<compile_context>
chip_gen: v7x
topology: tpu7x:2x2x1
jax: 0.10.0
libtpu: 0.0.40
codegen_flags: <defaults>
</compile_context>

<pallas_src>
import jax
import jax.numpy as jnp
from jax.experimental import pallas as pl
from jax.experimental.pallas import tpu as pltpu


def _full(shape):
    nd = len(shape)
    return pl.BlockSpec(tuple(int(s) for s in shape), lambda *_: (0,) * nd)


def _fit_tile(n, desired, quantum=8):
    """Largest tile <= desired that divides n and is a multiple of `quantum`."""
    if n <= quantum or n % quantum:
        # TODO(synk): for production N not 8-aligned, pad host-side instead of
        # falling back to a single full-extent block.
        return n
    d = max(quantum, (min(desired, n) // quantum) * quantum)
    while n % d:
        d -= quantum
    return d


# ----------------------------------------------------------------------------
# Kernel 1: per-graph (block-diagonal) pairwise distances + fused top-k.
# Grid: (graph, row-tile-in-graph).  The distance tile never leaves VMEM; the
# kernel emits only the [tm, k] global neighbor indices.
# ----------------------------------------------------------------------------
def _knn_kernel(xr_ref, xc_ref, sqr_ref, sqc_ref, o_ref):
    tm = xr_ref.shape[1]
    npg = xc_ref.shape[1]
    k = o_ref.shape[2]
    xr = xr_ref[0].astype(jnp.bfloat16)                     # bf16 MXU operands
    xc = xc_ref[0].astype(jnp.bfloat16)
    gram = jax.lax.dot_general(xr, xc, (((1,), (1,)), ((), ())),
                               preferred_element_type=jnp.float32)   # [tm, npg]
    d = sqr_ref[0] + sqc_ref[0] - 2.0 * gram                # f32 distances
    col = jax.lax.broadcasted_iota(jnp.int32, (tm, npg), 1)
    kcol = jax.lax.broadcasted_iota(jnp.int32, (tm, k), 1)
    base = pl.program_id(0) * npg                           # graph offset -> global ids
    idx_acc = jnp.zeros((tm, k), jnp.int32)
    vals = d
    # k is small & static -> unrolled iterative k-smallest selection (incl. self,
    # matching PyG knn(x, x, k) used inside DynamicEdgeConv).
    for j in range(k):
        row_min = jnp.min(vals, axis=1, keepdims=True)                      # [tm,1]
        sel = jnp.min(jnp.where(vals == row_min, col, npg),
                      axis=1, keepdims=True)                                # first argmin
        idx_acc = jnp.where(kcol == j, sel + base, idx_acc)
        vals = jnp.where(col == sel, jnp.float32(jnp.inf), vals)
    o_ref[0] = idx_acc
    # TODO(synk): for very large npg, stream column tiles with a running top-k
    # in VMEM scratch instead of holding the full [tm, npg] distance tile.


def knn_indices(feat, *, num_graphs, npg, k, tm):
    """feat: [N, F] (graphs contiguous, equal-sized). Returns [N, k] int32."""
    B = num_graphs
    N, F = feat.shape
    f32 = feat.astype(jnp.float32)
    sq = jnp.sum(f32 * f32, axis=1)                 # hoisted ||x||^2, computed once
    fg = feat.reshape(B, npg, F)
    sr = sq.reshape(B, npg, 1)
    sc = sq.reshape(B, 1, npg)
    idx = pl.pallas_call(
        _knn_kernel,
        out_shape=jax.ShapeDtypeStruct((B, npg, k), jnp.int32),
        grid=(B, npg // tm),
        in_specs=[
            pl.BlockSpec((1, tm, F), lambda g, i: (g, i, 0)),
            pl.BlockSpec((1, npg, F), lambda g, i: (g, 0, 0)),
            pl.BlockSpec((1, tm, 1), lambda g, i: (g, i, 0)),
            pl.BlockSpec((1, 1, npg), lambda g, i: (g, 0, 0)),
        ],
        out_specs=pl.BlockSpec((1, tm, k), lambda g, i: (g, i, 0)),
        compiler_params=pltpu.CompilerParams(
            dimension_semantics=("parallel", "parallel")),
    )(fg, fg, sr, sc)
    return idx.reshape(N, k)


# ----------------------------------------------------------------------------
# Kernel 2: EdgeConv with 3-layer MLP([2F,64,64,64]) and max aggregation.
# message_j = MLP([x_i, x_j - x_i]) = MLP1(x_i @ (Wa-Wb) + x_j @ Wb + b)...
# The k neighbor matmuls are stacked into a single (tm*k, F) MXU matmul.
# ----------------------------------------------------------------------------
def _edgeconv_mlp3_kernel(xc_ref, xn_ref, w1d_ref, w1b_ref, b1_ref, s1_ref,
                          t1_ref, w2_ref, b2_ref, s2_ref, t2_ref, w3_ref,
                          b3_ref, o_ref):
    tm, k, F = xn_ref.shape
    xc = xc_ref[...].astype(w1d_ref.dtype)
    # center-node part of layer 1 (weight difference folded at init time)
    base = jnp.dot(xc, w1d_ref[...],
                   preferred_element_type=jnp.float32) + b1_ref[...]    # [tm, 64]
    xn = xn_ref[...].reshape(tm * k, F)                                 # stacked neighbors
    h = jnp.dot(xn, w1b_ref[...], preferred_element_type=jnp.float32)   # [tm*k, 64]
    h = (h.reshape(tm, k, -1) + base.reshape(tm, 1, -1)).reshape(tm * k, -1)
    h = jnp.maximum(h * s1_ref[...] + t1_ref[...], 0.0)                 # folded BN + ReLU (f32)
    h = jnp.dot(h.astype(w2_ref.dtype), w2_ref[...],
                preferred_element_type=jnp.float32) + b2_ref[...]
    h = jnp.maximum(h * s2_ref[...] + t2_ref[...], 0.0)
    h = jnp.dot(h.astype(w3_ref.dtype), w3_ref[...],
                preferred_element_type=jnp.float32) + b3_ref[...]       # plain last layer
    o_ref[...] = jnp.max(h.reshape(tm, k, -1), axis=1).astype(o_ref.dtype)  # 'max' aggr


def edgeconv_mlp3(xc, xn, p, *, tm, out_dtype=jnp.bfloat16):
    N, F = xc.shape
    k = xn.shape[1]
    H = p["w3"].shape[1]
    return pl.pallas_call(
        _edgeconv_mlp3_kernel,
        out_shape=jax.ShapeDtypeStruct((N, H), out_dtype),
        grid=(N // tm,),
        in_specs=[
            pl.BlockSpec((tm, F), lambda i: (i, 0)),
            pl.BlockSpec((tm, k, F), lambda i: (i, 0, 0)),
            _full(p["w1d"].shape), _full(p["w1b"].shape), _full(p["b1"].shape),
            _full(p["s1"].shape), _full(p["t1"].shape),
            _full(p["w2"].shape), _full(p["b2"].shape),
            _full(p["s2"].shape), _full(p["t2"].shape),
            _full(p["w3"].shape), _full(p["b3"].shape),
        ],
        out_specs=pl.BlockSpec((tm, H), lambda i: (i, 0)),
        compiler_params=pltpu.CompilerParams(dimension_semantics=("parallel",)),
    )(xc, xn, p["w1d"], p["w1b"], p["b1"], p["s1"], p["t1"],
      p["w2"], p["b2"], p["s2"], p["t2"], p["w3"], p["b3"])


# ----------------------------------------------------------------------------
# Kernel 3: EdgeConv with single Linear(2*64, 128) and max aggregation (conv2).
# max_j (x_i @ (Wa-Wb) + x_j @ Wb + b) = base_i + max_j (x_j @ Wb)
# ----------------------------------------------------------------------------
def _edgeconv_lin_kernel(xc_ref, xn_ref, wd_ref, wb_ref, b_ref, o_ref):
    tm, k, F = xn_ref.shape
    xc = xc_ref[...].astype(wd_ref.dtype)
    base = jnp.dot(xc, wd_ref[...],
                   preferred_element_type=jnp.float32) + b_ref[...]     # [tm, 128]
    xn = xn_ref[...].reshape(tm * k, F)
    h = jnp.dot(xn, wb_ref[...], preferred_element_type=jnp.float32)    # [tm*k, 128]
    o_ref[...] = (base + jnp.max(h.reshape(tm, k, -1), axis=1)).astype(o_ref.dtype)


def edgeconv_lin(xc, xn, p, *, tm, out_dtype=jnp.bfloat16):
    N, F = xc.shape
    k = xn.shape[1]
    H = p["wb"].shape[1]
    return pl.pallas_call(
        _edgeconv_lin_kernel,
        out_shape=jax.ShapeDtypeStruct((N, H), out_dtype),
        grid=(N // tm,),
        in_specs=[
            pl.BlockSpec((tm, F), lambda i: (i, 0)),
            pl.BlockSpec((tm, k, F), lambda i: (i, 0, 0)),
            _full(p["wd"].shape), _full(p["wb"].shape), _full(p["b"].shape),
        ],
        out_specs=pl.BlockSpec((tm, H), lambda i: (i, 0)),
        compiler_params=pltpu.CompilerParams(dimension_semantics=("parallel",)),
    )(xc, xn, p["wd"], p["wb"], p["b"])


# ----------------------------------------------------------------------------
# Kernel 4: lin1(cat([x1,x2])) + global_max_pool + classification head, fused.
# Processes G graphs (contiguous equal-sized node blocks) per grid step.
# ----------------------------------------------------------------------------
def _lin1_pool_head_kernel(x1_ref, x2_ref, wa_ref, wb_ref, bl_ref,
                           w1_ref, b1_ref, s1_ref, t1_ref,
                           w2_ref, b2_ref, s2_ref, t2_ref,
                           w3_ref, b3_ref, o_ref):
    G = o_ref.shape[0]
    npg = x1_ref.shape[0] // G
    h = (jnp.dot(x1_ref[...].astype(wa_ref.dtype), wa_ref[...],
                 preferred_element_type=jnp.float32)
         + jnp.dot(x2_ref[...].astype(wb_ref.dtype), wb_ref[...],
                   preferred_element_type=jnp.float32)
         + bl_ref[...])                                                # [G*npg, 256]
    pooled = jnp.max(h.reshape(G, npg, -1), axis=1)                    # global_max_pool
    # classification head (tiny; rides in the MXU/VPU slack of the lin1 matmul)
    g = jnp.dot(pooled, w1_ref[...], preferred_element_type=jnp.float32) + b1_ref[...]
    g = jnp.maximum(g * s1_ref[...] + t1_ref[...], 0.0)
    # TODO(synk): dropout is identity in inference mode (not applied).
    g = jnp.dot(g, w2_ref[...], preferred_element_type=jnp.float32) + b2_ref[...]
    g = jnp.maximum(g * s2_ref[...] + t2_ref[...], 0.0)
    o_ref[...] = jnp.dot(g, w3_ref[...], preferred_element_type=jnp.float32) + b3_ref[...]


def _graphs_per_step(num_graphs, npg, rows_cap):
    cands = [g for g in range(1, num_graphs + 1)
             if num_graphs % g == 0
             and (g % 8 == 0 or g == num_graphs)           # legal (G, C) output block
             and ((g * npg) % 8 == 0 or g == num_graphs)]  # legal (G*npg, D) input block
    # prefer >=2 grid steps (keeps both v7x TensorCores busy), then max per-step work
    multi = [g for g in cands if num_graphs // g >= 2 and g * npg <= rows_cap]
    if multi:
        return max(multi)
    fit = [g for g in cands if g * npg <= rows_cap]
    return max(fit) if fit else min(cands)


def lin1_pool_head(x1, x2, p_lin, p_head, *, num_graphs, npg, rows_per_step=4096):
    N, D1 = x1.shape
    D2 = x2.shape[1]
    C = p_head["w3"].shape[1]
    G = _graphs_per_step(num_graphs, npg, rows_per_step)
    return pl.pallas_call(
        _lin1_pool_head_kernel,
        out_shape=jax.ShapeDtypeStruct((num_graphs, C), jnp.float32),
        grid=(num_graphs // G,),
        in_specs=[
            pl.BlockSpec((G * npg, D1), lambda g: (g, 0)),
            pl.BlockSpec((G * npg, D2), lambda g: (g, 0)),
            _full(p_lin["wa"].shape), _full(p_lin["wb"].shape), _full(p_lin["b"].shape),
            _full(p_head["w1"].shape), _full(p_head["b1"].shape),
            _full(p_head["s1"].shape), _full(p_head["t1"].shape),
            _full(p_head["w2"].shape), _full(p_head["b2"].shape),
            _full(p_head["s2"].shape), _full(p_head["t2"].shape),
            _full(p_head["w3"].shape), _full(p_head["b3"].shape),
        ],
        out_specs=pl.BlockSpec((G, C), lambda g: (g, 0)),
        compiler_params=pltpu.CompilerParams(dimension_semantics=("parallel",)),
    )(x1, x2, p_lin["wa"], p_lin["wb"], p_lin["b"],
      p_head["w1"], p_head["b1"], p_head["s1"], p_head["t1"],
      p_head["w2"], p_head["b2"], p_head["s2"], p_head["t2"],
      p_head["w3"], p_head["b3"])


# ----------------------------------------------------------------------------
# Parameter init (deterministic, synthetic) — kernel-ready layout:
# weight differences folded for the center-node term, MXU weights in bf16,
# biases / folded batch-norm scale-shift in f32.
# ----------------------------------------------------------------------------
def _dense(key, fan_in, fan_out):
    kw, kb = jax.random.split(key)
    lim = 1.0 / (float(fan_in) ** 0.5)
    w = jax.random.uniform(kw, (fan_in, fan_out), jnp.float32, -lim, lim)
    b = jax.random.uniform(kb, (1, fan_out), jnp.float32, -lim, lim)
    return w, b


def _bn_fold(key, dim, eps=1e-5):
    k1, k2, k3 = jax.random.split(key, 3)
    gamma = 1.0 + 0.1 * jax.random.normal(k1, (1, dim), jnp.float32)
    beta = 0.1 * jax.random.normal(k2, (1, dim), jnp.float32)
    mean = 0.1 * jax.random.normal(k3, (1, dim), jnp.float32)
    var = jnp.ones((1, dim), jnp.float32)
    scale = gamma / jnp.sqrt(var + eps)
    shift = beta - mean * scale
    return scale, shift


def init_params(key, in_feat, num_classes, *, mxu_dtype=jnp.bfloat16):
    ks = jax.random.split(key, 12)
    p = {}
    # conv1: DynamicEdgeConv(MLP([2*in_feat, 64, 64, 64])), last layer plain
    w1, b1 = _dense(ks[0], 2 * in_feat, 64)
    s1, t1 = _bn_fold(ks[1], 64)
    w2, b2 = _dense(ks[2], 64, 64)
    s2, t2 = _bn_fold(ks[3], 64)
    w3, b3 = _dense(ks[4], 64, 64)
    w1a, w1b = w1[:in_feat], w1[in_feat:]
    p["c1"] = dict(w1d=(w1a - w1b).astype(mxu_dtype),     # folded center weight
                   w1b=w1b.astype(mxu_dtype), b1=b1, s1=s1, t1=t1,
                   w2=w2.astype(mxu_dtype), b2=b2, s2=s2, t2=t2,
                   w3=w3.astype(mxu_dtype), b3=b3)
    # conv2: DynamicEdgeConv(MLP([2*64, 128])) -> single plain Linear(128, 128)
    wc, bc = _dense(ks[5], 128, 128)
    wa, wb = wc[:64], wc[64:]
    p["c2"] = dict(wd=(wa - wb).astype(mxu_dtype), wb=wb.astype(mxu_dtype), b=bc)
    # lin1: Linear(128 + 64, 256) applied to cat([x1, x2])
    wl, bl = _dense(ks[6], 192, 256)
    p["lin1"] = dict(wa=wl[:64].astype(mxu_dtype), wb=wl[64:].astype(mxu_dtype), b=bl)
    # head: MLP([256, 128, 64, num_classes], dropout, batch_norm), last plain
    wh1, bh1 = _dense(ks[7], 256, 128)
    sh1, th1 = _bn_fold(ks[8], 128)
    wh2, bh2 = _dense(ks[9], 128, 64)
    sh2, th2 = _bn_fold(ks[10], 64)
    wh3, bh3 = _dense(ks[11], 64, num_classes)
    p["head"] = dict(w1=wh1, b1=bh1, s1=sh1, t1=th1,
                     w2=wh2, b2=bh2, s2=sh2, t2=th2, w3=wh3, b3=bh3)
    return p


# ----------------------------------------------------------------------------
# Full forward pass (graphs are contiguous equal-sized blocks of npg nodes).
# ----------------------------------------------------------------------------
def dyedcnn_forward(x, batch, params, *, k, num_graphs,
                    tile_nodes=512, rows_per_step=4096):
    N, F = x.shape
    npg = N // num_graphs
    assert N == num_graphs * npg
    assert k <= npg, "k must not exceed nodes per graph"
    del batch  # graphs are contiguous equal-sized blocks; the batch-id array is implicit
    # TODO(synk): variable-size graphs would need host-side padding to a common
    # npg with sentinel rows (masked out of the kNN and the pooled max).
    tm_g = _fit_tile(npg, min(256, max(8, npg // 2)))      # kNN row tile (per graph)
    tm_n = _fit_tile(N, min(tile_nodes, max(8, N // 2)))   # EdgeConv node tile
    mxu_dtype = params["c1"]["w1b"].dtype

    # conv1: block-diagonal kNN (top-k fused in-kernel), EdgeConv(MLP3) + max aggr
    x_mxu = x.astype(mxu_dtype)                                     # bf16 before gather
    idx1 = knn_indices(x_mxu, num_graphs=num_graphs, npg=npg, k=k, tm=tm_g)   # [N, k]
    # TODO(synk): fuse this gather into the EdgeConv kernel (per-graph VMEM slab
    # + scalar-prefetched indices) to drop the [N,k,F] HBM round trip entirely.
    xn1 = x_mxu[idx1]                                               # [N, k, F] bf16
    x1 = edgeconv_mlp3(x_mxu, xn1, params["c1"], tm=tm_n)           # [N, 64] bf16

    # conv2: kNN recomputed on x1 features, EdgeConv(Linear) + max aggr
    idx2 = knn_indices(x1, num_graphs=num_graphs, npg=npg, k=k, tm=tm_g)
    xn2 = x1[idx2]                                                  # [N, k, 64] bf16
    x2 = edgeconv_lin(x1, xn2, params["c2"], tm=tm_n)               # [N, 128] bf16

    # lin1(cat([x1, x2])) + global_max_pool + classification head, fused
    return lin1_pool_head(x1, x2, params["lin1"], params["head"],
                          num_graphs=num_graphs, npg=npg,
                          rows_per_step=rows_per_step)              # [B, num_classes]


if __name__ == "__main__":
    B, NPG, IN_FEAT, K, NUM_CLASSES = 4, 16, 8, 8, 4   # k scaled down from 35 (npg=16)
    N = B * NPG
    key = jax.random.PRNGKey(0)
    kx, kp = jax.random.split(key)
    x = jax.random.normal(kx, (N, IN_FEAT), jnp.float32)
    batch = jnp.repeat(jnp.arange(B, dtype=jnp.int32), NPG)        # contiguous graphs
    params = init_params(kp, IN_FEAT, NUM_CLASSES)

    fwd = jax.jit(dyedcnn_forward,
                  static_argnames=("k", "num_graphs", "tile_nodes", "rows_per_step"))
    out = fwd(x, batch, params, k=K, num_graphs=B)
    out = jax.block_until_ready(out)
    assert out.shape == (B, NUM_CLASSES), out.shape
    assert bool(jnp.all(jnp.isfinite(out)))
    print("KERNEL_OK")
</pallas_src>

<mosaic_0001>
module attributes {stable_mosaic.version = 11 : i64} {
  func.func @_knn_kernel(%arg0: i32, %arg1: i32, %arg2: memref<1x8x8xbf16, #tpu.memory_space<vmem>>, %arg3: memref<1x16x8xbf16, #tpu.memory_space<vmem>>, %arg4: memref<1x8x1xf32, #tpu.memory_space<vmem>>, %arg5: memref<1x1x16xf32, #tpu.memory_space<vmem>>, %arg6: memref<1x8x8xi32, #tpu.memory_space<vmem>>) attributes {dimension_semantics = [#tpu.dimension_semantics<parallel>, #tpu.dimension_semantics<parallel>], iteration_bounds = array<i64: 4, 2>, scalar_prefetch = 0 : i64, scratch_operands = 0 : i64, tpu.core_type = #tpu.core_type<tc>, window_params = [{transform_indices = @transform_0, window_bounds = array<i64: 1, 8, 8>}, {transform_indices = @transform_1, window_bounds = array<i64: 1, 16, 8>}, {transform_indices = @transform_2, window_bounds = array<i64: 1, 8, 1>}, {transform_indices = @transform_3, window_bounds = array<i64: 1, 1, 16>}, {transform_indices = @transform_4, window_bounds = array<i64: 1, 8, 8>}]} {
    %c0 = arith.constant 0 : index
    %c0_0 = arith.constant 0 : index
    %c0_1 = arith.constant 0 : index
    %0 = vector.load %arg2[%c0, %c0_0, %c0_1] : memref<1x8x8xbf16, #tpu.memory_space<vmem>>, vector<1x8x8xbf16>
    %1 = vector.shape_cast %0 : vector<1x8x8xbf16> to vector<8x8xbf16>
    %c0_2 = arith.constant 0 : index
    %c0_3 = arith.constant 0 : index
    %c0_4 = arith.constant 0 : index
    %2 = vector.load %arg3[%c0_2, %c0_3, %c0_4] : memref<1x16x8xbf16, #tpu.memory_space<vmem>>, vector<1x16x8xbf16>
    %3 = vector.shape_cast %2 : vector<1x16x8xbf16> to vector<16x8xbf16>
    %cst = arith.constant dense<0.000000e+00> : vector<8x16xf32>
    %4 = tpu.matmul %1, %3, %cst {dimension_numbers = #tpu.dot_dimension_numbers<[1], [1], [0], [0], [0, 0, 1, 0], [], []>} : vector<8x8xbf16>, vector<16x8xbf16>, vector<8x16xf32> -> vector<8x16xf32>
    %c0_5 = arith.constant 0 : index
    %c0_6 = arith.constant 0 : index
    %c0_7 = arith.constant 0 : index
    %5 = vector.load %arg4[%c0_5, %c0_6, %c0_7] : memref<1x8x1xf32, #tpu.memory_space<vmem>>, vector<1x8x1xf32>
    %6 = vector.shape_cast %5 : vector<1x8x1xf32> to vector<8x1xf32>
    %c0_8 = arith.constant 0 : index
    %c0_9 = arith.constant 0 : index
    %c0_10 = arith.constant 0 : index
    %7 = vector.load %arg5[%c0_8, %c0_9, %c0_10] : memref<1x1x16xf32, #tpu.memory_space<vmem>>, vector<1x1x16xf32>
    %8 = vector.shape_cast %7 : vector<1x1x16xf32> to vector<1x16xf32>
    %9 = vector.broadcast %6 : vector<8x1xf32> to vector<8x16xf32>
    %10 = vector.broadcast %8 : vector<1x16xf32> to vector<8x16xf32>
    %11 = arith.addf %9, %10 : vector<8x16xf32>
    %cst_11 = arith.constant 2.000000e+00 : f32
    %12 = vector.broadcast %cst_11 : f32 to vector<8x16xf32>
    %13 = arith.mulf %12, %4 : vector<8x16xf32>
    %14 = arith.subf %11, %13 : vector<8x16xf32>
    %15 = tpu.iota {dimensions = array<i32: 1>} : vector<8x16xi32>
    %16 = tpu.iota {dimensions = array<i32: 1>} : vector<8x8xi32>
    %c16_i32 = arith.constant 16 : i32
    %17 = arith.muli %arg0, %c16_i32 : i32
    %c0_i32 = arith.constant 0 : i32
    %18 = vector.broadcast %c0_i32 : i32 to vector<8x8xi32>
    %cst_12 = arith.constant dense<0x7F800000> : vector<8xf32>
    %19 = vector.multi_reduction <minimumf>, %14, %cst_12 [1] : vector<8x16xf32> to vector<8xf32>
    %20 = vector.shape_cast %19 : vector<8xf32> to vector<8x1xf32>
    %21 = vector.broadcast %20 : vector<8x1xf32> to vector<8x16xf32>
    %22 = arith.cmpf oeq, %14, %21 : vector<8x16xf32>
    %c16_i32_13 = arith.constant 16 : i32
    %23 = vector.broadcast %c16_i32_13 : i32 to vector<8x16xi32>
    %24 = arith.select %22, %15, %23 : vector<8x16xi1>, vector<8x16xi32>
    %cst_14 = arith.constant dense<2147483647> : vector<8xi32>
    %25 = vector.multi_reduction <minsi>, %24, %cst_14 [1] : vector<8x16xi32> to vector<8xi32>
    %26 = vector.shape_cast %25 : vector<8xi32> to vector<8x1xi32>
    %c0_i32_15 = arith.constant 0 : i32
    %27 = vector.broadcast %c0_i32_15 : i32 to vector<8x8xi32>
    %28 = arith.cmpi eq, %16, %27 : vector<8x8xi32>
    %29 = vector.broadcast %17 : i32 to vector<8x1xi32>
    %30 = arith.addi %26, %29 : vector<8x1xi32>
    %31 = vector.shape_cast %30 : vector<8x1xi32> to vector<8x1xi32>
    %32 = vector.broadcast %31 : vector<8x1xi32> to vector<8x8xi32>
    %33 = arith.select %28, %32, %18 : vector<8x8xi1>, vector<8x8xi32>
    %34 = vector.broadcast %26 : vector<8x1xi32> to vector<8x16xi32>
    %35 = arith.cmpi eq, %15, %34 : vector<8x16xi32>
    %cst_16 = arith.constant 0x7F800000 : f32
    %36 = vector.broadcast %cst_16 : f32 to vector<8x16xf32>
    %37 = arith.select %35, %36, %14 : vector<8x16xi1>, vector<8x16xf32>
    %cst_17 = arith.constant dense<0x7F800000> : vector<8xf32>
    %38 = vector.multi_reduction <minimumf>, %37, %cst_17 [1] : vector<8x16xf32> to vector<8xf32>
    %39 = vector.shape_cast %38 : vector<8xf32> to vector<8x1xf32>
    %40 = vector.broadcast %39 : vector<8x1xf32> to vector<8x16xf32>
    %41 = arith.cmpf oeq, %37, %40 : vector<8x16xf32>
    %c16_i32_18 = arith.constant 16 : i32
    %42 = vector.broadcast %c16_i32_18 : i32 to vector<8x16xi32>
    %43 = arith.select %41, %15, %42 : vector<8x16xi1>, vector<8x16xi32>
    %cst_19 = arith.constant dense<2147483647> : vector<8xi32>
    %44 = vector.multi_reduction <minsi>, %43, %cst_19 [1] : vector<8x16xi32> to vector<8xi32>
    %45 = vector.shape_cast %44 : vector<8xi32> to vector<8x1xi32>
    %c1_i32 = arith.constant 1 : i32
    %46 = vector.broadcast %c1_i32 : i32 to vector<8x8xi32>
    %47 = arith.cmpi eq, %16, %46 : vector<8x8xi32>
    %48 = vector.broadcast %17 : i32 to vector<8x1xi32>
    %49 = arith.addi %45, %48 : vector<8x1xi32>
    %50 = vector.shape_cast %49 : vector<8x1xi32> to vector<8x1xi32>
    %51 = vector.broadcast %50 : vector<8x1xi32> to vector<8x8xi32>
    %52 = arith.select %47, %51, %33 : vector<8x8xi1>, vector<8x8xi32>
    %53 = vector.broadcast %45 : vector<8x1xi32> to vector<8x16xi32>
    %54 = arith.cmpi eq, %15, %53 : vector<8x16xi32>
    %cst_20 = arith.constant 0x7F800000 : f32
    %55 = vector.broadcast %cst_20 : f32 to vector<8x16xf32>
    %56 = arith.select %54, %55, %37 : vector<8x16xi1>, vector<8x16xf32>
    %cst_21 = arith.constant dense<0x7F800000> : vector<8xf32>
    %57 = vector.multi_reduction <minimumf>, %56, %cst_21 [1] : vector<8x16xf32> to vector<8xf32>
    %58 = vector.shape_cast %57 : vector<8xf32> to vector<8x1xf32>
    %59 = vector.broadcast %58 : vector<8x1xf32> to vector<8x16xf32>
    %60 = arith.cmpf oeq, %56, %59 : vector<8x16xf32>
    %c16_i32_22 = arith.constant 16 : i32
    %61 = vector.broadcast %c16_i32_22 : i32 to vector<8x16xi32>
    %62 = arith.select %60, %15, %61 : vector<8x16xi1>, vector<8x16xi32>
    %cst_23 = arith.constant dense<2147483647> : vector<8xi32>
    %63 = vector.multi_reduction <minsi>, %62, %cst_23 [1] : vector<8x16xi32> to vector<8xi32>
    %64 = vector.shape_cast %63 : vector<8xi32> to vector<8x1xi32>
    %c2_i32 = arith.constant 2 : i32
    %65 = vector.broadcast %c2_i32 : i32 to vector<8x8xi32>
    %66 = arith.cmpi eq, %16, %65 : vector<8x8xi32>
    %67 = vector.broadcast %17 : i32 to vector<8x1xi32>
    %68 = arith.addi %64, %67 : vector<8x1xi32>
    %69 = vector.shape_cast %68 : vector<8x1xi32> to vector<8x1xi32>
    %70 = vector.broadcast %69 : vector<8x1xi32> to vector<8x8xi32>
    %71 = arith.select %66, %70, %52 : vector<8x8xi1>, vector<8x8xi32>
    %72 = vector.broadcast %64 : vector<8x1xi32> to vector<8x16xi32>
    %73 = arith.cmpi eq, %15, %72 : vector<8x16xi32>
    %cst_24 = arith.constant 0x7F800000 : f32
    %74 = vector.broadcast %cst_24 : f32 to vector<8x16xf32>
    %75 = arith.select %73, %74, %56 : vector<8x16xi1>, vector<8x16xf32>
    %cst_25 = arith.constant dense<0x7F800000> : vector<8xf32>
    %76 = vector.multi_reduction <minimumf>, %75, %cst_25 [1] : vector<8x16xf32> to vector<8xf32>
    %77 = vector.shape_cast %76 : vector<8xf32> to vector<8x1xf32>
    %78 = vector.broadcast %77 : vector<8x1xf32> to vector<8x16xf32>
    %79 = arith.cmpf oeq, %75, %78 : vector<8x16xf32>
    %c16_i32_26 = arith.constant 16 : i32
    %80 = vector.broadcast %c16_i32_26 : i32 to vector<8x16xi32>
    %81 = arith.select %79, %15, %80 : vector<8x16xi1>, vector<8x16xi32>
    %cst_27 = arith.constant dense<2147483647> : vector<8xi32>
    %82 = vector.multi_reduction <minsi>, %81, %cst_27 [1] : vector<8x16xi32> to vector<8xi32>
    %83 = vector.shape_cast %82 : vector<8xi32> to vector<8x1xi32>
    %c3_i32 = arith.constant 3 : i32
    %84 = vector.broadcast %c3_i32 : i32 to vector<8x8xi32>
    %85 = arith.cmpi eq, %16, %84 : vector<8x8xi32>
    %86 = vector.broadcast %17 : i32 to vector<8x1xi32>
    %87 = arith.addi %83, %86 : vector<8x1xi32>
    %88 = vector.shape_cast %87 : vector<8x1xi32> to vector<8x1xi32>
    %89 = vector.broadcast %88 : vector<8x1xi32> to vector<8x8xi32>
    %90 = arith.select %85, %89, %71 : vector<8x8xi1>, vector<8x8xi32>
    %91 = vector.broadcast %83 : vector<8x1xi32> to vector<8x16xi32>
    %92 = arith.cmpi eq, %15, %91 : vector<8x16xi32>
    %cst_28 = arith.constant 0x7F800000 : f32
    %93 = vector.broadcast %cst_28 : f32 to vector<8x16xf32>
    %94 = arith.select %92, %93, %75 : vector<8x16xi1>, vector<8x16xf32>
    %cst_29 = arith.constant dense<0x7F800000> : vector<8xf32>
    %95 = vector.multi_reduction <minimumf>, %94, %cst_29 [1] : vector<8x16xf32> to vector<8xf32>
    %96 = vector.shape_cast %95 : vector<8xf32> to vector<8x1xf32>
    %97 = vector.broadcast %96 : vector<8x1xf32> to vector<8x16xf32>
    %98 = arith.cmpf oeq, %94, %97 : vector<8x16xf32>
    %c16_i32_30 = arith.constant 16 : i32
    %99 = vector.broadcast %c16_i32_30 : i32 to vector<8x16xi32>
    %100 = arith.select %98, %15, %99 : vector<8x16xi1>, vector<8x16xi32>
    %cst_31 = arith.constant dense<2147483647> : vector<8xi32>
    %101 = vector.multi_reduction <minsi>, %100, %cst_31 [1] : vector<8x16xi32> to vector<8xi32>
    %102 = vector.shape_cast %101 : vector<8xi32> to vector<8x1xi32>
    %c4_i32 = arith.constant 4 : i32
    %103 = vector.broadcast %c4_i32 : i32 to vector<8x8xi32>
    %104 = arith.cmpi eq, %16, %103 : vector<8x8xi32>
    %105 = vector.broadcast %17 : i32 to vector<8x1xi32>
    %106 = arith.addi %102, %105 : vector<8x1xi32>
    %107 = vector.shape_cast %106 : vector<8x1xi32> to vector<8x1xi32>
    %108 = vector.broadcast %107 : vector<8x1xi32> to vector<8x8xi32>
    %109 = arith.select %104, %108, %90 : vector<8x8xi1>, vector<8x8xi32>
    %110 = vector.broadcast %102 : vector<8x1xi32> to vector<8x16xi32>
    %111 = arith.cmpi eq, %15, %110 : vector<8x16xi32>
    %cst_32 = arith.constant 0x7F800000 : f32
    %112 = vector.broadcast %cst_32 : f32 to vector<8x16xf32>
    %113 = arith.select %111, %112, %94 : vector<8x16xi1>, vector<8x16xf32>
    %cst_33 = arith.constant dense<0x7F800000> : vector<8xf32>
    %114 = vector.multi_reduction <minimumf>, %113, %cst_33 [1] : vector<8x16xf32> to vector<8xf32>
    %115 = vector.shape_cast %114 : vector<8xf32> to vector<8x1xf32>
    %116 = vector.broadcast %115 : vector<8x1xf32> to vector<8x16xf32>
    %117 = arith.cmpf oeq, %113, %116 : vector<8x16xf32>
    %c16_i32_34 = arith.constant 16 : i32
    %118 = vector.broadcast %c16_i32_34 : i32 to vector<8x16xi32>
    %119 = arith.select %117, %15, %118 : vector<8x16xi1>, vector<8x16xi32>
    %cst_35 = arith.constant dense<2147483647> : vector<8xi32>
    %120 = vector.multi_reduction <minsi>, %119, %cst_35 [1] : vector<8x16xi32> to vector<8xi32>
    %121 = vector.shape_cast %120 : vector<8xi32> to vector<8x1xi32>
    %c5_i32 = arith.constant 5 : i32
    %122 = vector.broadcast %c5_i32 : i32 to vector<8x8xi32>
    %123 = arith.cmpi eq, %16, %122 : vector<8x8xi32>
    %124 = vector.broadcast %17 : i32 to vector<8x1xi32>
    %125 = arith.addi %121, %124 : vector<8x1xi32>
    %126 = vector.shape_cast %125 : vector<8x1xi32> to vector<8x1xi32>
    %127 = vector.broadcast %126 : vector<8x1xi32> to vector<8x8xi32>
    %128 = arith.select %123, %127, %109 : vector<8x8xi1>, vector<8x8xi32>
    %129 = vector.broadcast %121 : vector<8x1xi32> to vector<8x16xi32>
    %130 = arith.cmpi eq, %15, %129 : vector<8x16xi32>
    %cst_36 = arith.constant 0x7F800000 : f32
    %131 = vector.broadcast %cst_36 : f32 to vector<8x16xf32>
    %132 = arith.select %130, %131, %113 : vector<8x16xi1>, vector<8x16xf32>
    %cst_37 = arith.constant dense<0x7F800000> : vector<8xf32>
    %133 = vector.multi_reduction <minimumf>, %132, %cst_37 [1] : vector<8x16xf32> to vector<8xf32>
    %134 = vector.shape_cast %133 : vector<8xf32> to vector<8x1xf32>
    %135 = vector.broadcast %134 : vector<8x1xf32> to vector<8x16xf32>
    %136 = arith.cmpf oeq, %132, %135 : vector<8x16xf32>
    %c16_i32_38 = arith.constant 16 : i32
    %137 = vector.broadcast %c16_i32_38 : i32 to vector<8x16xi32>
    %138 = arith.select %136, %15, %137 : vector<8x16xi1>, vector<8x16xi32>
    %cst_39 = arith.constant dense<2147483647> : vector<8xi32>
    %139 = vector.multi_reduction <minsi>, %138, %cst_39 [1] : vector<8x16xi32> to vector<8xi32>
    %140 = vector.shape_cast %139 : vector<8xi32> to vector<8x1xi32>
    %c6_i32 = arith.constant 6 : i32
    %141 = vector.broadcast %c6_i32 : i32 to vector<8x8xi32>
    %142 = arith.cmpi eq, %16, %141 : vector<8x8xi32>
    %143 = vector.broadcast %17 : i32 to vector<8x1xi32>
    %144 = arith.addi %140, %143 : vector<8x1xi32>
    %145 = vector.shape_cast %144 : vector<8x1xi32> to vector<8x1xi32>
    %146 = vector.broadcast %145 : vector<8x1xi32> to vector<8x8xi32>
    %147 = arith.select %142, %146, %128 : vector<8x8xi1>, vector<8x8xi32>
    %148 = vector.broadcast %140 : vector<8x1xi32> to vector<8x16xi32>
    %149 = arith.cmpi eq, %15, %148 : vector<8x16xi32>
    %cst_40 = arith.constant 0x7F800000 : f32
    %150 = vector.broadcast %cst_40 : f32 to vector<8x16xf32>
    %151 = arith.select %149, %150, %132 : vector<8x16xi1>, vector<8x16xf32>
    %cst_41 = arith.constant dense<0x7F800000> : vector<8xf32>
    %152 = vector.multi_reduction <minimumf>, %151, %cst_41 [1] : vector<8x16xf32> to vector<8xf32>
    %153 = vector.shape_cast %152 : vector<8xf32> to vector<8x1xf32>
    %154 = vector.broadcast %153 : vector<8x1xf32> to vector<8x16xf32>
    %155 = arith.cmpf oeq, %151, %154 : vector<8x16xf32>
    %c16_i32_42 = arith.constant 16 : i32
    %156 = vector.broadcast %c16_i32_42 : i32 to vector<8x16xi32>
    %157 = arith.select %155, %15, %156 : vector<8x16xi1>, vector<8x16xi32>
    %cst_43 = arith.constant dense<2147483647> : vector<8xi32>
    %158 = vector.multi_reduction <minsi>, %157, %cst_43 [1] : vector<8x16xi32> to vector<8xi32>
    %159 = vector.shape_cast %158 : vector<8xi32> to vector<8x1xi32>
    %c7_i32 = arith.constant 7 : i32
    %160 = vector.broadcast %c7_i32 : i32 to vector<8x8xi32>
    %161 = arith.cmpi eq, %16, %160 : vector<8x8xi32>
    %162 = vector.broadcast %17 : i32 to vector<8x1xi32>
    %163 = arith.addi %159, %162 : vector<8x1xi32>
    %164 = vector.shape_cast %163 : vector<8x1xi32> to vector<8x1xi32>
    %165 = vector.broadcast %164 : vector<8x1xi32> to vector<8x8xi32>
    %166 = arith.select %161, %165, %147 : vector<8x8xi1>, vector<8x8xi32>
    %c0_44 = arith.constant 0 : index
    %c0_45 = arith.constant 0 : index
    %c0_46 = arith.constant 0 : index
    %167 = vector.load %arg6[%c0_44, %c0_45, %c0_46] : memref<1x8x8xi32, #tpu.memory_space<vmem>>, vector<1x8x8xi32>
    %168 = vector.shape_cast %167 : vector<1x8x8xi32> to vector<8x8xi32>
    %169 = vector.shape_cast %166 : vector<8x8xi32> to vector<1x8x8xi32>
    tpu.vector_store %arg6[%c0_44, %c0_45, %c0_46], %169 {strides = array<i32>} : memref<1x8x8xi32, #tpu.memory_space<vmem>>, vector<1x8x8xi32>,
    return
  }
  func.func @transform_0(%arg0: i32, %arg1: i32) -> (i32, i32, i32) {
    %c0_i32 = arith.constant 0 : i32
    %c0_i32_0 = arith.constant 0 : i32
    return %arg0, %arg1, %c0_i32 : i32, i32, i32
  }
  func.func @transform_1(%arg0: i32, %arg1: i32) -> (i32, i32, i32) {
    %c0_i32 = arith.constant 0 : i32
    %c0_i32_0 = arith.constant 0 : i32
    %c0_i32_1 = arith.constant 0 : i32
    return %arg0, %c0_i32, %c0_i32_0 : i32, i32, i32
  }
  func.func @transform_2(%arg0: i32, %arg1: i32) -> (i32, i32, i32) {
    %c0_i32 = arith.constant 0 : i32
    %c0_i32_0 = arith.constant 0 : i32
    return %arg0, %arg1, %c0_i32 : i32, i32, i32
  }
  func.func @transform_3(%arg0: i32, %arg1: i32) -> (i32, i32, i32) {
    %c0_i32 = arith.constant 0 : i32
    %c0_i32_0 = arith.constant 0 : i32
    %c0_i32_1 = arith.constant 0 : i32
    return %arg0, %c0_i32, %c0_i32_0 : i32, i32, i32
  }
  func.func @transform_4(%arg0: i32, %arg1: i32) -> (i32, i32, i32) {
    %c0_i32 = arith.constant 0 : i32
    %c0_i32_0 = arith.constant 0 : i32
    return %arg0, %arg1, %c0_i32 : i32, i32, i32
  }
}

module attributes {stable_mosaic.version = 11 : i64} {
  func.func @_edgeconv_mlp3_kernel(%arg0: i32, %arg1: memref<32x8xbf16, #tpu.memory_space<vmem>>, %arg2: memref<32x8x8xbf16, #tpu.memory_space<vmem>>, %arg3: memref<8x64xbf16, #tpu.memory_space<vmem>>, %arg4: memref<8x64xbf16, #tpu.memory_space<vmem>>, %arg5: memref<1x64xf32, #tpu.memory_space<vmem>>, %arg6: memref<1x64xf32, #tpu.memory_space<vmem>>, %arg7: memref<1x64xf32, #tpu.memory_space<vmem>>, %arg8: memref<64x64xbf16, #tpu.memory_space<vmem>>, %arg9: memref<1x64xf32, #tpu.memory_space<vmem>>, %arg10: memref<1x64xf32, #tpu.memory_space<vmem>>, %arg11: memref<1x64xf32, #tpu.memory_space<vmem>>, %arg12: memref<64x64xbf16, #tpu.memory_space<vmem>>, %arg13: memref<1x64xf32, #tpu.memory_space<vmem>>, %arg14: memref<32x64xbf16, #tpu.memory_space<vmem>>) attributes {dimension_semantics = [#tpu.dimension_semantics<parallel>], iteration_bounds = array<i64: 2>, scalar_prefetch = 0 : i64, scratch_operands = 0 : i64, tpu.core_type = #tpu.core_type<tc>, window_params = [{transform_indices = @transform_0, window_bounds = array<i64: 32, 8>}, {transform_indices = @transform_1, window_bounds = array<i64: 32, 8, 8>}, {pipeline_mode = #tpu.pipeline_mode<synchronous>, transform_indices = @transform_2, window_bounds = array<i64: 8, 64>}, {pipeline_mode = #tpu.pipeline_mode<synchronous>, transform_indices = @transform_3, window_bounds = array<i64: 8, 64>}, {pipeline_mode = #tpu.pipeline_mode<synchronous>, transform_indices = @transform_4, window_bounds = array<i64: 1, 64>}, {pipeline_mode = #tpu.pipeline_mode<synchronous>, transform_indices = @transform_5, window_bounds = array<i64: 1, 64>}, {pipeline_mode = #tpu.pipeline_mode<synchronous>, transform_indices = @transform_6, window_bounds = array<i64: 1, 64>}, {pipeline_mode = #tpu.pipeline_mode<synchronous>, transform_indices = @transform_7, window_bounds = array<i64: 64, 64>}, {pipeline_mode = #tpu.pipeline_mode<synchronous>, transform_indices = @transform_8, window_bounds = array<i64: 1, 64>}, {pipeline_mode = #tpu.pipeline_mode<synchronous>, transform_indices = @transform_9, window_bounds = array<i64: 1, 64>}, {pipeline_mode = #tpu.pipeline_mode<synchronous>, transform_indices = @transform_10, window_bounds = array<i64: 1, 64>}, {pipeline_mode = #tpu.pipeline_mode<synchronous>, transform_indices = @transform_11, window_bounds = array<i64: 64, 64>}, {pipeline_mode = #tpu.pipeline_mode<synchronous>, transform_indices = @transform_12, window_bounds = array<i64: 1, 64>}, {transform_indices = @transform_13, window_bounds = array<i64: 32, 64>}]} {
    %c0 = arith.constant 0 : index
    %c0_0 = arith.constant 0 : index
    %0 = vector.load %arg1[%c0, %c0_0] : memref<32x8xbf16, #tpu.memory_space<vmem>>, vector<32x8xbf16>
    %c0_1 = arith.constant 0 : index
    %c0_2 = arith.constant 0 : index
    %1 = vector.load %arg3[%c0_1, %c0_2] : memref<8x64xbf16, #tpu.memory_space<vmem>>, vector<8x64xbf16>
    %cst = arith.constant dense<0.000000e+00> : vector<32x64xf32>
    %2 = tpu.matmul %0, %1, %cst {dimension_numbers = #tpu.dot_dimension_numbers<[1], [0], [0], [1], [0, 0, 1, 1], [], []>} : vector<32x8xbf16>, vector<8x64xbf16>, vector<32x64xf32> -> vector<32x64xf32>
    %c0_3 = arith.constant 0 : index
    %c0_4 = arith.constant 0 : index
    %3 = vector.load %arg5[%c0_3, %c0_4] : memref<1x64xf32, #tpu.memory_space<vmem>>, vector<1x64xf32>
    %4 = vector.broadcast %3 : vector<1x64xf32> to vector<32x64xf32>
    %5 = arith.addf %2, %4 : vector<32x64xf32>
    %c0_5 = arith.constant 0 : index
    %c0_6 = arith.constant 0 : index
    %c0_7 = arith.constant 0 : index
    %6 = vector.load %arg2[%c0_5, %c0_6, %c0_7] : memref<32x8x8xbf16, #tpu.memory_space<vmem>>, vector<32x8x8xbf16>
    %7 = vector.shape_cast %6 : vector<32x8x8xbf16> to vector<256x8xbf16>
    %c0_8 = arith.constant 0 : index
    %c0_9 = arith.constant 0 : index
    %8 = vector.load %arg4[%c0_8, %c0_9] : memref<8x64xbf16, #tpu.memory_space<vmem>>, vector<8x64xbf16>
    %cst_10 = arith.constant dense<0.000000e+00> : vector<256x64xf32>
    %9 = tpu.matmul %7, %8, %cst_10 {dimension_numbers = #tpu.dot_dimension_numbers<[1], [0], [0], [1], [0, 0, 1, 1], [], []>} : vector<256x8xbf16>, vector<8x64xbf16>, vector<256x64xf32> -> vector<256x64xf32>
    %10 = vector.shape_cast %9 : vector<256x64xf32> to vector<32x8x64xf32>
    %11 = vector.shape_cast %5 : vector<32x64xf32> to vector<32x1x64xf32>
    %12 = vector.broadcast %11 : vector<32x1x64xf32> to vector<32x8x64xf32>
    %13 = arith.addf %10, %12 : vector<32x8x64xf32>
    %14 = vector.shape_cast %13 : vector<32x8x64xf32> to vector<256x64xf32>
    %c0_11 = arith.constant 0 : index
    %c0_12 = arith.constant 0 : index
    %15 = vector.load %arg6[%c0_11, %c0_12] : memref<1x64xf32, #tpu.memory_space<vmem>>, vector<1x64xf32>
    %16 = vector.broadcast %15 : vector<1x64xf32> to vector<256x64xf32>
    %17 = arith.mulf %14, %16 : vector<256x64xf32>
    %c0_13 = arith.constant 0 : index
    %c0_14 = arith.constant 0 : index
    %18 = vector.load %arg7[%c0_13, %c0_14] : memref<1x64xf32, #tpu.memory_space<vmem>>, vector<1x64xf32>
    %19 = vector.broadcast %18 : vector<1x64xf32> to vector<256x64xf32>
    %20 = arith.addf %17, %19 : vector<256x64xf32>
    %cst_15 = arith.constant 0.000000e+00 : f32
    %21 = vector.broadcast %cst_15 : f32 to vector<256x64xf32>
    %22 = arith.maximumf %20, %21 : vector<256x64xf32>
    %23 = arith.truncf %22 : vector<256x64xf32> to vector<256x64xbf16>
    %c0_16 = arith.constant 0 : index
    %c0_17 = arith.constant 0 : index
    %24 = vector.load %arg8[%c0_16, %c0_17] : memref<64x64xbf16, #tpu.memory_space<vmem>>, vector<64x64xbf16>
    %cst_18 = arith.constant dense<0.000000e+00> : vector<256x64xf32>
    %25 = tpu.matmul %23, %24, %cst_18 {dimension_numbers = #tpu.dot_dimension_numbers<[1], [0], [0], [1], [0, 0, 1, 1], [], []>} : vector<256x64xbf16>, vector<64x64xbf16>, vector<256x64xf32> -> vector<256x64xf32>
    %c0_19 = arith.constant 0 : index
    %c0_20 = arith.constant 0 : index
    %26 = vector.load %arg9[%c0_19, %c0_20] : memref<1x64xf32, #tpu.memory_space<vmem>>, vector<1x64xf32>
    %27 = vector.broadcast %26 : vector<1x64xf32> to vector<256x64xf32>
    %28 = arith.addf %25, %27 : vector<256x64xf32>
    %c0_21 = arith.constant 0 : index
    %c0_22 = arith.constant 0 : index
    %29 = vector.load %arg10[%c0_21, %c0_22] : memref<1x64xf32, #tpu.memory_space<vmem>>, vector<1x64xf32>
    %30 = vector.broadcast %29 : vector<1x64xf32> to vector<256x64xf32>
    %31 = arith.mulf %28, %30 : vector<256x64xf32>
    %c0_23 = arith.constant 0 : index
    %c0_24 = arith.constant 0 : index
    %32 = vector.load %arg11[%c0_23, %c0_24] : memref<1x64xf32, #tpu.memory_space<vmem>>, vector<1x64xf32>
    %33 = vector.broadcast %32 : vector<1x64xf32> to vector<256x64xf32>
    %34 = arith.addf %31, %33 : vector<256x64xf32>
    %cst_25 = arith.constant 0.000000e+00 : f32
    %35 = vector.broadcast %cst_25 : f32 to vector<256x64xf32>
    %36 = arith.maximumf %34, %35 : vector<256x64xf32>
    %37 = arith.truncf %36 : vector<256x64xf32> to vector<256x64xbf16>
    %c0_26 = arith.constant 0 : index
    %c0_27 = arith.constant 0 : index
    %38 = vector.load %arg12[%c0_26, %c0_27] : memref<64x64xbf16, #tpu.memory_space<vmem>>, vector<64x64xbf16>
    %cst_28 = arith.constant dense<0.000000e+00> : vector<256x64xf32>
    %39 = tpu.matmul %37, %38, %cst_28 {dimension_numbers = #tpu.dot_dimension_numbers<[1], [0], [0], [1], [0, 0, 1, 1], [], []>} : vector<256x64xbf16>, vector<64x64xbf16>, vector<256x64xf32> -> vector<256x64xf32>
    %c0_29 = arith.constant 0 : index
    %c0_30 = arith.constant 0 : index
    %40 = vector.load %arg13[%c0_29, %c0_30] : memref<1x64xf32, #tpu.memory_space<vmem>>, vector<1x64xf32>
    %41 = vector.broadcast %40 : vector<1x64xf32> to vector<256x64xf32>
    %42 = arith.addf %39, %41 : vector<256x64xf32>
    %43 = vector.shape_cast %42 : vector<256x64xf32> to vector<32x8x64xf32>
    %cst_31 = arith.constant dense<0xFF800000> : vector<32x64xf32>
    %44 = vector.multi_reduction <maximumf>, %43, %cst_31 [1] : vector<32x8x64xf32> to vector<32x64xf32>
    %45 = arith.truncf %44 : vector<32x64xf32> to vector<32x64xbf16>
    %c0_32 = arith.constant 0 : index
    %c0_33 = arith.constant 0 : index
    %46 = vector.load %arg14[%c0_32, %c0_33] : memref<32x64xbf16, #tpu.memory_space<vmem>>, vector<32x64xbf16>
    tpu.vector_store %arg14[%c0_32, %c0_33], %45 {strides = array<i32>} : memref<32x64xbf16, #tpu.memory_space<vmem>>, vector<32x64xbf16>,
    return
  }
  func.func @transform_0(%arg0: i32) -> (i32, i32) {
    %c0_i32 = arith.constant 0 : i32
    %c0_i32_0 = arith.constant 0 : i32
    return %arg0, %c0_i32 : i32, i32
  }
  func.func @transform_1(%arg0: i32) -> (i32, i32, i32) {
    %c0_i32 = arith.constant 0 : i32
    %c0_i32_0 = arith.constant 0 : i32
    %c0_i32_1 = arith.constant 0 : i32
    return %arg0, %c0_i32, %c0_i32_0 : i32, i32, i32
  }
  func.func @transform_2(%arg0: i32) -> (i32, i32) {
    %c0_i32 = arith.constant 0 : i32
    %c0_i32_0 = arith.constant 0 : i32
    %c0_i32_1 = arith.constant 0 : i32
    return %c0_i32, %c0_i32_0 : i32, i32
  }
  func.func @transform_3(%arg0: i32) -> (i32, i32) {
    %c0_i32 = arith.constant 0 : i32
    %c0_i32_0 = arith.constant 0 : i32
    %c0_i32_1 = arith.constant 0 : i32
    return %c0_i32, %c0_i32_0 : i32, i32
  }
  func.func @transform_4(%arg0: i32) -> (i32, i32) {
    %c0_i32 = arith.constant 0 : i32
    %c0_i32_0 = arith.constant 0 : i32
    %c0_i32_1 = arith.constant 0 : i32
    return %c0_i32, %c0_i32_0 : i32, i32
  }
  func.func @transform_5(%arg0: i32) -> (i32, i32) {
    %c0_i32 = arith.constant 0 : i32
    %c0_i32_0 = arith.constant 0 : i32
    %c0_i32_1 = arith.constant 0 : i32
    return %c0_i32, %c0_i32_0 : i32, i32
  }
  func.func @transform_6(%arg0: i32) -> (i32, i32) {
    %c0_i32 = arith.constant 0 : i32
    %c0_i32_0 = arith.constant 0 : i32
    %c0_i32_1 = arith.constant 0 : i32
    return %c0_i32, %c0_i32_0 : i32, i32
  }
  func.func @transform_7(%arg0: i32) -> (i32, i32) {
    %c0_i32 = arith.constant 0 : i32
    %c0_i32_0 = arith.constant 0 : i32
    %c0_i32_1 = arith.constant 0 : i32
    return %c0_i32, %c0_i32_0 : i32, i32
  }
  func.func @transform_8(%arg0: i32) -> (i32, i32) {
    %c0_i32 = arith.constant 0 : i32
    %c0_i32_0 = arith.constant 0 : i32
    %c0_i32_1 = arith.constant 0 : i32
    return %c0_i32, %c0_i32_0 : i32, i32
  }
  func.func @transform_9(%arg0: i32) -> (i32, i32) {
    %c0_i32 = arith.constant 0 : i32
    %c0_i32_0 = arith.constant 0 : i32
    %c0_i32_1 = arith.constant 0 : i32
    return %c0_i32, %c0_i32_0 : i32, i32
  }
  func.func @transform_10(%arg0: i32) -> (i32, i32) {
    %c0_i32 = arith.constant 0 : i32
    %c0_i32_0 = arith.constant 0 : i32
    %c0_i32_1 = arith.constant 0 : i32
    return %c0_i32, %c0_i32_0 : i32, i32
  }
  func.func @transform_11(%arg0: i32) -> (i32, i32) {
    %c0_i32 = arith.constant 0 : i32
    %c0_i32_0 = arith.constant 0 : i32
    %c0_i32_1 = arith.constant 0 : i32
    return %c0_i32, %c0_i32_0 : i32, i32
  }
  func.func @transform_12(%arg0: i32) -> (i32, i32) {
    %c0_i32 = arith.constant 0 : i32
    %c0_i32_0 = arith.constant 0 : i32
    %c0_i32_1 = arith.constant 0 : i32
    return %c0_i32, %c0_i32_0 : i32, i32
  }
  func.func @transform_13(%arg0: i32) -> (i32, i32) {
    %c0_i32 = arith.constant 0 : i32
    %c0_i32_0 = arith.constant 0 : i32
    return %arg0, %c0_i32 : i32, i32
  }
}

module attributes {stable_mosaic.version = 11 : i64} {
  func.func @_knn_kernel(%arg0: i32, %arg1: i32, %arg2: memref<1x8x64xbf16, #tpu.memory_space<vmem>>, %arg3: memref<1x16x64xbf16, #tpu.memory_space<vmem>>, %arg4: memref<1x8x1xf32, #tpu.memory_space<vmem>>, %arg5: memref<1x1x16xf32, #tpu.memory_space<vmem>>, %arg6: memref<1x8x8xi32, #tpu.memory_space<vmem>>) attributes {dimension_semantics = [#tpu.dimension_semantics<parallel>, #tpu.dimension_semantics<parallel>], iteration_bounds = array<i64: 4, 2>, scalar_prefetch = 0 : i64, scratch_operands = 0 : i64, tpu.core_type = #tpu.core_type<tc>, window_params = [{transform_indices = @transform_0, window_bounds = array<i64: 1, 8, 64>}, {transform_indices = @transform_1, window_bounds = array<i64: 1, 16, 64>}, {transform_indices = @transform_2, window_bounds = array<i64: 1, 8, 1>}, {transform_indices = @transform_3, window_bounds = array<i64: 1, 1, 16>}, {transform_indices = @transform_4, window_bounds = array<i64: 1, 8, 8>}]} {
    %c0 = arith.constant 0 : index
    %c0_0 = arith.constant 0 : index
    %c0_1 = arith.constant 0 : index
    %0 = vector.load %arg2[%c0, %c0_0, %c0_1] : memref<1x8x64xbf16, #tpu.memory_space<vmem>>, vector<1x8x64xbf16>
    %1 = vector.shape_cast %0 : vector<1x8x64xbf16> to vector<8x64xbf16>
    %c0_2 = arith.constant 0 : index
    %c0_3 = arith.constant 0 : index
    %c0_4 = arith.constant 0 : index
    %2 = vector.load %arg3[%c0_2, %c0_3, %c0_4] : memref<1x16x64xbf16, #tpu.memory_space<vmem>>, vector<1x16x64xbf16>
    %3 = vector.shape_cast %2 : vector<1x16x64xbf16> to vector<16x64xbf16>
    %cst = arith.constant dense<0.000000e+00> : vector<8x16xf32>
    %4 = tpu.matmul %1, %3, %cst {dimension_numbers = #tpu.dot_dimension_numbers<[1], [1], [0], [0], [0, 0, 1, 0], [], []>} : vector<8x64xbf16>, vector<16x64xbf16>, vector<8x16xf32> -> vector<8x16xf32>
    %c0_5 = arith.constant 0 : index
    %c0_6 = arith.constant 0 : index
    %c0_7 = arith.constant 0 : index
    %5 = vector.load %arg4[%c0_5, %c0_6, %c0_7] : memref<1x8x1xf32, #tpu.memory_space<vmem>>, vector<1x8x1xf32>
    %6 = vector.shape_cast %5 : vector<1x8x1xf32> to vector<8x1xf32>
    %c0_8 = arith.constant 0 : index
    %c0_9 = arith.constant 0 : index
    %c0_10 = arith.constant 0 : index
    %7 = vector.load %arg5[%c0_8, %c0_9, %c0_10] : memref<1x1x16xf32, #tpu.memory_space<vmem>>, vector<1x1x16xf32>
    %8 = vector.shape_cast %7 : vector<1x1x16xf32> to vector<1x16xf32>
    %9 = vector.broadcast %6 : vector<8x1xf32> to vector<8x16xf32>
    %10 = vector.broadcast %8 : vector<1x16xf32> to vector<8x16xf32>
    %11 = arith.addf %9, %10 : vector<8x16xf32>
    %cst_11 = arith.constant 2.000000e+00 : f32
    %12 = vector.broadcast %cst_11 : f32 to vector<8x16xf32>
    %13 = arith.mulf %12, %4 : vector<8x16xf32>
    %14 = arith.subf %11, %13 : vector<8x16xf32>
    %15 = tpu.iota {dimensions = array<i32: 1>} : vector<8x16xi32>
    %16 = tpu.iota {dimensions = array<i32: 1>} : vector<8x8xi32>
    %c16_i32 = arith.constant 16 : i32
    %17 = arith.muli %arg0, %c16_i32 : i32
    %c0_i32 = arith.constant 0 : i32
    %18 = vector.broadcast %c0_i32 : i32 to vector<8x8xi32>
    %cst_12 = arith.constant dense<0x7F800000> : vector<8xf32>
    %19 = vector.multi_reduction <minimumf>, %14, %cst_12 [1] : vector<8x16xf32> to vector<8xf32>
    %20 = vector.shape_cast %19 : vector<8xf32> to vector<8x1xf32>
    %21 = vector.broadcast %20 : vector<8x1xf32> to vector<8x16xf32>
    %22 = arith.cmpf oeq, %14, %21 : vector<8x16xf32>
    %c16_i32_13 = arith.constant 16 : i32
    %23 = vector.broadcast %c16_i32_13 : i32 to vector<8x16xi32>
    %24 = arith.select %22, %15, %23 : vector<8x16xi1>, vector<8x16xi32>
    %cst_14 = arith.constant dense<2147483647> : vector<8xi32>
    %25 = vector.multi_reduction <minsi>, %24, %cst_14 [1] : vector<8x16xi32> to vector<8xi32>
    %26 = vector.shape_cast %25 : vector<8xi32> to vector<8x1xi32>
    %c0_i32_15 = arith.constant 0 : i32
    %27 = vector.broadcast %c0_i32_15 : i32 to vector<8x8xi32>
    %28 = arith.cmpi eq, %16, %27 : vector<8x8xi32>
    %29 = vector.broadcast %17 : i32 to vector<8x1xi32>
    %30 = arith.addi %26, %29 : vector<8x1xi32>
    %31 = vector.shape_cast %30 : vector<8x1xi32> to vector<8x1xi32>
    %32 = vector.broadcast %31 : vector<8x1xi32> to vector<8x8xi32>
    %33 = arith.select %28, %32, %18 : vector<8x8xi1>, vector<8x8xi32>
    %34 = vector.broadcast %26 : vector<8x1xi32> to vector<8x16xi32>
    %35 = arith.cmpi eq, %15, %34 : vector<8x16xi32>
    %cst_16 = arith.constant 0x7F800000 : f32
    %36 = vector.broadcast %cst_16 : f32 to vector<8x16xf32>
    %37 = arith.select %35, %36, %14 : vector<8x16xi1>, vector<8x16xf32>
    %cst_17 = arith.constant dense<0x7F800000> : vector<8xf32>
    %38 = vector.multi_reduction <minimumf>, %37, %cst_17 [1] : vector<8x16xf32> to vector<8xf32>
    %39 = vector.shape_cast %38 : vector<8xf32> to vector<8x1xf32>
    %40 = vector.broadcast %39 : vector<8x1xf32> to vector<8x16xf32>
    %41 = arith.cmpf oeq, %37, %40 : vector<8x16xf32>
    %c16_i32_18 = arith.constant 16 : i32
    %42 = vector.broadcast %c16_i32_18 : i32 to vector<8x16xi32>
    %43 = arith.select %41, %15, %42 : vector<8x16xi1>, vector<8x16xi32>
    %cst_19 = arith.constant dense<2147483647> : vector<8xi32>
    %44 = vector.multi_reduction <minsi>, %43, %cst_19 [1] : vector<8x16xi32> to vector<8xi32>
    %45 = vector.shape_cast %44 : vector<8xi32> to vector<8x1xi32>
    %c1_i32 = arith.constant 1 : i32
    %46 = vector.broadcast %c1_i32 : i32 to vector<8x8xi32>
    %47 = arith.cmpi eq, %16, %46 : vector<8x8xi32>
    %48 = vector.broadcast %17 : i32 to vector<8x1xi32>
    %49 = arith.addi %45, %48 : vector<8x1xi32>
    %50 = vector.shape_cast %49 : vector<8x1xi32> to vector<8x1xi32>
    %51 = vector.broadcast %50 : vector<8x1xi32> to vector<8x8xi32>
    %52 = arith.select %47, %51, %33 : vector<8x8xi1>, vector<8x8xi32>
    %53 = vector.broadcast %45 : vector<8x1xi32> to vector<8x16xi32>
    %54 = arith.cmpi eq, %15, %53 : vector<8x16xi32>
    %cst_20 = arith.constant 0x7F800000 : f32
    %55 = vector.broadcast %cst_20 : f32 to vector<8x16xf32>
    %56 = arith.select %54, %55, %37 : vector<8x16xi1>, vector<8x16xf32>
    %cst_21 = arith.constant dense<0x7F800000> : vector<8xf32>
    %57 = vector.multi_reduction <minimumf>, %56, %cst_21 [1] : vector<8x16xf32> to vector<8xf32>
    %58 = vector.shape_cast %57 : vector<8xf32> to vector<8x1xf32>
    %59 = vector.broadcast %58 : vector<8x1xf32> to vector<8x16xf32>
    %60 = arith.cmpf oeq, %56, %59 : vector<8x16xf32>
    %c16_i32_22 = arith.constant 16 : i32
    %61 = vector.broadcast %c16_i32_22 : i32 to vector<8x16xi32>
    %62 = arith.select %60, %15, %61 : vector<8x16xi1>, vector<8x16xi32>
    %cst_23 = arith.constant dense<2147483647> : vector<8xi32>
    %63 = vector.multi_reduction <minsi>, %62, %cst_23 [1] : vector<8x16xi32> to vector<8xi32>
    %64 = vector.shape_cast %63 : vector<8xi32> to vector<8x1xi32>
    %c2_i32 = arith.constant 2 : i32
    %65 = vector.broadcast %c2_i32 : i32 to vector<8x8xi32>
    %66 = arith.cmpi eq, %16, %65 : vector<8x8xi32>
    %67 = vector.broadcast %17 : i32 to vector<8x1xi32>
    %68 = arith.addi %64, %67 : vector<8x1xi32>
    %69 = vector.shape_cast %68 : vector<8x1xi32> to vector<8x1xi32>
    %70 = vector.broadcast %69 : vector<8x1xi32> to vector<8x8xi32>
    %71 = arith.select %66, %70, %52 : vector<8x8xi1>, vector<8x8xi32>
    %72 = vector.broadcast %64 : vector<8x1xi32> to vector<8x16xi32>
    %73 = arith.cmpi eq, %15, %72 : vector<8x16xi32>
    %cst_24 = arith.constant 0x7F800000 : f32
    %74 = vector.broadcast %cst_24 : f32 to vector<8x16xf32>
    %75 = arith.select %73, %74, %56 : vector<8x16xi1>, vector<8x16xf32>
    %cst_25 = arith.constant dense<0x7F800000> : vector<8xf32>
    %76 = vector.multi_reduction <minimumf>, %75, %cst_25 [1] : vector<8x16xf32> to vector<8xf32>
    %77 = vector.shape_cast %76 : vector<8xf32> to vector<8x1xf32>
    %78 = vector.broadcast %77 : vector<8x1xf32> to vector<8x16xf32>
    %79 = arith.cmpf oeq, %75, %78 : vector<8x16xf32>
    %c16_i32_26 = arith.constant 16 : i32
    %80 = vector.broadcast %c16_i32_26 : i32 to vector<8x16xi32>
    %81 = arith.select %79, %15, %80 : vector<8x16xi1>, vector<8x16xi32>
    %cst_27 = arith.constant dense<2147483647> : vector<8xi32>
    %82 = vector.multi_reduction <minsi>, %81, %cst_27 [1] : vector<8x16xi32> to vector<8xi32>
    %83 = vector.shape_cast %82 : vector<8xi32> to vector<8x1xi32>
    %c3_i32 = arith.constant 3 : i32
    %84 = vector.broadcast %c3_i32 : i32 to vector<8x8xi32>
    %85 = arith.cmpi eq, %16, %84 : vector<8x8xi32>
    %86 = vector.broadcast %17 : i32 to vector<8x1xi32>
    %87 = arith.addi %83, %86 : vector<8x1xi32>
    %88 = vector.shape_cast %87 : vector<8x1xi32> to vector<8x1xi32>
    %89 = vector.broadcast %88 : vector<8x1xi32> to vector<8x8xi32>
    %90 = arith.select %85, %89, %71 : vector<8x8xi1>, vector<8x8xi32>
    %91 = vector.broadcast %83 : vector<8x1xi32> to vector<8x16xi32>
    %92 = arith.cmpi eq, %15, %91 : vector<8x16xi32>
    %cst_28 = arith.constant 0x7F800000 : f32
    %93 = vector.broadcast %cst_28 : f32 to vector<8x16xf32>
    %94 = arith.select %92, %93, %75 : vector<8x16xi1>, vector<8x16xf32>
    %cst_29 = arith.constant dense<0x7F800000> : vector<8xf32>
    %95 = vector.multi_reduction <minimumf>, %94, %cst_29 [1] : vector<8x16xf32> to vector<8xf32>
    %96 = vector.shape_cast %95 : vector<8xf32> to vector<8x1xf32>
    %97 = vector.broadcast %96 : vector<8x1xf32> to vector<8x16xf32>
    %98 = arith.cmpf oeq, %94, %97 : vector<8x16xf32>
    %c16_i32_30 = arith.constant 16 : i32
    %99 = vector.broadcast %c16_i32_30 : i32 to vector<8x16xi32>
    %100 = arith.select %98, %15, %99 : vector<8x16xi1>, vector<8x16xi32>
    %cst_31 = arith.constant dense<2147483647> : vector<8xi32>
    %101 = vector.multi_reduction <minsi>, %100, %cst_31 [1] : vector<8x16xi32> to vector<8xi32>
    %102 = vector.shape_cast %101 : vector<8xi32> to vector<8x1xi32>
    %c4_i32 = arith.constant 4 : i32
    %103 = vector.broadcast %c4_i32 : i32 to vector<8x8xi32>
    %104 = arith.cmpi eq, %16, %103 : vector<8x8xi32>
    %105 = vector.broadcast %17 : i32 to vector<8x1xi32>
    %106 = arith.addi %102, %105 : vector<8x1xi32>
    %107 = vector.shape_cast %106 : vector<8x1xi32> to vector<8x1xi32>
    %108 = vector.broadcast %107 : vector<8x1xi32> to vector<8x8xi32>
    %109 = arith.select %104, %108, %90 : vector<8x8xi1>, vector<8x8xi32>
    %110 = vector.broadcast %102 : vector<8x1xi32> to vector<8x16xi32>
    %111 = arith.cmpi eq, %15, %110 : vector<8x16xi32>
    %cst_32 = arith.constant 0x7F800000 : f32
    %112 = vector.broadcast %cst_32 : f32 to vector<8x16xf32>
    %113 = arith.select %111, %112, %94 : vector<8x16xi1>, vector<8x16xf32>
    %cst_33 = arith.constant dense<0x7F800000> : vector<8xf32>
    %114 = vector.multi_reduction <minimumf>, %113, %cst_33 [1] : vector<8x16xf32> to vector<8xf32>
    %115 = vector.shape_cast %114 : vector<8xf32> to vector<8x1xf32>
    %116 = vector.broadcast %115 : vector<8x1xf32> to vector<8x16xf32>
    %117 = arith.cmpf oeq, %113, %116 : vector<8x16xf32>
    %c16_i32_34 = arith.constant 16 : i32
    %118 = vector.broadcast %c16_i32_34 : i32 to vector<8x16xi32>
    %119 = arith.select %117, %15, %118 : vector<8x16xi1>, vector<8x16xi32>
    %cst_35 = arith.constant dense<2147483647> : vector<8xi32>
    %120 = vector.multi_reduction <minsi>, %119, %cst_35 [1] : vector<8x16xi32> to vector<8xi32>
    %121 = vector.shape_cast %120 : vector<8xi32> to vector<8x1xi32>
    %c5_i32 = arith.constant 5 : i32
    %122 = vector.broadcast %c5_i32 : i32 to vector<8x8xi32>
    %123 = arith.cmpi eq, %16, %122 : vector<8x8xi32>
    %124 = vector.broadcast %17 : i32 to vector<8x1xi32>
    %125 = arith.addi %121, %124 : vector<8x1xi32>
    %126 = vector.shape_cast %125 : vector<8x1xi32> to vector<8x1xi32>
    %127 = vector.broadcast %126 : vector<8x1xi32> to vector<8x8xi32>
    %128 = arith.select %123, %127, %109 : vector<8x8xi1>, vector<8x8xi32>
    %129 = vector.broadcast %121 : vector<8x1xi32> to vector<8x16xi32>
    %130 = arith.cmpi eq, %15, %129 : vector<8x16xi32>
    %cst_36 = arith.constant 0x7F800000 : f32
    %131 = vector.broadcast %cst_36 : f32 to vector<8x16xf32>
    %132 = arith.select %130, %131, %113 : vector<8x16xi1>, vector<8x16xf32>
    %cst_37 = arith.constant dense<0x7F800000> : vector<8xf32>
    %133 = vector.multi_reduction <minimumf>, %132, %cst_37 [1] : vector<8x16xf32> to vector<8xf32>
    %134 = vector.shape_cast %133 : vector<8xf32> to vector<8x1xf32>
    %135 = vector.broadcast %134 : vector<8x1xf32> to vector<8x16xf32>
    %136 = arith.cmpf oeq, %132, %135 : vector<8x16xf32>
    %c16_i32_38 = arith.constant 16 : i32
    %137 = vector.broadcast %c16_i32_38 : i32 to vector<8x16xi32>
    %138 = arith.select %136, %15, %137 : vector<8x16xi1>, vector<8x16xi32>
    %cst_39 = arith.constant dense<2147483647> : vector<8xi32>
    %139 = vector.multi_reduction <minsi>, %138, %cst_39 [1] : vector<8x16xi32> to vector<8xi32>
    %140 = vector.shape_cast %139 : vector<8xi32> to vector<8x1xi32>
    %c6_i32 = arith.constant 6 : i32
    %141 = vector.broadcast %c6_i32 : i32 to vector<8x8xi32>
    %142 = arith.cmpi eq, %16, %141 : vector<8x8xi32>
    %143 = vector.broadcast %17 : i32 to vector<8x1xi32>
    %144 = arith.addi %140, %143 : vector<8x1xi32>
    %145 = vector.shape_cast %144 : vector<8x1xi32> to vector<8x1xi32>
    %146 = vector.broadcast %145 : vector<8x1xi32> to vector<8x8xi32>
    %147 = arith.select %142, %146, %128 : vector<8x8xi1>, vector<8x8xi32>
    %148 = vector.broadcast %140 : vector<8x1xi32> to vector<8x16xi32>
    %149 = arith.cmpi eq, %15, %148 : vector<8x16xi32>
    %cst_40 = arith.constant 0x7F800000 : f32
    %150 = vector.broadcast %cst_40 : f32 to vector<8x16xf32>
    %151 = arith.select %149, %150, %132 : vector<8x16xi1>, vector<8x16xf32>
    %cst_41 = arith.constant dense<0x7F800000> : vector<8xf32>
    %152 = vector.multi_reduction <minimumf>, %151, %cst_41 [1] : vector<8x16xf32> to vector<8xf32>
    %153 = vector.shape_cast %152 : vector<8xf32> to vector<8x1xf32>
    %154 = vector.broadcast %153 : vector<8x1xf32> to vector<8x16xf32>
    %155 = arith.cmpf oeq, %151, %154 : vector<8x16xf32>
    %c16_i32_42 = arith.constant 16 : i32
    %156 = vector.broadcast %c16_i32_42 : i32 to vector<8x16xi32>
    %157 = arith.select %155, %15, %156 : vector<8x16xi1>, vector<8x16xi32>
    %cst_43 = arith.constant dense<2147483647> : vector<8xi32>
    %158 = vector.multi_reduction <minsi>, %157, %cst_43 [1] : vector<8x16xi32> to vector<8xi32>
    %159 = vector.shape_cast %158 : vector<8xi32> to vector<8x1xi32>
    %c7_i32 = arith.constant 7 : i32
    %160 = vector.broadcast %c7_i32 : i32 to vector<8x8xi32>
    %161 = arith.cmpi eq, %16, %160 : vector<8x8xi32>
    %162 = vector.broadcast %17 : i32 to vector<8x1xi32>
    %163 = arith.addi %159, %162 : vector<8x1xi32>
    %164 = vector.shape_cast %163 : vector<8x1xi32> to vector<8x1xi32>
    %165 = vector.broadcast %164 : vector<8x1xi32> to vector<8x8xi32>
    %166 = arith.select %161, %165, %147 : vector<8x8xi1>, vector<8x8xi32>
    %c0_44 = arith.constant 0 : index
    %c0_45 = arith.constant 0 : index
    %c0_46 = arith.constant 0 : index
    %167 = vector.load %arg6[%c0_44, %c0_45, %c0_46] : memref<1x8x8xi32, #tpu.memory_space<vmem>>, vector<1x8x8xi32>
    %168 = vector.shape_cast %167 : vector<1x8x8xi32> to vector<8x8xi32>
    %169 = vector.shape_cast %166 : vector<8x8xi32> to vector<1x8x8xi32>
    tpu.vector_store %arg6[%c0_44, %c0_45, %c0_46], %169 {strides = array<i32>} : memref<1x8x8xi32, #tpu.memory_space<vmem>>, vector<1x8x8xi32>,
    return
  }
  func.func @transform_0(%arg0: i32, %arg1: i32) -> (i32, i32, i32) {
    %c0_i32 = arith.constant 0 : i32
    %c0_i32_0 = arith.constant 0 : i32
    return %arg0, %arg1, %c0_i32 : i32, i32, i32
  }
  func.func @transform_1(%arg0: i32, %arg1: i32) -> (i32, i32, i32) {
    %c0_i32 = arith.constant 0 : i32
    %c0_i32_0 = arith.constant 0 : i32
    %c0_i32_1 = arith.constant 0 : i32
    return %arg0, %c0_i32, %c0_i32_0 : i32, i32, i32
  }
  func.func @transform_2(%arg0: i32, %arg1: i32) -> (i32, i32, i32) {
    %c0_i32 = arith.constant 0 : i32
    %c0_i32_0 = arith.constant 0 : i32
    return %arg0, %arg1, %c0_i32 : i32, i32, i32
  }
  func.func @transform_3(%arg0: i32, %arg1: i32) -> (i32, i32, i32) {
    %c0_i32 = arith.constant 0 : i32
    %c0_i32_0 = arith.constant 0 : i32
    %c0_i32_1 = arith.constant 0 : i32
    return %arg0, %c0_i32, %c0_i32_0 : i32, i32, i32
  }
  func.func @transform_4(%arg0: i32, %arg1: i32) -> (i32, i32, i32) {
    %c0_i32 = arith.constant 0 : i32
    %c0_i32_0 = arith.constant 0 : i32
    return %arg0, %arg1, %c0_i32 : i32, i32, i32
  }
}

module attributes {stable_mosaic.version = 11 : i64} {
  func.func @_edgeconv_lin_kernel(%arg0: i32, %arg1: memref<32x64xbf16, #tpu.memory_space<vmem>>, %arg2: memref<32x8x64xbf16, #tpu.memory_space<vmem>>, %arg3: memref<64x128xbf16, #tpu.memory_space<vmem>>, %arg4: memref<64x128xbf16, #tpu.memory_space<vmem>>, %arg5: memref<1x128xf32, #tpu.memory_space<vmem>>, %arg6: memref<32x128xbf16, #tpu.memory_space<vmem>>) attributes {dimension_semantics = [#tpu.dimension_semantics<parallel>], iteration_bounds = array<i64: 2>, scalar_prefetch = 0 : i64, scratch_operands = 0 : i64, tpu.core_type = #tpu.core_type<tc>, window_params = [{transform_indices = @transform_0, window_bounds = array<i64: 32, 64>}, {transform_indices = @transform_1, window_bounds = array<i64: 32, 8, 64>}, {pipeline_mode = #tpu.pipeline_mode<synchronous>, transform_indices = @transform_2, window_bounds = array<i64: 64, 128>}, {pipeline_mode = #tpu.pipeline_mode<synchronous>, transform_indices = @transform_3, window_bounds = array<i64: 64, 128>}, {pipeline_mode = #tpu.pipeline_mode<synchronous>, transform_indices = @transform_4, window_bounds = array<i64: 1, 128>}, {transform_indices = @transform_5, window_bounds = array<i64: 32, 128>}]} {
    %c0 = arith.constant 0 : index
    %c0_0 = arith.constant 0 : index
    %0 = vector.load %arg1[%c0, %c0_0] : memref<32x64xbf16, #tpu.memory_space<vmem>>, vector<32x64xbf16>
    %c0_1 = arith.constant 0 : index
    %c0_2 = arith.constant 0 : index
    %1 = vector.load %arg3[%c0_1, %c0_2] : memref<64x128xbf16, #tpu.memory_space<vmem>>, vector<64x128xbf16>
    %cst = arith.constant dense<0.000000e+00> : vector<32x128xf32>
    %2 = tpu.matmul %0, %1, %cst {dimension_numbers = #tpu.dot_dimension_numbers<[1], [0], [0], [1], [0, 0, 1, 1], [], []>} : vector<32x64xbf16>, vector<64x128xbf16>, vector<32x128xf32> -> vector<32x128xf32>
    %c0_3 = arith.constant 0 : index
    %c0_4 = arith.constant 0 : index
    %3 = vector.load %arg5[%c0_3, %c0_4] : memref<1x128xf32, #tpu.memory_space<vmem>>, vector<1x128xf32>
    %4 = vector.broadcast %3 : vector<1x128xf32> to vector<32x128xf32>
    %5 = arith.addf %2, %4 : vector<32x128xf32>
    %c0_5 = arith.constant 0 : index
    %c0_6 = arith.constant 0 : index
    %c0_7 = arith.constant 0 : index
    %6 = vector.load %arg2[%c0_5, %c0_6, %c0_7] : memref<32x8x64xbf16, #tpu.memory_space<vmem>>, vector<32x8x64xbf16>
    %7 = vector.shape_cast %6 : vector<32x8x64xbf16> to vector<256x64xbf16>
    %c0_8 = arith.constant 0 : index
    %c0_9 = arith.constant 0 : index
    %8 = vector.load %arg4[%c0_8, %c0_9] : memref<64x128xbf16, #tpu.memory_space<vmem>>, vector<64x128xbf16>
    %cst_10 = arith.constant dense<0.000000e+00> : vector<256x128xf32>
    %9 = tpu.matmul %7, %8, %cst_10 {dimension_numbers = #tpu.dot_dimension_numbers<[1], [0], [0], [1], [0, 0, 1, 1], [], []>} : vector<256x64xbf16>, vector<64x128xbf16>, vector<256x128xf32> -> vector<256x128xf32>
    %10 = vector.shape_cast %9 : vector<256x128xf32> to vector<32x8x128xf32>
    %cst_11 = arith.constant dense<0xFF800000> : vector<32x128xf32>
    %11 = vector.multi_reduction <maximumf>, %10, %cst_11 [1] : vector<32x8x128xf32> to vector<32x128xf32>
    %12 = arith.addf %5, %11 : vector<32x128xf32>
    %13 = arith.truncf %12 : vector<32x128xf32> to vector<32x128xbf16>
    %c0_12 = arith.constant 0 : index
    %c0_13 = arith.constant 0 : index
    %14 = vector.load %arg6[%c0_12, %c0_13] : memref<32x128xbf16, #tpu.memory_space<vmem>>, vector<32x128xbf16>
    tpu.vector_store %arg6[%c0_12, %c0_13], %13 {strides = array<i32>} : memref<32x128xbf16, #tpu.memory_space<vmem>>, vector<32x128xbf16>,
    return
  }
  func.func @transform_0(%arg0: i32) -> (i32, i32) {
    %c0_i32 = arith.constant 0 : i32
    %c0_i32_0 = arith.constant 0 : i32
    return %arg0, %c0_i32 : i32, i32
  }
  func.func @transform_1(%arg0: i32) -> (i32, i32, i32) {
    %c0_i32 = arith.constant 0 : i32
    %c0_i32_0 = arith.constant 0 : i32
    %c0_i32_1 = arith.constant 0 : i32
    return %arg0, %c0_i32, %c0_i32_0 : i32, i32, i32
  }
  func.func @transform_2(%arg0: i32) -> (i32, i32) {
    %c0_i32 = arith.constant 0 : i32
    %c0_i32_0 = arith.constant 0 : i32
    %c0_i32_1 = arith.constant 0 : i32
    return %c0_i32, %c0_i32_0 : i32, i32
  }
  func.func @transform_3(%arg0: i32) -> (i32, i32) {
    %c0_i32 = arith.constant 0 : i32
    %c0_i32_0 = arith.constant 0 : i32
    %c0_i32_1 = arith.constant 0 : i32
    return %c0_i32, %c0_i32_0 : i32, i32
  }
  func.func @transform_4(%arg0: i32) -> (i32, i32) {
    %c0_i32 = arith.constant 0 : i32
    %c0_i32_0 = arith.constant 0 : i32
    %c0_i32_1 = arith.constant 0 : i32
    return %c0_i32, %c0_i32_0 : i32, i32
  }
  func.func @transform_5(%arg0: i32) -> (i32, i32) {
    %c0_i32 = arith.constant 0 : i32
    %c0_i32_0 = arith.constant 0 : i32
    return %arg0, %c0_i32 : i32, i32
  }
}

module attributes {stable_mosaic.version = 11 : i64} {
  func.func @_lin1_pool_head_kernel(%arg0: i32, %arg1: memref<64x64xbf16, #tpu.memory_space<vmem>>, %arg2: memref<64x128xbf16, #tpu.memory_space<vmem>>, %arg3: memref<64x256xbf16, #tpu.memory_space<vmem>>, %arg4: memref<128x256xbf16, #tpu.memory_space<vmem>>, %arg5: memref<1x256xf32, #tpu.memory_space<vmem>>, %arg6: memref<256x128xf32, #tpu.memory_space<vmem>>, %arg7: memref<1x128xf32, #tpu.memory_space<vmem>>, %arg8: memref<1x128xf32, #tpu.memory_space<vmem>>, %arg9: memref<1x128xf32, #tpu.memory_space<vmem>>, %arg10: memref<128x64xf32, #tpu.memory_space<vmem>>, %arg11: memref<1x64xf32, #tpu.memory_space<vmem>>, %arg12: memref<1x64xf32, #tpu.memory_space<vmem>>, %arg13: memref<1x64xf32, #tpu.memory_space<vmem>>, %arg14: memref<64x4xf32, #tpu.memory_space<vmem>>, %arg15: memref<1x4xf32, #tpu.memory_space<vmem>>, %arg16: memref<4x4xf32, #tpu.memory_space<vmem>>) attributes {dimension_semantics = [#tpu.dimension_semantics<parallel>], iteration_bounds = array<i64: 1>, scalar_prefetch = 0 : i64, scratch_operands = 0 : i64, tpu.core_type = #tpu.core_type<tc>, window_params = [{transform_indices = @transform_0, window_bounds = array<i64: 64, 64>}, {transform_indices = @transform_1, window_bounds = array<i64: 64, 128>}, {pipeline_mode = #tpu.pipeline_mode<synchronous>, transform_indices = @transform_2, window_bounds = array<i64: 64, 256>}, {pipeline_mode = #tpu.pipeline_mode<synchronous>, transform_indices = @transform_3, window_bounds = array<i64: 128, 256>}, {pipeline_mode = #tpu.pipeline_mode<synchronous>, transform_indices = @transform_4, window_bounds = array<i64: 1, 256>}, {pipeline_mode = #tpu.pipeline_mode<synchronous>, transform_indices = @transform_5, window_bounds = array<i64: 256, 128>}, {pipeline_mode = #tpu.pipeline_mode<synchronous>, transform_indices = @transform_6, window_bounds = array<i64: 1, 128>}, {pipeline_mode = #tpu.pipeline_mode<synchronous>, transform_indices = @transform_7, window_bounds = array<i64: 1, 128>}, {pipeline_mode = #tpu.pipeline_mode<synchronous>, transform_indices = @transform_8, window_bounds = array<i64: 1, 128>}, {pipeline_mode = #tpu.pipeline_mode<synchronous>, transform_indices = @transform_9, window_bounds = array<i64: 128, 64>}, {pipeline_mode = #tpu.pipeline_mode<synchronous>, transform_indices = @transform_10, window_bounds = array<i64: 1, 64>}, {pipeline_mode = #tpu.pipeline_mode<synchronous>, transform_indices = @transform_11, window_bounds = array<i64: 1, 64>}, {pipeline_mode = #tpu.pipeline_mode<synchronous>, transform_indices = @transform_12, window_bounds = array<i64: 1, 64>}, {pipeline_mode = #tpu.pipeline_mode<synchronous>, transform_indices = @transform_13, window_bounds = array<i64: 64, 4>}, {pipeline_mode = #tpu.pipeline_mode<synchronous>, transform_indices = @transform_14, window_bounds = array<i64: 1, 4>}, {transform_indices = @transform_15, window_bounds = array<i64: 4, 4>}]} {
    %c0 = arith.constant 0 : index
    %c0_0 = arith.constant 0 : index
    %0 = vector.load %arg1[%c0, %c0_0] : memref<64x64xbf16, #tpu.memory_space<vmem>>, vector<64x64xbf16>
    %c0_1 = arith.constant 0 : index
    %c0_2 = arith.constant 0 : index
    %1 = vector.load %arg3[%c0_1, %c0_2] : memref<64x256xbf16, #tpu.memory_space<vmem>>, vector<64x256xbf16>
    %cst = arith.constant dense<0.000000e+00> : vector<64x256xf32>
    %2 = tpu.matmul %0, %1, %cst {dimension_numbers = #tpu.dot_dimension_numbers<[1], [0], [0], [1], [0, 0, 1, 1], [], []>} : vector<64x64xbf16>, vector<64x256xbf16>, vector<64x256xf32> -> vector<64x256xf32>
    %c0_3 = arith.constant 0 : index
    %c0_4 = arith.constant 0 : index
    %3 = vector.load %arg2[%c0_3, %c0_4] : memref<64x128xbf16, #tpu.memory_space<vmem>>, vector<64x128xbf16>
    %c0_5 = arith.constant 0 : index
    %c0_6 = arith.constant 0 : index
    %4 = vector.load %arg4[%c0_5, %c0_6] : memref<128x256xbf16, #tpu.memory_space<vmem>>, vector<128x256xbf16>
    %cst_7 = arith.constant dense<0.000000e+00> : vector<64x256xf32>
    %5 = tpu.matmul %3, %4, %cst_7 {dimension_numbers = #tpu.dot_dimension_numbers<[1], [0], [0], [1], [0, 0, 1, 1], [], []>} : vector<64x128xbf16>, vector<128x256xbf16>, vector<64x256xf32> -> vector<64x256xf32>
    %6 = arith.addf %2, %5 : vector<64x256xf32>
    %c0_8 = arith.constant 0 : index
    %c0_9 = arith.constant 0 : index
    %7 = vector.load %arg5[%c0_8, %c0_9] : memref<1x256xf32, #tpu.memory_space<vmem>>, vector<1x256xf32>
    %8 = vector.broadcast %7 : vector<1x256xf32> to vector<64x256xf32>
    %9 = arith.addf %6, %8 : vector<64x256xf32>
    %10 = vector.shape_cast %9 : vector<64x256xf32> to vector<4x16x256xf32>
    %cst_10 = arith.constant dense<0xFF800000> : vector<4x256xf32>
    %11 = vector.multi_reduction <maximumf>, %10, %cst_10 [1] : vector<4x16x256xf32> to vector<4x256xf32>
    %c0_11 = arith.constant 0 : index
    %c0_12 = arith.constant 0 : index
    %12 = vector.load %arg6[%c0_11, %c0_12] : memref<256x128xf32, #tpu.memory_space<vmem>>, vector<256x128xf32>
    %cst_13 = arith.constant dense<0.000000e+00> : vector<4x128xf32>
    %13 = tpu.matmul %11, %12, %cst_13 {dimension_numbers = #tpu.dot_dimension_numbers<[1], [0], [0], [1], [0, 0, 1, 1], [], []>} : vector<4x256xf32>, vector<256x128xf32>, vector<4x128xf32> -> vector<4x128xf32>
    %c0_14 = arith.constant 0 : index
    %c0_15 = arith.constant 0 : index
    %14 = vector.load %arg7[%c0_14, %c0_15] : memref<1x128xf32, #tpu.memory_space<vmem>>, vector<1x128xf32>
    %15 = vector.broadcast %14 : vector<1x128xf32> to vector<4x128xf32>
    %16 = arith.addf %13, %15 : vector<4x128xf32>
    %c0_16 = arith.constant 0 : index
    %c0_17 = arith.constant 0 : index
    %17 = vector.load %arg8[%c0_16, %c0_17] : memref<1x128xf32, #tpu.memory_space<vmem>>, vector<1x128xf32>
    %18 = vector.broadcast %17 : vector<1x128xf32> to vector<4x128xf32>
    %19 = arith.mulf %16, %18 : vector<4x128xf32>
    %c0_18 = arith.constant 0 : index
    %c0_19 = arith.constant 0 : index
    %20 = vector.load %arg9[%c0_18, %c0_19] : memref<1x128xf32, #tpu.memory_space<vmem>>, vector<1x128xf32>
    %21 = vector.broadcast %20 : vector<1x128xf32> to vector<4x128xf32>
    %22 = arith.addf %19, %21 : vector<4x128xf32>
    %cst_20 = arith.constant 0.000000e+00 : f32
    %23 = vector.broadcast %cst_20 : f32 to vector<4x128xf32>
    %24 = arith.maximumf %22, %23 : vector<4x128xf32>
    %c0_21 = arith.constant 0 : index
    %c0_22 = arith.constant 0 : index
    %25 = vector.load %arg10[%c0_21, %c0_22] : memref<128x64xf32, #tpu.memory_space<vmem>>, vector<128x64xf32>
    %cst_23 = arith.constant dense<0.000000e+00> : vector<4x64xf32>
    %26 = tpu.matmul %24, %25, %cst_23 {dimension_numbers = #tpu.dot_dimension_numbers<[1], [0], [0], [1], [0, 0, 1, 1], [], []>} : vector<4x128xf32>, vector<128x64xf32>, vector<4x64xf32> -> vector<4x64xf32>
    %c0_24 = arith.constant 0 : index
    %c0_25 = arith.constant 0 : index
    %27 = vector.load %arg11[%c0_24, %c0_25] : memref<1x64xf32, #tpu.memory_space<vmem>>, vector<1x64xf32>
    %28 = vector.broadcast %27 : vector<1x64xf32> to vector<4x64xf32>
    %29 = arith.addf %26, %28 : vector<4x64xf32>
    %c0_26 = arith.constant 0 : index
    %c0_27 = arith.constant 0 : index
    %30 = vector.load %arg12[%c0_26, %c0_27] : memref<1x64xf32, #tpu.memory_space<vmem>>, vector<1x64xf32>
    %31 = vector.broadcast %30 : vector<1x64xf32> to vector<4x64xf32>
    %32 = arith.mulf %29, %31 : vector<4x64xf32>
    %c0_28 = arith.constant 0 : index
    %c0_29 = arith.constant 0 : index
    %33 = vector.load %arg13[%c0_28, %c0_29] : memref<1x64xf32, #tpu.memory_space<vmem>>, vector<1x64xf32>
    %34 = vector.broadcast %33 : vector<1x64xf32> to vector<4x64xf32>
    %35 = arith.addf %32, %34 : vector<4x64xf32>
    %cst_30 = arith.constant 0.000000e+00 : f32
    %36 = vector.broadcast %cst_30 : f32 to vector<4x64xf32>
    %37 = arith.maximumf %35, %36 : vector<4x64xf32>
    %c0_31 = arith.constant 0 : index
    %c0_32 = arith.constant 0 : index
    %38 = vector.load %arg14[%c0_31, %c0_32] : memref<64x4xf32, #tpu.memory_space<vmem>>, vector<64x4xf32>
    %cst_33 = arith.constant dense<0.000000e+00> : vector<4x4xf32>
    %39 = tpu.matmul %37, %38, %cst_33 {dimension_numbers = #tpu.dot_dimension_numbers<[1], [0], [0], [1], [0, 0, 1, 1], [], []>} : vector<4x64xf32>, vector<64x4xf32>, vector<4x4xf32> -> vector<4x4xf32>
    %c0_34 = arith.constant 0 : index
    %c0_35 = arith.constant 0 : index
    %40 = vector.load %arg15[%c0_34, %c0_35] : memref<1x4xf32, #tpu.memory_space<vmem>>, vector<1x4xf32>
    %41 = vector.broadcast %40 : vector<1x4xf32> to vector<4x4xf32>
    %42 = arith.addf %39, %41 : vector<4x4xf32>
    %c0_36 = arith.constant 0 : index
    %c0_37 = arith.constant 0 : index
    %43 = vector.load %arg16[%c0_36, %c0_37] : memref<4x4xf32, #tpu.memory_space<vmem>>, vector<4x4xf32>
    tpu.vector_store %arg16[%c0_36, %c0_37], %42 {strides = array<i32>} : memref<4x4xf32, #tpu.memory_space<vmem>>, vector<4x4xf32>,
    return
  }
  func.func @transform_0(%arg0: i32) -> (i32, i32) {
    %c0_i32 = arith.constant 0 : i32
    %c0_i32_0 = arith.constant 0 : i32
    return %arg0, %c0_i32 : i32, i32
  }
  func.func @transform_1(%arg0: i32) -> (i32, i32) {
    %c0_i32 = arith.constant 0 : i32
    %c0_i32_0 = arith.constant 0 : i32
    return %arg0, %c0_i32 : i32, i32
  }
  func.func @transform_2(%arg0: i32) -> (i32, i32) {
    %c0_i32 = arith.constant 0 : i32
    %c0_i32_0 = arith.constant 0 : i32
    %c0_i32_1 = arith.constant 0 : i32
    return %c0_i32, %c0_i32_0 : i32, i32
  }
  func.func @transform_3(%arg0: i32) -> (i32, i32) {
    %c0_i32 = arith.constant 0 : i32
    %c0_i32_0 = arith.constant 0 : i32
    %c0_i32_1 = arith.constant 0 : i32
    return %c0_i32, %c0_i32_0 : i32, i32
  }
  func.func @transform_4(%arg0: i32) -> (i32, i32) {
    %c0_i32 = arith.constant 0 : i32
    %c0_i32_0 = arith.constant 0 : i32
    %c0_i32_1 = arith.constant 0 : i32
    return %c0_i32, %c0_i32_0 : i32, i32
  }
  func.func @transform_5(%arg0: i32) -> (i32, i32) {
    %c0_i32 = arith.constant 0 : i32
    %c0_i32_0 = arith.constant 0 : i32
    %c0_i32_1 = arith.constant 0 : i32
    return %c0_i32, %c0_i32_0 : i32, i32
  }
  func.func @transform_6(%arg0: i32) -> (i32, i32) {
    %c0_i32 = arith.constant 0 : i32
    %c0_i32_0 = arith.constant 0 : i32
    %c0_i32_1 = arith.constant 0 : i32
    return %c0_i32, %c0_i32_0 : i32, i32
  }
  func.func @transform_7(%arg0: i32) -> (i32, i32) {
    %c0_i32 = arith.constant 0 : i32
    %c0_i32_0 = arith.constant 0 : i32
    %c0_i32_1 = arith.constant 0 : i32
    return %c0_i32, %c0_i32_0 : i32, i32
  }
  func.func @transform_8(%arg0: i32) -> (i32, i32) {
    %c0_i32 = arith.constant 0 : i32
    %c0_i32_0 = arith.constant 0 : i32
    %c0_i32_1 = arith.constant 0 : i32
    return %c0_i32, %c0_i32_0 : i32, i32
  }
  func.func @transform_9(%arg0: i32) -> (i32, i32) {
    %c0_i32 = arith.constant 0 : i32
    %c0_i32_0 = arith.constant 0 : i32
    %c0_i32_1 = arith.constant 0 : i32
    return %c0_i32, %c0_i32_0 : i32, i32
  }
  func.func @transform_10(%arg0: i32) -> (i32, i32) {
    %c0_i32 = arith.constant 0 : i32
    %c0_i32_0 = arith.constant 0 : i32
    %c0_i32_1 = arith.constant 0 : i32
    return %c0_i32, %c0_i32_0 : i32, i32
  }
  func.func @transform_11(%arg0: i32) -> (i32, i32) {
    %c0_i32 = arith.constant 0 : i32
    %c0_i32_0 = arith.constant 0 : i32
    %c0_i32_1 = arith.constant 0 : i32
    return %c0_i32, %c0_i32_0 : i32, i32
  }
  func.func @transform_12(%arg0: i32) -> (i32, i32) {
    %c0_i32 = arith.constant 0 : i32
    %c0_i32_0 = arith.constant 0 : i32
    %c0_i32_1 = arith.constant 0 : i32
    return %c0_i32, %c0_i32_0 : i32, i32
  }
  func.func @transform_13(%arg0: i32) -> (i32, i32) {
    %c0_i32 = arith.constant 0 : i32
    %c0_i32_0 = arith.constant 0 : i32
    %c0_i32_1 = arith.constant 0 : i32
    return %c0_i32, %c0_i32_0 : i32, i32
  }
  func.func @transform_14(%arg0: i32) -> (i32, i32) {
    %c0_i32 = arith.constant 0 : i32
    %c0_i32_0 = arith.constant 0 : i32
    %c0_i32_1 = arith.constant 0 : i32
    return %c0_i32, %c0_i32_0 : i32, i32
  }
  func.func @transform_15(%arg0: i32) -> (i32, i32) {
    %c0_i32 = arith.constant 0 : i32
    %c0_i32_0 = arith.constant 0 : i32
    return %arg0, %c0_i32 : i32, i32
  }
}

</mosaic_0001>

<bundles_post_ra>
// kernel: dyedcnn_forward.5
= control target key start
LH: loop header
LB: loop body
LE: loop exit
PB: predicated region body
PF: predicated region fallthrough
CT: control target
= control target key end

     0   :  { %s836_s15 = smov 0   ;;  %s838_s16 = smov 0   ;;  %s963_s0 = inlined_call_operand.vmem [shape: bf16[4,16,8], index: 0, kind: input, shape index: {}, may-alias: {0,1}]   ;;  %s964_s1 = inlined_call_operand.vmem [shape: bf16[4,16,8], index: 1, kind: input, shape index: {}, may-alias: {0,1}]   ;;  %s965_s2 = inlined_call_operand.vmem [shape: f32[4,16,1], index: 2, kind: input, shape index: {}]   ;;  %s966_s3 = inlined_call_operand.vmem [shape: f32[4,1,16], index: 3, kind: input, shape index: {}]   ;;  %s967_s4 = inlined_call_operand.vmem [shape: s32[4,16,8], index: 4, kind: output, shape index: {}]  }
   0x1   :  { %s840_s17 = smov 0   ;;  %s842_s18 = smov 0  }
   0x2   :  { %s844_s19 = smov 0  }
   0x3 LB: > { %s23_s20 = sadd.s32 1, %s798_s17  ;;  %s26_s21 = sadd.s32 1, %s802_s18  ;;  %s806_s19 = sphi %s844_s19, %s14_s19   ;;  %s802_s18 = sphi %s842_s18, %s971_s18   ;;  %s798_s17 = sphi %s840_s17, %s970_s17   ;;  %s794_s16 = sphi %s838_s16, %s969_s16   ;;  %s790_s15 = sphi %s836_s15, %s968_s15  }
   0x4   : > { %p24_p0 = scmp.ge.s32.totalorder %s23_s20, 2  ;;  %p699_p1 = scmp.ge.s32.totalorder %s806_s19, 1 }
   0x5   : > { %p214_p2 = scmp.lt.s32.totalorder %s806_s19, 9 }
   0x6   : > { %s973_s20 = smov (%p24_p0, %s23_s20), 0  ;;  %s975_s21 = smov (!%p24_p0, %s26_s21), %s802_s18 }
   0x7   : > { %p215_p3 = pnand %p699_p1, %p214_p2  ;;  %p28_p4 = scmp.ge.s32.totalorder %s975_s21, 4 }
   0x8   : > { %p262_p5 = scmp.lt.s32.totalorder (!%p215_p3), %s794_s16, 3  ;;  %p264_p6 = scmp.lt.s32.totalorder (!%p215_p3), %s790_s15, 1  ;;  %v808_v0 = vmov (!%p215_p3), 0.0   ;;  %vm809_vm0 = vmmov (!%p215_p3), 0   ;;  %v810_v1 = vmov (!%p215_p3), 0   ;;  %vm303_vm1 = vcmask (!%p215_p3), 64512  }
   0x9   : > { %s977_s21 = smov (%p28_p4, %s975_s21), 0  ;;  %218 = sbr.rel (%p215_p3) target bundleno = 3783 (0xec7), region = 36 }
   0xa   : > { %717 = vmatprep.subr.bf16.mxu0 (!%p215_p3), %v808_v0  ;;  %719 = vmatprep.mubr.msk.bf16.mxu0 (!%p215_p3), %vm809_vm0, %v808_v0  ;;  %vm369_vm2 = vcmask (!%p215_p3), 130048   ;;  %v366_v16 = vlaneseq (!%p215_p3)  ;;  %s711_s14 = sshll.u32 (!%p215_p3), %s794_s16, 4 }
   0xb   : > { %766 = vset.pattern.permute.xlu0 (!%p215_p3), %v810_v1  ;;  %v900_v44 = vstv (!%p215_p3), %s711_s14 }
   0xc   : > { %v891_v17 = vand.u32 (!%p215_p3), 127, %v366_v16 }
   0xe   : > { %vm390_vm8 = vcmp.eq.s32.totalorder (!%p215_p3), %v891_v17, 0  ;;  %vm416_vm9 = vcmp.eq.s32.totalorder (!%p215_p3), %v891_v17, 1  ;;  %vm441_vm13 = vcmp.eq.s32.totalorder (!%p215_p3), %v891_v17, 2 }
  0x10   : > { %s263_s22 = scalar_select %p262_p5, %s794_s16, 3 }
  0x11   : > { %s979_s15 = smov (!%p264_p6, %s790_s15), 1 }
  0x12   : > { %s714_s23 = sshll.u32 %s263_s22, 3  ;;  %s700_s24 = sshll.u32 %s263_s22, 1 }
  0x13   : > { %s274_s27 = scalar_lea.vmem %s964_s1, %s714_s23  ;;  %s873_s28 = sadd.s32 %s700_s24, %s979_s15 }
  0x14   : > { %v767_v2 = vld [vmem:[%s274_s27] sm:$0xff]   ;;  %s701_s29 = sshll.u32 %s873_s28, 2  ;;  %s705_s30 = sshll.u32 %s873_s28, 3 }
  0x15   : > { %v308_v3 = vsel %vm303_vm1, %v767_v2, 0  ;;  %s282_s7 = scalar_lea.vmem %s965_s2, %s705_s30  ;;  %s269_s10 = scalar_lea.vmem %s963_s0, %s701_s29 }
  0x16   : > { %718 = vmatpush3.bf16.xpose.msra.mxu0 %v308_v3  ;;  %v350_v4 = vld [vmem:[%s282_s7] sm:$0xff]  ;;  %s285_s13 = scalar_lea.vmem %s966_s3, %s263_s22  ;;  %s293_s22 = scalar_lea.vmem %s967_s4, %s705_s30 }
  0x17   : > { %354 = vperm.xlu0 %766, %v350_v4   ;;  %v295_v5 = vld [vmem:[%s269_s10] sm:$0xf] }
  0x18   : > { %v710_v6 = vld [vmem:[%s285_s13] ss:$0 sm:$0xff] }
  0x1d   : > { %720 = vmatmul.mubr.msk.bf16.vlgmr.msra.gmra.mrb[0].mxu0 %vm303_vm1, %v295_v5 }
  0x96   : > { %v355_v7 = vpop.permute.xlu0 %354 }
  0x97   : > { %v363_v8 = vadd.f32 %v710_v6, %v355_v7 }
  0xf0   : > { %v344_v9 = vpop.f32.mrb[0].mxu0 }
  0xf1   : > { %v364_v10 = vmul.f32 2.0, %v344_v9  ;;  %v721_v11 = vpop.f32.mrb[1].mxu0 }
  0xf2   : > { %v347_v12 = vpop.f32.mrb[2].mxu0 }
  0xf3   : > { %v365_v13 = vsub.f32 %v363_v8, %v364_v10  ;;  %v722_v14 = vpop.f32.mrb[3].mxu0 }
  0xf5   : > { %v370_v15 = vsel %vm369_vm2, %v365_v13, inf }
  0xf6   : > { %371 = vmin.xlane.f32.xlu0 %v370_v15 }
 0x183   : > { %v372_v18 = vpop.xlane.xlu0 %371 }
 0x184   : > { %vm373_vm3 = vcmp.eq.f32.partialorder %v365_v13, %v372_v18 }
 0x185   : > { %v374_v19 = vsel %vm373_vm3, %v891_v17, 16  ;;  %vm466_vm3 = vcmp.eq.s32.totalorder %v891_v17, 3 }
 0x186   : > { %v375_v20 = vsel %vm369_vm2, %v374_v19, 2147483647 }
 0x187   : > { %v377_v21 = vshra.s32 %v375_v20, 16  ;;  %v376_v23 = vand.u32 65535, %v375_v20 }
 0x189   : > { %v379_v22 = vcvt.s32.f32 %v377_v21  ;;  %v378_v25 = vcvt.s32.f32 %v376_v23 }
 0x18b   : > { %380 = vmin.xlane.f32.xlu1 %v379_v22 }
 0x218   : > { %v381_v24 = vpop.xlane.xlu1 %380 }
 0x219   : > { %vm382_vm4 = vcmp.eq.f32.partialorder %v379_v22, %v381_v24  ;;  %v387_v27 = vcvt.f32.s32 %v381_v24 }
 0x21a   : > { %v383_v26 = vsel %vm382_vm4, %v378_v25, inf }
 0x21b   : > { %384 = vmin.xlane.f32.xlu1 %v383_v26  ;;  %v388_v29 = vshll.u32 %v387_v27, 16 }
 0x2a8   : > { %v385_v28 = vpop.xlane.xlu1 %384 }
 0x2a9   : > { %v386_v30 = vcvt.f32.s32 %v385_v28 }
 0x2ab   : > { %v389_v31 = vadd.s32 %v388_v29, %v386_v30 }
 0x2ad   : > { %vm394_vm5 = vcmp.eq.s32.totalorder %v891_v17, %v389_v31  ;;  %v392_v48 = vadd.s32 %v900_v44, %v389_v31 }
 0x2ae   : > { %v395_v32 = vsel %vm394_vm5, inf, %v365_v13 }
 0x2af   : > { %v396_v33 = vsel %vm369_vm2, %v395_v32, inf  ;;  %v393_v51 = vsel %vm390_vm8, %v392_v48, 0 }
 0x2b0   : > { %397 = vmin.xlane.f32.xlu1 %v396_v33 }
 0x33d   : > { %v398_v34 = vpop.xlane.xlu1 %397 }
 0x33e   : > { %vm399_vm6 = vcmp.eq.f32.partialorder %v395_v32, %v398_v34 }
 0x33f   : > { %v400_v35 = vsel %vm399_vm6, %v891_v17, 16 }
 0x340   : > { %v401_v36 = vsel %vm369_vm2, %v400_v35, 2147483647 }
 0x341   : > { %v403_v37 = vshra.s32 %v401_v36, 16  ;;  %v402_v39 = vand.u32 65535, %v401_v36 }
 0x343   : > { %v405_v38 = vcvt.s32.f32 %v403_v37  ;;  %v404_v41 = vcvt.s32.f32 %v402_v39 }
 0x345   : > { %406 = vmin.xlane.f32.xlu1 %v405_v38 }
 0x3d2   : > { %v407_v40 = vpop.xlane.xlu1 %406 }
 0x3d3   : > { %vm408_vm7 = vcmp.eq.f32.partialorder %v405_v38, %v407_v40  ;;  %v413_v43 = vcvt.f32.s32 %v407_v40 }
 0x3d4   : > { %v409_v42 = vsel %vm408_vm7, %v404_v41, inf  ;;  %vm491_vm7 = vcmp.eq.s32.totalorder %v891_v17, 4 }
 0x3d5   : > { %410 = vmin.xlane.f32.xlu1 %v409_v42  ;;  %v414_v46 = vshll.u32 %v413_v43, 16 }
 0x462   : > { %v411_v45 = vpop.xlane.xlu1 %410 }
 0x463   : > { %v412_v47 = vcvt.f32.s32 %v411_v45 }
 0x465   : > { %v415_v49 = vadd.s32 %v414_v46, %v412_v47 }
 0x467   : > { %v417_v50 = vadd.s32 %v415_v49, %v900_v44  ;;  %vm419_vm10 = vcmp.eq.s32.totalorder %v891_v17, %v415_v49 }
 0x468   : > { %v420_v52 = vsel %vm419_vm10, inf, %v395_v32 }
 0x469   : > { %v418_v53 = vsel %vm416_vm9, %v417_v50, %v393_v51  ;;  %v421_v54 = vsel %vm369_vm2, %v420_v52, inf }
 0x46a   : > { %422 = vmin.xlane.f32.xlu1 %v421_v54 }
 0x4f7   : > { %v423_v55 = vpop.xlane.xlu1 %422 }
 0x4f8   : > { %vm424_vm11 = vcmp.eq.f32.partialorder %v420_v52, %v423_v55 }
 0x4f9   : > { %v425_v56 = vsel %vm424_vm11, %v891_v17, 16  ;;  %vm516_vm11 = vcmp.eq.s32.totalorder %v891_v17, 5 }
 0x4fa   : > { %v426_v57 = vsel %vm369_vm2, %v425_v56, 2147483647 }
 0x4fb   : > { %v428_v58 = vshra.s32 %v426_v57, 16  ;;  %v427_v60 = vand.u32 65535, %v426_v57 }
 0x4fd   : > { %v430_v59 = vcvt.s32.f32 %v428_v58  ;;  %v429_v62 = vcvt.s32.f32 %v427_v60 }
 0x4ff   : > { %431 = vmin.xlane.f32.xlu1 %v430_v59 }
 0x58c   : > { %v432_v61 = vpop.xlane.xlu1 %431 }
 0x58d   : > { %vm433_vm12 = vcmp.eq.f32.partialorder %v430_v59, %v432_v61  ;;  %v438_v0 = vcvt.f32.s32 %v432_v61 }
 0x58e   : > { %v434_v63 = vsel %vm433_vm12, %v429_v62, inf }
 0x58f   : > { %435 = vmin.xlane.f32.xlu1 %v434_v63  ;;  %v439_v2 = vshll.u32 %v438_v0, 16 }
 0x61c   : > { %v436_v1 = vpop.xlane.xlu1 %435 }
 0x61d   : > { %v437_v3 = vcvt.f32.s32 %v436_v1 }
 0x61f   : > { %v440_v4 = vadd.s32 %v439_v2, %v437_v3 }
 0x621   : > { %v442_v5 = vadd.s32 %v440_v4, %v900_v44  ;;  %vm444_vm14 = vcmp.eq.s32.totalorder %v891_v17, %v440_v4 }
 0x622   : > { %v445_v6 = vsel %vm444_vm14, inf, %v420_v52 }
 0x623   : > { %v443_v7 = vsel %vm441_vm13, %v442_v5, %v418_v53  ;;  %v446_v8 = vsel %vm369_vm2, %v445_v6, inf }
 0x624   : > { %447 = vmin.xlane.f32.xlu1 %v446_v8 }
 0x6b1   : > { %v448_v9 = vpop.xlane.xlu1 %447 }
 0x6b2   : > { %vm449_vm15 = vcmp.eq.f32.partialorder %v445_v6, %v448_v9 }
 0x6b3   : > { %v450_v10 = vsel %vm449_vm15, %v891_v17, 16  ;;  %vm541_vm15 = vcmp.eq.s32.totalorder %v891_v17, 6 }
 0x6b4   : > { %v451_v11 = vsel %vm369_vm2, %v450_v10, 2147483647 }
 0x6b5   : > { %v453_v12 = vshra.s32 %v451_v11, 16  ;;  %v452_v14 = vand.u32 65535, %v451_v11 }
 0x6b7   : > { %v455_v13 = vcvt.s32.f32 %v453_v12  ;;  %v454_v16 = vcvt.s32.f32 %v452_v14 }
 0x6b9   : > { %456 = vmin.xlane.f32.xlu0 %v455_v13 }
 0x746   : > { %v457_v15 = vpop.xlane.xlu0 %456 }
 0x747   : > { %vm458_vm0 = vcmp.eq.f32.partialorder %v455_v13, %v457_v15  ;;  %v463_v19 = vcvt.f32.s32 %v457_v15 }
 0x748   : > { %v459_v18 = vsel %vm458_vm0, %v454_v16, inf }
 0x749   : > { %460 = vmin.xlane.f32.xlu1 %v459_v18  ;;  %v464_v21 = vshll.u32 %v463_v19, 16 }
 0x7d6   : > { %v461_v20 = vpop.xlane.xlu1 %460 }
 0x7d7   : > { %v462_v22 = vcvt.f32.s32 %v461_v20 }
 0x7d9   : > { %v465_v23 = vadd.s32 %v464_v21, %v462_v22 }
 0x7db   : > { %v467_v24 = vadd.s32 %v465_v23, %v900_v44  ;;  %vm469_vm4 = vcmp.eq.s32.totalorder %v891_v17, %v465_v23 }
 0x7dc   : > { %v470_v25 = vsel %vm469_vm4, inf, %v445_v6 }
 0x7dd   : > { %v468_v26 = vsel %vm466_vm3, %v467_v24, %v443_v7  ;;  %v471_v27 = vsel %vm369_vm2, %v470_v25, inf }
 0x7de   : > { %472 = vmin.xlane.f32.xlu0 %v471_v27 }
 0x86b   : > { %v473_v28 = vpop.xlane.xlu0 %472 }
 0x86c   : > { %vm474_vm5 = vcmp.eq.f32.partialorder %v470_v25, %v473_v28 }
 0x86d   : > { %v475_v29 = vsel %vm474_vm5, %v891_v17, 16  ;;  %vm566_vm5 = vcmp.eq.s32.totalorder %v891_v17, 7 }
 0x86e   : > { %v476_v30 = vsel %vm369_vm2, %v475_v29, 2147483647 }
 0x86f   : > { %v478_v31 = vshra.s32 %v476_v30, 16  ;;  %v477_v33 = vand.u32 65535, %v476_v30 }
 0x871   : > { %v480_v32 = vcvt.s32.f32 %v478_v31  ;;  %v479_v35 = vcvt.s32.f32 %v477_v33 }
 0x873   : > { %481 = vmin.xlane.f32.xlu1 %v480_v32 }
 0x900   : > { %v482_v34 = vpop.xlane.xlu1 %481 }
 0x901   : > { %vm483_vm6 = vcmp.eq.f32.partialorder %v480_v32, %v482_v34  ;;  %v488_v37 = vcvt.f32.s32 %v482_v34 }
 0x902   : > { %v484_v36 = vsel %vm483_vm6, %v479_v35, inf }
 0x903   : > { %485 = vmin.xlane.f32.xlu0 %v484_v36  ;;  %v489_v39 = vshll.u32 %v488_v37, 16 }
 0x990   : > { %v486_v38 = vpop.xlane.xlu0 %485 }
 0x991   : > { %v487_v40 = vcvt.f32.s32 %v486_v38 }
 0x993   : > { %v490_v41 = vadd.s32 %v489_v39, %v487_v40 }
 0x995   : > { %v492_v42 = vadd.s32 %v490_v41, %v900_v44  ;;  %vm494_vm8 = vcmp.eq.s32.totalorder %v891_v17, %v490_v41 }
 0x996   : > { %v495_v43 = vsel %vm494_vm8, inf, %v470_v25 }
 0x997   : > { %v493_v45 = vsel %vm491_vm7, %v492_v42, %v468_v26  ;;  %v496_v46 = vsel %vm369_vm2, %v495_v43, inf }
 0x998   : > { %497 = vmin.xlane.f32.xlu1 %v496_v46 }
 0xa25   : > { %v498_v47 = vpop.xlane.xlu1 %497 }
 0xa26   : > { %vm499_vm9 = vcmp.eq.f32.partialorder %v495_v43, %v498_v47 }
 0xa27   : > { %v500_v48 = vsel %vm499_vm9, %v891_v17, 16 }
 0xa28   : > { %v501_v49 = vsel %vm369_vm2, %v500_v48, 2147483647 }
 0xa29   : > { %v503_v50 = vshra.s32 %v501_v49, 16  ;;  %v502_v52 = vand.u32 65535, %v501_v49 }
 0xa2b   : > { %v505_v51 = vcvt.s32.f32 %v503_v50  ;;  %v504_v54 = vcvt.s32.f32 %v502_v52 }
 0xa2d   : > { %506 = vmin.xlane.f32.xlu0 %v505_v51 }
 0xaba   : > { %v507_v53 = vpop.xlane.xlu0 %506 }
 0xabb   : > { %vm508_vm10 = vcmp.eq.f32.partialorder %v505_v51, %v507_v53  ;;  %v513_v56 = vcvt.f32.s32 %v507_v53 }
 0xabc   : > { %v509_v55 = vsel %vm508_vm10, %v504_v54, inf }
 0xabd   : > { %510 = vmin.xlane.f32.xlu1 %v509_v55  ;;  %v514_v58 = vshll.u32 %v513_v56, 16 }
 0xb4a   : > { %v511_v57 = vpop.xlane.xlu1 %510 }
 0xb4b   : > { %v512_v59 = vcvt.f32.s32 %v511_v57 }
 0xb4d   : > { %v515_v60 = vadd.s32 %v514_v58, %v512_v59 }
 0xb4f   : > { %v517_v61 = vadd.s32 %v515_v60, %v900_v44  ;;  %vm519_vm12 = vcmp.eq.s32.totalorder %v891_v17, %v515_v60 }
 0xb50   : > { %v520_v62 = vsel %vm519_vm12, inf, %v495_v43 }
 0xb51   : > { %v518_v63 = vsel %vm516_vm11, %v517_v61, %v493_v45  ;;  %v521_v0 = vsel %vm369_vm2, %v520_v62, inf }
 0xb52   : > { %522 = vmin.xlane.f32.xlu0 %v521_v0 }
 0xbdf   : > { %v523_v1 = vpop.xlane.xlu0 %522 }
 0xbe0   : > { %vm524_vm13 = vcmp.eq.f32.partialorder %v520_v62, %v523_v1 }
 0xbe1   : > { %v525_v2 = vsel %vm524_vm13, %v891_v17, 16 }
 0xbe2   : > { %v526_v3 = vsel %vm369_vm2, %v525_v2, 2147483647 }
 0xbe3   : > { %v528_v4 = vshra.s32 %v526_v3, 16  ;;  %v527_v6 = vand.u32 65535, %v526_v3 }
 0xbe5   : > { %v530_v5 = vcvt.s32.f32 %v528_v4  ;;  %v529_v8 = vcvt.s32.f32 %v527_v6 }
 0xbe7   : > { %531 = vmin.xlane.f32.xlu1 %v530_v5 }
 0xc74   : > { %v532_v7 = vpop.xlane.xlu1 %531 }
 0xc75   : > { %vm533_vm14 = vcmp.eq.f32.partialorder %v530_v5, %v532_v7  ;;  %v538_v10 = vcvt.f32.s32 %v532_v7 }
 0xc76   : > { %v534_v9 = vsel %vm533_vm14, %v529_v8, inf }
 0xc77   : > { %535 = vmin.xlane.f32.xlu0 %v534_v9  ;;  %v539_v12 = vshll.u32 %v538_v10, 16 }
 0xd04   : > { %v536_v11 = vpop.xlane.xlu0 %535 }
 0xd05   : > { %v537_v13 = vcvt.f32.s32 %v536_v11 }
 0xd07   : > { %v540_v14 = vadd.s32 %v539_v12, %v537_v13 }
 0xd09   : > { %v542_v15 = vadd.s32 %v540_v14, %v900_v44  ;;  %vm544_vm0 = vcmp.eq.s32.totalorder %v891_v17, %v540_v14 }
 0xd0a   : > { %v545_v16 = vsel %vm544_vm0, inf, %v520_v62 }
 0xd0b   : > { %v543_v18 = vsel %vm541_vm15, %v542_v15, %v518_v63  ;;  %v546_v19 = vsel %vm369_vm2, %v545_v16, inf }
 0xd0c   : > { %547 = vmin.xlane.f32.xlu1 %v546_v19 }
 0xd99   : > { %v548_v20 = vpop.xlane.xlu1 %547 }
 0xd9a   : > { %vm549_vm3 = vcmp.eq.f32.partialorder %v545_v16, %v548_v20 }
 0xd9b   : > { %v550_v21 = vsel %vm549_vm3, %v891_v17, 16 }
 0xd9c   : > { %v551_v22 = vsel %vm369_vm2, %v550_v21, 2147483647 }
 0xd9d   : > { %v553_v23 = vshra.s32 %v551_v22, 16  ;;  %v552_v25 = vand.u32 65535, %v551_v22 }
 0xd9f   : > { %v555_v24 = vcvt.s32.f32 %v553_v23  ;;  %v554_v27 = vcvt.s32.f32 %v552_v25 }
 0xda1   : > { %556 = vmin.xlane.f32.xlu0 %v555_v24 }
 0xe2e   : > { %v557_v26 = vpop.xlane.xlu0 %556 }
 0xe2f   : > { %vm558_vm4 = vcmp.eq.f32.partialorder %v555_v24, %v557_v26  ;;  %v563_v29 = vcvt.f32.s32 %v557_v26 }
 0xe30   : > { %v559_v28 = vsel %vm558_vm4, %v554_v27, inf }
 0xe31   : > { %560 = vmin.xlane.f32.xlu1 %v559_v28  ;;  %v564_v31 = vshll.u32 %v563_v29, 16 }
 0xebe   : > { %v561_v30 = vpop.xlane.xlu1 %560 }
 0xebf   : > { %v562_v32 = vcvt.f32.s32 %v561_v30 }
 0xec1   : > { %v565_v33 = vadd.s32 %v564_v31, %v562_v32 }
 0xec3   : > { %v567_v34 = vadd.s32 %v565_v33, %v900_v44 }
 0xec5   : > { %v568_v35 = vsel %vm566_vm5, %v567_v34, %v543_v18 }
 0xec6   : > { %569 = vst.msk [vmem:[%s293_s22] sm:$0xff] %vm303_vm1, %v568_v35 }
 0xec7 PF: > { %s14_s19 = sadd.s32 1, %s806_s19   ;;  %s968_s15 = smov %s798_s17 }
 0xec8   : > { %p11_p7 = scmp.ge.s32.totalorder %s14_s19, 10   ;;  %s969_s16 = smov %s802_s18 }
 0xec9   : > { %s970_s17 = smov %s973_s20  ;;  %s971_s18 = smov %s977_s21 }
 0xeca   :  { %13 = sbr.rel (!%p11_p7) target bundleno = 3 (0x3), region = 75 }

// kernel: dyedcnn_forward.7
= control target key start
LH: loop header
LB: loop body
LE: loop exit
PB: predicated region body
PF: predicated region fallthrough
CT: control target
= control target key end

     0   :  { %s837_s15 = smov 0   ;;  %s839_s16 = smov 0   ;;  %s961_s0 = inlined_call_operand.vmem [shape: bf16[4,16,64], index: 0, kind: input, shape index: {}, may-alias: {0,1}]   ;;  %s962_s1 = inlined_call_operand.vmem [shape: bf16[4,16,64], index: 1, kind: input, shape index: {}, may-alias: {0,1}]   ;;  %s963_s2 = inlined_call_operand.vmem [shape: f32[4,16,1], index: 2, kind: input, shape index: {}]   ;;  %s964_s3 = inlined_call_operand.vmem [shape: f32[4,1,16], index: 3, kind: input, shape index: {}]   ;;  %s965_s4 = inlined_call_operand.vmem [shape: s32[4,16,8], index: 4, kind: output, shape index: {}]  }
   0x1   :  { %s841_s17 = smov 0   ;;  %s843_s18 = smov 0  }
   0x2   :  { %s845_s19 = smov 0  }
   0x3 LB: > { %s23_s20 = sadd.s32 1, %s799_s17  ;;  %s26_s21 = sadd.s32 1, %s803_s18  ;;  %s807_s19 = sphi %s845_s19, %s14_s19   ;;  %s803_s18 = sphi %s843_s18, %s969_s18   ;;  %s799_s17 = sphi %s841_s17, %s968_s17   ;;  %s795_s16 = sphi %s839_s16, %s967_s16   ;;  %s791_s15 = sphi %s837_s15, %s966_s15  }
   0x4   : > { %p24_p0 = scmp.ge.s32.totalorder %s23_s20, 2  ;;  %p700_p1 = scmp.ge.s32.totalorder %s807_s19, 1 }
   0x5   : > { %p214_p2 = scmp.lt.s32.totalorder %s807_s19, 9 }
   0x6   : > { %s971_s20 = smov (%p24_p0, %s23_s20), 0  ;;  %s973_s21 = smov (!%p24_p0, %s26_s21), %s803_s18 }
   0x7   : > { %p215_p3 = pnand %p700_p1, %p214_p2  ;;  %p28_p4 = scmp.ge.s32.totalorder %s973_s21, 4 }
   0x8   : > { %p262_p5 = scmp.lt.s32.totalorder (!%p215_p3), %s795_s16, 3  ;;  %p264_p6 = scmp.lt.s32.totalorder (!%p215_p3), %s791_s15, 1  ;;  %v809_v0 = vmov (!%p215_p3), 0.0   ;;  %vm810_vm0 = vmmov (!%p215_p3), 0   ;;  %v811_v1 = vmov (!%p215_p3), 0   ;;  %vm303_vm1 = vcmask (!%p215_p3), 523264  }
   0x9   : > { %s975_s21 = smov (%p28_p4, %s973_s21), 0  ;;  %218 = sbr.rel (%p215_p3) target bundleno = 3783 (0xec7), region = 36 }
   0xa   : > { %718 = vmatprep.subr.bf16.mxu0 (!%p215_p3), %v809_v0  ;;  %720 = vmatprep.mubr.msk.bf16.mxu0 (!%p215_p3), %vm810_vm0, %v809_v0  ;;  %vm369_vm2 = vcmask (!%p215_p3), 130048   ;;  %v366_v16 = vlaneseq (!%p215_p3)  ;;  %s712_s14 = sshll.u32 (!%p215_p3), %s795_s16, 4 }
   0xb   : > { %767 = vset.pattern.permute.xlu0 (!%p215_p3), %v811_v1  ;;  %v899_v44 = vstv (!%p215_p3), %s712_s14 }
   0xc   : > { %v890_v17 = vand.u32 (!%p215_p3), 127, %v366_v16 }
   0xe   : > { %vm390_vm8 = vcmp.eq.s32.totalorder (!%p215_p3), %v890_v17, 0  ;;  %vm416_vm9 = vcmp.eq.s32.totalorder (!%p215_p3), %v890_v17, 1  ;;  %vm441_vm13 = vcmp.eq.s32.totalorder (!%p215_p3), %v890_v17, 2 }
  0x10   : > { %s263_s22 = scalar_select %p262_p5, %s795_s16, 3 }
  0x11   : > { %s977_s15 = smov (!%p264_p6, %s791_s15), 1 }
  0x12   : > { %s715_s23 = sshll.u32 %s263_s22, 3  ;;  %s701_s24 = sshll.u32 %s263_s22, 1 }
  0x13   : > { %s274_s27 = scalar_lea.vmem %s962_s1, %s715_s23  ;;  %s874_s28 = sadd.s32 %s701_s24, %s977_s15 }
  0x14   : > { %v768_v2 = vld [vmem:[%s274_s27] sm:$0xff]   ;;  %s702_s29 = sshll.u32 %s874_s28, 2  ;;  %s706_s30 = sshll.u32 %s874_s28, 3 }
  0x15   : > { %v308_v3 = vsel %vm303_vm1, %v768_v2, 0  ;;  %s282_s7 = scalar_lea.vmem %s963_s2, %s706_s30  ;;  %s269_s10 = scalar_lea.vmem %s961_s0, %s702_s29 }
  0x16   : > { %719 = vmatpush3.bf16.xpose.msra.mxu0 %v308_v3  ;;  %v350_v4 = vld [vmem:[%s282_s7] sm:$0xff]  ;;  %s285_s13 = scalar_lea.vmem %s964_s3, %s263_s22  ;;  %s293_s22 = scalar_lea.vmem %s965_s4, %s706_s30 }
  0x17   : > { %354 = vperm.xlu0 %767, %v350_v4   ;;  %v295_v5 = vld [vmem:[%s269_s10] sm:$0xf] }
  0x18   : > { %v711_v6 = vld [vmem:[%s285_s13] ss:$0 sm:$0xff] }
  0x1d   : > { %721 = vmatmul.mubr.msk.bf16.vlgmr.msra.gmra.mrb[0].mxu0 %vm303_vm1, %v295_v5  ;;  %vm466_vm1 = vcmp.eq.s32.totalorder %v890_v17, 3 }
  0x96   : > { %v355_v7 = vpop.permute.xlu0 %354 }
  0x97   : > { %v363_v8 = vadd.f32 %v711_v6, %v355_v7 }
  0xf0   : > { %v344_v9 = vpop.f32.mrb[0].mxu0 }
  0xf1   : > { %v364_v10 = vmul.f32 2.0, %v344_v9  ;;  %v722_v11 = vpop.f32.mrb[1].mxu0 }
  0xf2   : > { %v347_v12 = vpop.f32.mrb[2].mxu0 }
  0xf3   : > { %v365_v13 = vsub.f32 %v363_v8, %v364_v10  ;;  %v723_v14 = vpop.f32.mrb[3].mxu0 }
  0xf5   : > { %v370_v15 = vsel %vm369_vm2, %v365_v13, inf }
  0xf6   : > { %371 = vmin.xlane.f32.xlu0 %v370_v15 }
 0x183   : > { %v372_v18 = vpop.xlane.xlu0 %371 }
 0x184   : > { %vm373_vm3 = vcmp.eq.f32.partialorder %v365_v13, %v372_v18 }
 0x185   : > { %v374_v19 = vsel %vm373_vm3, %v890_v17, 16 }
 0x186   : > { %v375_v20 = vsel %vm369_vm2, %v374_v19, 2147483647 }
 0x187   : > { %v377_v21 = vshra.s32 %v375_v20, 16  ;;  %v376_v23 = vand.u32 65535, %v375_v20 }
 0x189   : > { %v379_v22 = vcvt.s32.f32 %v377_v21  ;;  %v378_v25 = vcvt.s32.f32 %v376_v23 }
 0x18b   : > { %380 = vmin.xlane.f32.xlu1 %v379_v22 }
 0x218   : > { %v381_v24 = vpop.xlane.xlu1 %380 }
 0x219   : > { %vm382_vm4 = vcmp.eq.f32.partialorder %v379_v22, %v381_v24  ;;  %v387_v27 = vcvt.f32.s32 %v381_v24 }
 0x21a   : > { %v383_v26 = vsel %vm382_vm4, %v378_v25, inf }
 0x21b   : > { %384 = vmin.xlane.f32.xlu1 %v383_v26  ;;  %v388_v29 = vshll.u32 %v387_v27, 16 }
 0x2a8   : > { %v385_v28 = vpop.xlane.xlu1 %384 }
 0x2a9   : > { %v386_v30 = vcvt.f32.s32 %v385_v28 }
 0x2ab   : > { %v389_v31 = vadd.s32 %v388_v29, %v386_v30 }
 0x2ad   : > { %vm394_vm5 = vcmp.eq.s32.totalorder %v890_v17, %v389_v31  ;;  %v392_v48 = vadd.s32 %v899_v44, %v389_v31 }
 0x2ae   : > { %v395_v32 = vsel %vm394_vm5, inf, %v365_v13 }
 0x2af   : > { %v396_v33 = vsel %vm369_vm2, %v395_v32, inf  ;;  %v393_v51 = vsel %vm390_vm8, %v392_v48, 0 }
 0x2b0   : > { %397 = vmin.xlane.f32.xlu1 %v396_v33 }
 0x33d   : > { %v398_v34 = vpop.xlane.xlu1 %397 }
 0x33e   : > { %vm399_vm6 = vcmp.eq.f32.partialorder %v395_v32, %v398_v34 }
 0x33f   : > { %v400_v35 = vsel %vm399_vm6, %v890_v17, 16  ;;  %vm491_vm6 = vcmp.eq.s32.totalorder %v890_v17, 4 }
 0x340   : > { %v401_v36 = vsel %vm369_vm2, %v400_v35, 2147483647 }
 0x341   : > { %v403_v37 = vshra.s32 %v401_v36, 16  ;;  %v402_v39 = vand.u32 65535, %v401_v36 }
 0x343   : > { %v405_v38 = vcvt.s32.f32 %v403_v37  ;;  %v404_v41 = vcvt.s32.f32 %v402_v39 }
 0x345   : > { %406 = vmin.xlane.f32.xlu1 %v405_v38 }
 0x3d2   : > { %v407_v40 = vpop.xlane.xlu1 %406 }
 0x3d3   : > { %vm408_vm7 = vcmp.eq.f32.partialorder %v405_v38, %v407_v40  ;;  %v413_v43 = vcvt.f32.s32 %v407_v40 }
 0x3d4   : > { %v409_v42 = vsel %vm408_vm7, %v404_v41, inf }
 0x3d5   : > { %410 = vmin.xlane.f32.xlu1 %v409_v42  ;;  %v414_v46 = vshll.u32 %v413_v43, 16 }
 0x462   : > { %v411_v45 = vpop.xlane.xlu1 %410 }
 0x463   : > { %v412_v47 = vcvt.f32.s32 %v411_v45 }
 0x465   : > { %v415_v49 = vadd.s32 %v414_v46, %v412_v47 }
 0x467   : > { %v417_v50 = vadd.s32 %v415_v49, %v899_v44  ;;  %vm419_vm10 = vcmp.eq.s32.totalorder %v890_v17, %v415_v49 }
 0x468   : > { %v420_v52 = vsel %vm419_vm10, inf, %v395_v32  ;;  %vm516_vm10 = vcmp.eq.s32.totalorder %v890_v17, 5 }
 0x469   : > { %v418_v53 = vsel %vm416_vm9, %v417_v50, %v393_v51  ;;  %v421_v54 = vsel %vm369_vm2, %v420_v52, inf }
 0x46a   : > { %422 = vmin.xlane.f32.xlu1 %v421_v54 }
 0x4f7   : > { %v423_v55 = vpop.xlane.xlu1 %422 }
 0x4f8   : > { %vm424_vm11 = vcmp.eq.f32.partialorder %v420_v52, %v423_v55 }
 0x4f9   : > { %v425_v56 = vsel %vm424_vm11, %v890_v17, 16 }
 0x4fa   : > { %v426_v57 = vsel %vm369_vm2, %v425_v56, 2147483647 }
 0x4fb   : > { %v428_v58 = vshra.s32 %v426_v57, 16  ;;  %v427_v60 = vand.u32 65535, %v426_v57 }
 0x4fd   : > { %v430_v59 = vcvt.s32.f32 %v428_v58  ;;  %v429_v62 = vcvt.s32.f32 %v427_v60 }
 0x4ff   : > { %431 = vmin.xlane.f32.xlu1 %v430_v59 }
 0x58c   : > { %v432_v61 = vpop.xlane.xlu1 %431 }
 0x58d   : > { %vm433_vm12 = vcmp.eq.f32.partialorder %v430_v59, %v432_v61  ;;  %v438_v0 = vcvt.f32.s32 %v432_v61 }
 0x58e   : > { %v434_v63 = vsel %vm433_vm12, %v429_v62, inf }
 0x58f   : > { %435 = vmin.xlane.f32.xlu1 %v434_v63  ;;  %v439_v2 = vshll.u32 %v438_v0, 16 }
 0x61c   : > { %v436_v1 = vpop.xlane.xlu1 %435 }
 0x61d   : > { %v437_v3 = vcvt.f32.s32 %v436_v1 }
 0x61f   : > { %v440_v4 = vadd.s32 %v439_v2, %v437_v3 }
 0x621   : > { %v442_v5 = vadd.s32 %v440_v4, %v899_v44  ;;  %vm444_vm14 = vcmp.eq.s32.totalorder %v890_v17, %v440_v4 }
 0x622   : > { %v445_v6 = vsel %vm444_vm14, inf, %v420_v52  ;;  %vm541_vm14 = vcmp.eq.s32.totalorder %v890_v17, 6 }
 0x623   : > { %v443_v7 = vsel %vm441_vm13, %v442_v5, %v418_v53  ;;  %v446_v8 = vsel %vm369_vm2, %v445_v6, inf }
 0x624   : > { %447 = vmin.xlane.f32.xlu1 %v446_v8 }
 0x6b1   : > { %v448_v9 = vpop.xlane.xlu1 %447 }
 0x6b2   : > { %vm449_vm15 = vcmp.eq.f32.partialorder %v445_v6, %v448_v9 }
 0x6b3   : > { %v450_v10 = vsel %vm449_vm15, %v890_v17, 16 }
 0x6b4   : > { %v451_v11 = vsel %vm369_vm2, %v450_v10, 2147483647 }
 0x6b5   : > { %v453_v12 = vshra.s32 %v451_v11, 16  ;;  %v452_v14 = vand.u32 65535, %v451_v11 }
 0x6b7   : > { %v455_v13 = vcvt.s32.f32 %v453_v12  ;;  %v454_v16 = vcvt.s32.f32 %v452_v14 }
 0x6b9   : > { %456 = vmin.xlane.f32.xlu0 %v455_v13 }
 0x746   : > { %v457_v15 = vpop.xlane.xlu0 %456 }
 0x747   : > { %vm458_vm0 = vcmp.eq.f32.partialorder %v455_v13, %v457_v15  ;;  %v463_v19 = vcvt.f32.s32 %v457_v15 }
 0x748   : > { %v459_v18 = vsel %vm458_vm0, %v454_v16, inf }
 0x749   : > { %460 = vmin.xlane.f32.xlu1 %v459_v18  ;;  %v464_v21 = vshll.u32 %v463_v19, 16 }
 0x7d6   : > { %v461_v20 = vpop.xlane.xlu1 %460 }
 0x7d7   : > { %v462_v22 = vcvt.f32.s32 %v461_v20 }
 0x7d9   : > { %v465_v23 = vadd.s32 %v464_v21, %v462_v22 }
 0x7db   : > { %v467_v24 = vadd.s32 %v465_v23, %v899_v44  ;;  %vm469_vm3 = vcmp.eq.s32.totalorder %v890_v17, %v465_v23 }
 0x7dc   : > { %v470_v25 = vsel %vm469_vm3, inf, %v445_v6  ;;  %vm566_vm3 = vcmp.eq.s32.totalorder %v890_v17, 7 }
 0x7dd   : > { %v468_v26 = vsel %vm466_vm1, %v467_v24, %v443_v7  ;;  %v471_v27 = vsel %vm369_vm2, %v470_v25, inf }
 0x7de   : > { %472 = vmin.xlane.f32.xlu0 %v471_v27 }
 0x86b   : > { %v473_v28 = vpop.xlane.xlu0 %472 }
 0x86c   : > { %vm474_vm4 = vcmp.eq.f32.partialorder %v470_v25, %v473_v28 }
 0x86d   : > { %v475_v29 = vsel %vm474_vm4, %v890_v17, 16 }
 0x86e   : > { %v476_v30 = vsel %vm369_vm2, %v475_v29, 2147483647 }
 0x86f   : > { %v478_v31 = vshra.s32 %v476_v30, 16  ;;  %v477_v33 = vand.u32 65535, %v476_v30 }
 0x871   : > { %v480_v32 = vcvt.s32.f32 %v478_v31  ;;  %v479_v35 = vcvt.s32.f32 %v477_v33 }
 0x873   : > { %481 = vmin.xlane.f32.xlu1 %v480_v32 }
 0x900   : > { %v482_v34 = vpop.xlane.xlu1 %481 }
 0x901   : > { %vm483_vm5 = vcmp.eq.f32.partialorder %v480_v32, %v482_v34  ;;  %v488_v37 = vcvt.f32.s32 %v482_v34 }
 0x902   : > { %v484_v36 = vsel %vm483_vm5, %v479_v35, inf }
 0x903   : > { %485 = vmin.xlane.f32.xlu0 %v484_v36  ;;  %v489_v39 = vshll.u32 %v488_v37, 16 }
 0x990   : > { %v486_v38 = vpop.xlane.xlu0 %485 }
 0x991   : > { %v487_v40 = vcvt.f32.s32 %v486_v38 }
 0x993   : > { %v490_v41 = vadd.s32 %v489_v39, %v487_v40 }
 0x995   : > { %v492_v42 = vadd.s32 %v490_v41, %v899_v44  ;;  %vm494_vm7 = vcmp.eq.s32.totalorder %v890_v17, %v490_v41 }
 0x996   : > { %v495_v43 = vsel %vm494_vm7, inf, %v470_v25 }
 0x997   : > { %v493_v45 = vsel %vm491_vm6, %v492_v42, %v468_v26  ;;  %v496_v46 = vsel %vm369_vm2, %v495_v43, inf }
 0x998   : > { %497 = vmin.xlane.f32.xlu1 %v496_v46 }
 0xa25   : > { %v498_v47 = vpop.xlane.xlu1 %497 }
 0xa26   : > { %vm499_vm8 = vcmp.eq.f32.partialorder %v495_v43, %v498_v47 }
 0xa27   : > { %v500_v48 = vsel %vm499_vm8, %v890_v17, 16 }
 0xa28   : > { %v501_v49 = vsel %vm369_vm2, %v500_v48, 2147483647 }
 0xa29   : > { %v503_v50 = vshra.s32 %v501_v49, 16  ;;  %v502_v52 = vand.u32 65535, %v501_v49 }
 0xa2b   : > { %v505_v51 = vcvt.s32.f32 %v503_v50  ;;  %v504_v54 = vcvt.s32.f32 %v502_v52 }
 0xa2d   : > { %506 = vmin.xlane.f32.xlu0 %v505_v51 }
 0xaba   : > { %v507_v53 = vpop.xlane.xlu0 %506 }
 0xabb   : > { %vm508_vm9 = vcmp.eq.f32.partialorder %v505_v51, %v507_v53  ;;  %v513_v56 = vcvt.f32.s32 %v507_v53 }
 0xabc   : > { %v509_v55 = vsel %vm508_vm9, %v504_v54, inf }
 0xabd   : > { %510 = vmin.xlane.f32.xlu1 %v509_v55  ;;  %v514_v58 = vshll.u32 %v513_v56, 16 }
 0xb4a   : > { %v511_v57 = vpop.xlane.xlu1 %510 }
 0xb4b   : > { %v512_v59 = vcvt.f32.s32 %v511_v57 }
 0xb4d   : > { %v515_v60 = vadd.s32 %v514_v58, %v512_v59 }
 0xb4f   : > { %v517_v61 = vadd.s32 %v515_v60, %v899_v44  ;;  %vm519_vm11 = vcmp.eq.s32.totalorder %v890_v17, %v515_v60 }
 0xb50   : > { %v520_v62 = vsel %vm519_vm11, inf, %v495_v43 }
 0xb51   : > { %v518_v63 = vsel %vm516_vm10, %v517_v61, %v493_v45  ;;  %v521_v0 = vsel %vm369_vm2, %v520_v62, inf }
 0xb52   : > { %522 = vmin.xlane.f32.xlu0 %v521_v0 }
 0xbdf   : > { %v523_v1 = vpop.xlane.xlu0 %522 }
 0xbe0   : > { %vm524_vm12 = vcmp.eq.f32.partialorder %v520_v62, %v523_v1 }
 0xbe1   : > { %v525_v2 = vsel %vm524_vm12, %v890_v17, 16 }
 0xbe2   : > { %v526_v3 = vsel %vm369_vm2, %v525_v2, 2147483647 }
 0xbe3   : > { %v528_v4 = vshra.s32 %v526_v3, 16  ;;  %v527_v6 = vand.u32 65535, %v526_v3 }
 0xbe5   : > { %v530_v5 = vcvt.s32.f32 %v528_v4  ;;  %v529_v8 = vcvt.s32.f32 %v527_v6 }
 0xbe7   : > { %531 = vmin.xlane.f32.xlu1 %v530_v5 }
 0xc74   : > { %v532_v7 = vpop.xlane.xlu1 %531 }
 0xc75   : > { %vm533_vm13 = vcmp.eq.f32.partialorder %v530_v5, %v532_v7  ;;  %v538_v10 = vcvt.f32.s32 %v532_v7 }
 0xc76   : > { %v534_v9 = vsel %vm533_vm13, %v529_v8, inf }
 0xc77   : > { %535 = vmin.xlane.f32.xlu0 %v534_v9  ;;  %v539_v12 = vshll.u32 %v538_v10, 16 }
 0xd04   : > { %v536_v11 = vpop.xlane.xlu0 %535 }
 0xd05   : > { %v537_v13 = vcvt.f32.s32 %v536_v11 }
 0xd07   : > { %v540_v14 = vadd.s32 %v539_v12, %v537_v13 }
 0xd09   : > { %v542_v15 = vadd.s32 %v540_v14, %v899_v44  ;;  %vm544_vm15 = vcmp.eq.s32.totalorder %v890_v17, %v540_v14 }
 0xd0a   : > { %v545_v16 = vsel %vm544_vm15, inf, %v520_v62 }
 0xd0b   : > { %v543_v18 = vsel %vm541_vm14, %v542_v15, %v518_v63  ;;  %v546_v19 = vsel %vm369_vm2, %v545_v16, inf }
 0xd0c   : > { %547 = vmin.xlane.f32.xlu1 %v546_v19 }
 0xd99   : > { %v548_v20 = vpop.xlane.xlu1 %547 }
 0xd9a   : > { %vm549_vm0 = vcmp.eq.f32.partialorder %v545_v16, %v548_v20 }
 0xd9b   : > { %v550_v21 = vsel %vm549_vm0, %v890_v17, 16 }
 0xd9c   : > { %v551_v22 = vsel %vm369_vm2, %v550_v21, 2147483647  ;;  %vm569_vm2 = vcmask 64512  }
 0xd9d   : > { %v553_v23 = vshra.s32 %v551_v22, 16  ;;  %v552_v25 = vand.u32 65535, %v551_v22 }
 0xd9f   : > { %v555_v24 = vcvt.s32.f32 %v553_v23  ;;  %v554_v27 = vcvt.s32.f32 %v552_v25 }
 0xda1   : > { %556 = vmin.xlane.f32.xlu0 %v555_v24 }
 0xe2e   : > { %v557_v26 = vpop.xlane.xlu0 %556 }
 0xe2f   : > { %vm558_vm1 = vcmp.eq.f32.partialorder %v555_v24, %v557_v26  ;;  %v563_v29 = vcvt.f32.s32 %v557_v26 }
 0xe30   : > { %v559_v28 = vsel %vm558_vm1, %v554_v27, inf }
 0xe31   : > { %560 = vmin.xlane.f32.xlu1 %v559_v28  ;;  %v564_v31 = vshll.u32 %v563_v29, 16 }
 0xebe   : > { %v561_v30 = vpop.xlane.xlu1 %560 }
 0xebf   : > { %v562_v32 = vcvt.f32.s32 %v561_v30 }
 0xec1   : > { %v565_v33 = vadd.s32 %v564_v31, %v562_v32 }
 0xec3   : > { %v567_v34 = vadd.s32 %v565_v33, %v899_v44 }
 0xec5   : > { %v568_v35 = vsel %vm566_vm3, %v567_v34, %v543_v18 }
 0xec6   : > { %570 = vst.msk [vmem:[%s293_s22] sm:$0xff] %vm569_vm2, %v568_v35 }
 0xec7 PF: > { %s14_s19 = sadd.s32 1, %s807_s19   ;;  %s966_s15 = smov %s799_s17 }
 0xec8   : > { %p11_p7 = scmp.ge.s32.totalorder %s14_s19, 10   ;;  %s967_s16 = smov %s803_s18 }
 0xec9   : > { %s968_s17 = smov %s971_s20  ;;  %s969_s18 = smov %s975_s21 }
 0xeca   :  { %13 = sbr.rel (!%p11_p7) target bundleno = 3 (0x3), region = 75 }

// kernel: dyedcnn_forward.6
= control target key start
LH: loop header
LB: loop body
LE: loop exit
PB: predicated region body
PF: predicated region fallthrough
CT: control target
= control target key end

     0   :  { %s2974_s25 = smov 0   ;;  %s3608_s0 = inlined_call_operand.vmem [shape: bf16[64,8], index: 0, kind: input, shape index: {}]   ;;  %s3609_s1 = inlined_call_operand.vmem [shape: bf16[64,8,8], index: 1, kind: input, shape index: {}]   ;;  %s3610_s2 = inlined_call_operand.vmem [shape: bf16[8,64], index: 2, kind: input, shape index: {}]   ;;  %s3611_s3 = inlined_call_operand.vmem [shape: bf16[8,64], index: 3, kind: input, shape index: {}]   ;;  %s3612_s4 = inlined_call_operand.vmem [shape: f32[1,64], index: 4, kind: input, shape index: {}]   ;;  %s3613_s5 = inlined_call_operand.vmem [shape: f32[1,64], index: 5, kind: input, shape index: {}]   ;;  %s3614_s6 = inlined_call_operand.vmem [shape: f32[1,64], index: 6, kind: input, shape index: {}]   ;;  %s3615_s7 = inlined_call_operand.vmem [shape: bf16[64,64], index: 7, kind: input, shape index: {}]   ;;  %s3616_s8 = inlined_call_operand.vmem [shape: f32[1,64], index: 8, kind: input, shape index: {}]   ;;  %s3617_s9 = inlined_call_operand.vmem [shape: f32[1,64], index: 9, kind: input, shape index: {}]   ;;  %s3618_s10 = inlined_call_operand.vmem [shape: f32[1,64], index: 10, kind: input, shape index: {}]   ;;  %s3619_s11 = inlined_call_operand.vmem [shape: bf16[64,64], index: 11, kind: input, shape index: {}]   ;;  %s3620_s12 = inlined_call_operand.vmem [shape: f32[1,64], index: 12, kind: input, shape index: {}]   ;;  %s3621_s13 = inlined_call_operand.vmem [shape: bf16[64,64], index: 13, kind: output, shape index: {}]  }
   0x1 LB: > { %s2515_s26 = sadd.s32 4294967295, %s2901_s25   ;;  %p2519_p0 = scmp.ge.s32.totalorder %s2901_s25, 1  ;;  %s2901_s25 = sphi %s2974_s25, %s23_s25  }
   0x2   : > { %p399_p1 = scmp.lt.s32.totalorder %s2901_s25, 3 }
   0x4   : > { %p400_p2 = pnand %p2519_p0, %p399_p1 }
   0x5   : > { %v471_v0 = vld [vmem:[%s3610_s2] sm:$0xf] (!%p400_p2)  ;;  %vm496_vm0 = vcmask (!%p400_p2), 1043456   ;;  %s2520_s14 = sshll.u32 (!%p400_p2), %s2515_s26, 2  ;;  %s2522_s15 = sshll.u32 (!%p400_p2), %s2515_s26, 5  ;;  %vm489_vm1 = vcmask (!%p400_p2), 64512   ;;  %v882_v31 = vlaneseq (!%p400_p2) }
   0x6   : > { %403 = sbr.rel (%p400_p2) target bundleno = 813 (0x32d), region = 72  ;;  %v581_v1 = vld [vmem:[%s3611_s3] sm:$0xf] (!%p400_p2)  ;;  %2857 = vmatprep.subr.msk.bf16.mxu0 (!%p400_p2), %vm496_vm0, %v471_v0  ;;  %v498_v2 = vsel (!%p400_p2), %vm496_vm0, %v471_v0, 0  ;;  %p449_p3 = scmp.lt.s32.totalorder (!%p400_p2), %s2520_s14, 7  ;;  %v2888_v23 = vld [vmem:[%s3615_s7 + $0x8] sm:$0xff] (!%p400_p2)  }
   0x7   : > { %2859 = vmatprep.subr.msk.bf16.mxu1 (!%p400_p2), %vm496_vm0, %v581_v1  ;;  %v711_v3 = vsel (!%p400_p2), %vm496_vm0, %v581_v1, 0  ;;  %2736 = vmatpush3.bf16.msra.mxu0 (!%p400_p2), %v498_v2  ;;  %p455_p4 = scmp.lt.s32.totalorder (!%p400_p2), %s2522_s15, 63  ;;  %v2887_v4 = vld [vmem:[%s3615_s7] sm:$0xff] (!%p400_p2)   ;;  %v2889_v24 = vld [vmem:[%s3615_s7 + $0x10] sm:$0xff] (!%p400_p2)   ;;  %v2890_v25 = vld [vmem:[%s3615_s7 + $0x18] sm:$0xff] (!%p400_p2)   ;;  %v883_v33 = vshrl.u32 (!%p400_p2), %v882_v31, 7 }
   0x8   : > { %2856 = vmatpush3.bf16.msra.mxu1 (!%p400_p2), %v711_v3  ;;  %2858 = vmatprep.subr.msk.bf16.mxu0 (!%p400_p2), %vm496_vm0, %v581_v1  ;;  %v2891_v26 = vld [vmem:[%s3619_s11] sm:$0xff] (!%p400_p2)   ;;  %v2892_v27 = vld [vmem:[%s3619_s11 + $0x8] sm:$0xff] (!%p400_p2)   ;;  %v2893_v28 = vld [vmem:[%s3619_s11 + $0x10] sm:$0xff] (!%p400_p2)   ;;  %v2903_v29 = vmov (!%p400_p2), 1966171168   ;;  %vm1431_vm2 = vcmask (!%p400_p2), 523264  }
   0x9   : > { %2815 = vmatprep.subr.bf16.mxu1 (!%p400_p2), %v2891_v26  ;;  %v880_v30 = vunpack.c.l.s4 (!%p400_p2), %v2903_v29  ;;  %v2526_v34 = vld [vmem:[%s3612_s4] ss:$0 sm:$0xff] (!%p400_p2)  ;;  %v3065_v50 = vsub.s32 (!%p400_p2), 0, %v883_v33  ;;  %vm2399_vm3 = vcmask (!%p400_p2), 1041409   ;;  %vm2401_vm4 = vcmask (!%p400_p2), 1042434  }
   0xa   : > { %vm2403_vm5 = vcmask (!%p400_p2), 1043459   ;;  %vm2405_vm6 = vcmask (!%p400_p2), 1044484   ;;  %vm2407_vm7 = vcmask (!%p400_p2), 1045509   ;;  %vm2409_vm8 = vcmask (!%p400_p2), 1046534  }
   0xb   : > { %v881_v32 = vunpack.c.0.s8 (!%p400_p2), %v880_v30  ;;  %v3122_v30 = vld [vmem:[%s3614_s6] ss:$0 sm:$0xff] (!%p400_p2)  ;;  %vm2411_vm9 = vcmask (!%p400_p2), 1047559   ;;  %vm2442_vm10 = vcmask (!%p400_p2), 519168  }
   0xd   : > { %s3623_s14 = smov (!%p449_p3, %s2520_s14), 7  ;;  %s3625_s15 = smov (!%p455_p4, %s2522_s15), 63  ;;  %v3059_v35 = vsub.s32 %v881_v32, %v883_v33 }
   0xe   : > { %s2521_s16 = sshll.u32 %s3623_s14, 2  ;;  %s2523_s22 = sshll.u32 %s3625_s15, 2 }
   0xf   : > { %s452_s19 = scalar_lea.vmem %s3608_s0, %s2521_s16  ;;  %s3002_s26 = scalar_lea.vmem %s3609_s1, %s2523_s22 }
  0x10   : > { %v2869_v5 = vld [vmem:[%s452_s19] sm:$0xff]   ;;  %v2871_v6 = vld [vmem:[%s452_s19 + $0x8] sm:$0xff]   ;;  %v2870_v7 = vld [vmem:[%s3002_s26 + $0x30] sm:$0xff]   ;;  %s3533_s29 = scalar_lea.vmem %s3621_s13, %s2521_s16 }
  0x11   : > { %2737 = vmatprep.mubr.msk.bf16.mxu0 %vm489_vm1, %v2869_v5  ;;  %v2872_v8 = vld [vmem:[%s3002_s26 + $0x38] sm:$0xff]   ;;  %2755 = vmatprep.mubr.msk.bf16.mxu1 %vm489_vm1, %v2870_v7  ;;  %v2873_v9 = vld [vmem:[%s3002_s26] sm:$0xff]   ;;  %v2875_v11 = vld [vmem:[%s3002_s26 + $0x8] sm:$0xff]  }
  0x12   : > { %2738 = vmatmul.mubr.msk.bf16.vlgmr.msra.gmra.mrb[0].mxu0 %vm489_vm1, %v2871_v6  ;;  %2756 = vmatmul.mubr.msk.bf16.vlgmr.msra.gmra.mrb[0].mxu1 %vm489_vm1, %v2872_v8  ;;  %v2874_v10 = vld [vmem:[%s3002_s26 + $0x40] sm:$0xff]   ;;  %v2877_v12 = vld [vmem:[%s3002_s26 + $0x10] sm:$0xff]   ;;  %v2876_v13 = vld [vmem:[%s3002_s26 + $0x48] sm:$0xff]  }
  0x13   : > { %2742 = vmatpush3.bf16.msra.mxu0 %v711_v3  ;;  %2743 = vmatprep.mubr.msk.bf16.mxu0 %vm489_vm1, %v2873_v9  ;;  %v2878_v14 = vld [vmem:[%s3002_s26 + $0x50] sm:$0xff]   ;;  %v2879_v15 = vld [vmem:[%s3002_s26 + $0x18] sm:$0xff]   ;;  %v2881_v17 = vld [vmem:[%s3002_s26 + $0x20] sm:$0xff]  }
  0x14   : > { %2775 = vmatprep.subr.bf16.mxu0 %v2887_v4  ;;  %2759 = vmatprep.mubr.msk.bf16.mxu1 %vm489_vm1, %v2874_v10  ;;  %v2880_v16 = vld [vmem:[%s3002_s26 + $0x58] sm:$0xff]   ;;  %v2882_v18 = vld [vmem:[%s3002_s26 + $0x60] sm:$0xff]   ;;  %v2883_v19 = vld [vmem:[%s3002_s26 + $0x28] sm:$0xff]  }
  0x15   : > { %v2884_v20 = vld [vmem:[%s3002_s26 + $0x68] sm:$0xff]   ;;  %v2885_v21 = vld [vmem:[%s3002_s26 + $0x70] sm:$0xff]   ;;  %v2886_v22 = vld [vmem:[%s3002_s26 + $0x78] sm:$0xff]   ;;  %2816 = vmatpush3.bf16.msra.mxu1 %v2891_v26 }
  0x16   : > { %2817 = vmatprep.subr.bf16.mxu1 %v2892_v27 }
  0x19   : > { %2818 = vmatpush3.bf16.msra.mxu1 %v2892_v27 }
  0x1a   : > { %2744 = vmatmul.mubr.msk.bf16.vlgmr.msra.gmra.mrb[4].mxu0 %vm489_vm1, %v2875_v11  ;;  %2760 = vmatmul.mubr.msk.bf16.gmra.mrb[4].mxu1 %vm489_vm1, %v2876_v13 }
  0x1b   : > { %2747 = vmatprep.mubr.msk.bf16.mxu0 %vm489_vm1, %v2877_v12  ;;  %2776 = vmatpush3.bf16.msra.mxu0 %v2887_v4 }
  0x1c   : > { %2763 = vmatprep.mubr.msk.bf16.mxu1 %vm489_vm1, %v2878_v14  ;;  %2777 = vmatprep.subr.bf16.mxu0 %v2888_v23 }
  0x1d   : > { %2819 = vmatprep.subr.bf16.mxu1 %v2893_v28 }
  0x1e   : > { %2820 = vmatpush3.bf16.msra.mxu1 %v2893_v28 }
  0x1f   : > { %2778 = vmatpush3.bf16.msra.mxu0 %v2888_v23 }
  0x20   : > { %2779 = vmatprep.subr.bf16.mxu0 %v2889_v24 }
  0x22   : > { %2748 = vmatmul.mubr.msk.bf16.gmra.mrb[8].mxu0 %vm489_vm1, %v2879_v15  ;;  %2764 = vmatmul.mubr.msk.bf16.gmra.mrb[8].mxu1 %vm489_vm1, %v2880_v16 }
  0x23   : > { %2751 = vmatprep.mubr.msk.bf16.mxu0 %vm489_vm1, %v2881_v17  ;;  %2767 = vmatprep.mubr.msk.bf16.mxu1 %vm489_vm1, %v2882_v18 }
  0x24   : > { %2780 = vmatpush3.bf16.msra.mxu0 %v2889_v24 }
  0x25   : > { %2781 = vmatprep.subr.bf16.mxu0 %v2890_v25 }
  0x28   : > { %2782 = vmatpush3.bf16.msra.mxu0 %v2890_v25 }
  0x2a   : > { %2752 = vmatmul.mubr.msk.bf16.gmra.mrb[12].mxu0 %vm489_vm1, %v2883_v19  ;;  %2768 = vmatmul.mubr.msk.bf16.gmra.mrb[12].mxu1 %vm489_vm1, %v2884_v20  ;;  %v3112_v19 = vld [vmem:[%s3613_s5] ss:$0 sm:$0xff] }
  0x2b   : > { %2771 = vmatprep.mubr.msk.bf16.mxu1 %vm489_vm1, %v2885_v21 }
  0x32   : > { %2772 = vmatmul.mubr.msk.bf16.gmra.mrb[16].mxu1 %vm489_vm1, %v2886_v22 }
  0xe5   : > { %v2739_v36 = vpop.f32.mrb[0].mxu0  ;;  %v3061_v41 = vpop.f32.mrb[0].mxu1 }
  0xe6   : > { %v543_v37 = vadd.f32 %v2739_v36, %v2526_v34  ;;  %v534_v38 = vpop.f32.mrb[1].mxu0  ;;  %v795_v46 = vpop.f32.mrb[1].mxu1 }
  0xe7   : > { %v535_v39 = vadd.f32 %v2526_v34, %v534_v38  ;;  %v2740_v40 = vpop.f32.mrb[2].mxu0  ;;  %v3067_v51 = vpop.f32.mrb[2].mxu1 }
  0xe8   : > { %v976_v42 = vcombine.high %v543_v37, %v543_v37  ;;  %v983_v43 = vrot.slane %v543_v37, %v3059_v35  ;;  %v546_v44 = vadd.f32 %v2740_v40, %v2526_v34  ;;  %v537_v45 = vpop.f32.mrb[3].mxu0  ;;  %v798_v56 = vpop.f32.mrb[3].mxu1 }
  0xe9   : > { %v878_v47 = vcombine.high %v535_v39, %v535_v39  ;;  %v885_v48 = vrot.slane %v535_v39, %v3059_v35  ;;  %v538_v49 = vadd.f32 %v2526_v34, %v537_v45 }
  0xea   : > { %v3070_v52 = vrot.slane %v976_v42, %v3059_v35  ;;  %v991_v53 = vcombine.high %v983_v43, %v983_v43  ;;  %v999_v54 = vrot.slane %v983_v43, %v3059_v35  ;;  %v1025_v55 = vcombine.high %v546_v44, %v546_v44 }
  0xeb   : > { %v3074_v57 = vrot.slane %v878_v47, %v3059_v35  ;;  %v893_v58 = vcombine.high %v885_v48, %v885_v48  ;;  %v901_v59 = vrot.slane %v885_v48, %v3059_v35  ;;  %v3078_v60 = vrot.slane %v546_v44, %v3059_v35 }
  0xec   : > { %v992_v61 = vcombine.high %v3070_v52, %v3070_v52  ;;  %v3083_v62 = vrot.slane %v1025_v55, %v3059_v35  ;;  %v927_v63 = vcombine.high %v538_v49, %v538_v49  ;;  %v3086_v0 = vrot.slane %v538_v49, %v3059_v35 }
  0xed   : > { %v894_v1 = vcombine.high %v3074_v57, %v3074_v57  ;;  %v1040_v2 = vcombine.high %v3078_v60, %v3078_v60  ;;  %v3094_v3 = vrot.slane %v3078_v60, %v3059_v35  ;;  %v2745_v4 = vpop.f32.mrb[4].mxu0  ;;  %v923_v5 = vcombine.high %v901_v59, %v901_v59  ;;  %v2761_v12 = vpop.f32.mrb[4].mxu1 }
  0xee   : > { %v1041_v6 = vcombine.high %v3083_v62, %v3083_v62  ;;  %v941_v7 = vrot.slane %v927_v63, %v3059_v35  ;;  %v942_v8 = vcombine.high %v3086_v0, %v3086_v0  ;;  %v3103_v9 = vrot.slane %v3086_v0, %v3059_v35  ;;  %v747_v10 = vpop.f32.mrb[5].mxu0  ;;  %v811_v20 = vpop.f32.mrb[5].mxu1 }
  0xef   : > { %v1085_v11 = vrot.slane %v923_v5, %v3065_v50  ;;  %v1021_v13 = vcombine.high %v999_v54, %v999_v54  ;;  %v1077_v14 = vrot.slane %v901_v59, %v3065_v50  ;;  %v1141_v15 = vrot.slane %v999_v54, %v3065_v50  ;;  %v2746_v16 = vpop.f32.mrb[6].mxu0  ;;  %v2762_v28 = vpop.f32.mrb[6].mxu1 }
  0xf0   : > { %v943_v17 = vcombine.high %v941_v7, %v941_v7  ;;  %v957_v18 = vrot.slane %v941_v7, %v3059_v35  ;;  %v915_v21 = vrot.slane %v893_v58, %v3059_v35  ;;  %v3116_v22 = vrot.slane %v991_v53, %v3059_v35  ;;  %v750_v23 = vpop.f32.mrb[7].mxu0  ;;  %v814_v34 = vpop.f32.mrb[7].mxu1 }
  0xf1   : > { %v1236_v24 = vadd.f32 %v2745_v4, %v1085_v11  ;;  %v1149_v25 = vrot.slane %v1021_v13, %v3065_v50  ;;  %v1234_v26 = vadd.f32 %v1077_v14, %v747_v10  ;;  %v1250_v27 = vadd.f32 %v1141_v15, %v811_v20 }
  0xf2   : > { %v973_v29 = vcombine.high %v957_v18, %v957_v18  ;;  %v1125_v31 = vrot.slane %v957_v18, %v3065_v50  ;;  %v971_v32 = vrot.slane %v943_v17, %v3059_v35  ;;  %v925_v33 = vcombine.high %v915_v21, %v915_v21 }
  0xf3   : > { %v1275_v36 = vmul.f32 %v3112_v19, %v1236_v24  ;;  %v1252_v37 = vadd.f32 %v2761_v12, %v1149_v25  ;;  %v1273_v38 = vmul.f32 %v3112_v19, %v1234_v26  ;;  %v1289_v39 = vmul.f32 %v3112_v19, %v1250_v27 }
  0xf4   : > { %v1133_v40 = vrot.slane %v973_v29, %v3065_v50  ;;  %v1246_v42 = vadd.f32 %v1125_v31, %v795_v46  ;;  %v975_v43 = vcombine.high %v971_v32, %v971_v32  ;;  %v1129_v44 = vrot.slane %v971_v32, %v3065_v50 }
  0xf5   : > { %v3132_v45 = vadd.f32 %v3122_v30, %v1275_v36  ;;  %v1291_v47 = vmul.f32 %v3112_v19, %v1252_v37  ;;  %v3136_v48 = vadd.f32 %v3122_v30, %v1273_v38  ;;  %v3139_v49 = vadd.f32 %v3122_v30, %v1289_v39  ;;  %v3141_v53 = vpop.f32.mrb[8].mxu0  ;;  %v3152_v10 = vpop.f32.mrb[8].mxu1 }
  0xf6   : > { %v1248_v54 = vadd.f32 %v3061_v41, %v1133_v40  ;;  %v1285_v46 = vmul.f32 %v3112_v19, %v1246_v42  ;;  %v1137_v55 = vrot.slane %v975_v43, %v3065_v50  ;;  %v1247_v58 = vadd.f32 %v1129_v44, %v798_v56  ;;  %v763_v59 = vpop.f32.mrb[9].mxu0  ;;  %v827_v14 = vpop.f32.mrb[9].mxu1 }
  0xf7   : > { %v1346_v63 = vmax.f32 %v3132_v45, 0.0  ;;  %v3148_v4 = vadd.f32 %v3122_v30, %v1291_v47  ;;  %v1344_v5 = vmax.f32 %v3136_v48, 0.0  ;;  %v1360_v7 = vmax.f32 %v3139_v49, 0.0  ;;  %v3154_v11 = vpop.f32.mrb[10].mxu0  ;;  %v3167_v25 = vpop.f32.mrb[10].mxu1 }
  0xf8   : > { %v1287_v41 = vmul.f32 %v3112_v19, %v1248_v54  ;;  %v1324_v12 = vadd.f32 %v3122_v30, %v1285_v46  ;;  %v1249_v56 = vadd.f32 %v3067_v51, %v1137_v55  ;;  %v1286_v13 = vmul.f32 %v3112_v19, %v1247_v58  ;;  %v3160_v15 = vpop.f32.mrb[11].mxu0  ;;  %v3172_v31 = vpop.f32.mrb[11].mxu1 }
  0xf9   : > { %v1362_v17 = vmax.f32 %v3148_v4, 0.0  ;;  %v1089_v18 = vrot.slane %v925_v33, %v3065_v50  ;;  %v1023_v20 = vcombine.high %v3116_v22, %v3116_v22  ;;  %v1081_v24 = vrot.slane %v915_v21, %v3065_v50 }
  0xfa   : > { %v1326_v26 = vadd.f32 %v3122_v30, %v1287_v41  ;;  %v1356_v27 = vmax.f32 %v1324_v12, 0.0  ;;  %v1288_v51 = vmul.f32 %v3112_v19, %v1249_v56  ;;  %v1325_v29 = vadd.f32 %v3122_v30, %v1286_v13 }
  0xfb   : > { %v1237_v32 = vadd.f32 %v2746_v16, %v1089_v18  ;;  %v1153_v33 = vrot.slane %v1023_v20, %v3065_v50  ;;  %v1235_v36 = vadd.f32 %v1081_v24, %v750_v23  ;;  %v1145_v37 = vrot.slane %v3116_v22, %v3065_v50 }
  0xfc   : > { %v1358_v21 = vmax.f32 %v1326_v26, 0.0  ;;  %v1327_v38 = vadd.f32 %v3122_v30, %v1288_v51  ;;  %v1357_v39 = vmax.f32 %v1325_v29, 0.0  ;;  %v908_v40 = vrot.slane %v3074_v57, %v3059_v35 }
  0xfd   : > { %v1276_v42 = vmul.f32 %v3112_v19, %v1237_v32  ;;  %v1253_v43 = vadd.f32 %v2762_v28, %v1153_v33  ;;  %v1274_v44 = vmul.f32 %v3112_v19, %v1235_v36  ;;  %v1251_v47 = vadd.f32 %v1145_v37, %v814_v34  ;;  %v3182_v16 = vpop.f32.mrb[12].mxu0  ;;  %v3194_v34 = vpop.f32.mrb[12].mxu1 }
  0xfe   : > { %v1359_v54 = vmax.f32 %v1327_v38, 0.0  ;;  %v3184_v23 = vpack.c.bf16 %v1357_v39, %v1356_v27  ;;  %v924_v46 = vcombine.high %v908_v40, %v908_v40  ;;  %v1006_v22 = vrot.slane %v3070_v52, %v3059_v35  ;;  %v3188_v55 = vpop.f32.mrb[13].mxu0  ;;  %v3202_v24 = vpop.f32.mrb[13].mxu1 }
  0xff   : > { %v1315_v58 = vadd.f32 %v3122_v30, %v1276_v42  ;;  %v1292_v4 = vmul.f32 %v3112_v19, %v1253_v43  ;;  %v1313_v28 = vadd.f32 %v3122_v30, %v1274_v44  ;;  %v1290_v41 = vmul.f32 %v3112_v19, %v1251_v47  ;;  %v3196_v12 = vpop.f32.mrb[14].mxu0  ;;  %v3208_v33 = vpop.f32.mrb[14].mxu1 }
 0x100   : > { %v3198_v56 = vpack.c.bf16 %v1359_v54, %v1358_v21  ;;  %v1101_v13 = vrot.slane %v924_v46, %v3065_v50  ;;  %v1022_v18 = vcombine.high %v1006_v22, %v1006_v22  ;;  %v1093_v20 = vrot.slane %v908_v40, %v3065_v50  ;;  %v3204_v26 = vpop.f32.mrb[15].mxu0  ;;  %v3213_v39 = vpop.f32.mrb[15].mxu1 }
 0x101   : > { %v1347_v27 = vmax.f32 %v1315_v58, 0.0  ;;  %v1331_v51 = vadd.f32 %v3122_v30, %v1292_v4  ;;  %v1345_v29 = vmax.f32 %v1313_v28, 0.0  ;;  %v1329_v32 = vadd.f32 %v3122_v30, %v1290_v41 }
 0x102   : > { %v1240_v36 = vadd.f32 %v3141_v53, %v1101_v13  ;;  %v1165_v37 = vrot.slane %v1022_v18, %v3065_v50  ;;  %v1238_v21 = vadd.f32 %v1093_v20, %v763_v59  ;;  %v1157_v38 = vrot.slane %v1006_v22, %v3065_v50 }
 0x103   : > { %v1377_v40 = vpack.c.bf16 %v1347_v27, %v1346_v63  ;;  %v1363_v42 = vmax.f32 %v1331_v51, 0.0  ;;  %v1376_v43 = vpack.c.bf16 %v1345_v29, %v1344_v5  ;;  %v1361_v44 = vmax.f32 %v1329_v32, 0.0 }
 0x104   : > { %v1279_v47 = vmul.f32 %v3112_v19, %v1240_v36  ;;  %v1256_v54 = vadd.f32 %v3152_v10, %v1165_v37  ;;  %v1277_v53 = vmul.f32 %v3112_v19, %v1238_v21  ;;  %v1254_v46 = vadd.f32 %v1157_v38, %v827_v14 }
 0x105   : > { %v3222_v59 = vpack.c.bf16 %v1363_v42, %v1362_v17  ;;  %v3226_v22 = vpack.c.bf16 %v1361_v44, %v1360_v7  ;;  %v922_v45 = vrot.slane %v894_v1, %v3059_v35  ;;  %v1020_v48 = vrot.slane %v992_v61, %v3059_v35  ;;  %2783 = vmatprep.mubr.msk.bf16.mxu0 %vm1431_vm2, %v1376_v43  ;;  %v3244_v52 = vpop.f32.mrb[16].mxu1 }
 0x106   : > { %v1318_v63 = vadd.f32 %v3122_v30, %v1279_v47  ;;  %v1295_v5 = vmul.f32 %v3112_v19, %v1256_v54  ;;  %v1316_v49 = vadd.f32 %v3122_v30, %v1277_v53  ;;  %v1293_v7 = vmul.f32 %v3112_v19, %v1254_v46  ;;  %2784 = vmatmul.mubr.msk.bf16.vlgmr.msra.gmra.mrb[16].mxu0 %vm1431_vm2, %v1377_v40  ;;  %v3248_v28 = vpop.f32.mrb[17].mxu1 }
 0x107   : > { %v926_v10 = vcombine.high %v922_v45, %v922_v45  ;;  %v1024_v57 = vcombine.high %v1020_v48, %v1020_v48  ;;  %v1097_v1 = vrot.slane %v922_v45, %v3065_v50  ;;  %v1161_v14 = vrot.slane %v1020_v48, %v3065_v50  ;;  %v3254_v27 = vpop.f32.mrb[18].mxu1 }
 0x108   : > { %v1350_v61 = vmax.f32 %v1318_v63, 0.0  ;;  %v1334_v17 = vadd.f32 %v3122_v30, %v1295_v5  ;;  %v1348_v58 = vmax.f32 %v1316_v49, 0.0  ;;  %v1332_v4 = vadd.f32 %v3122_v30, %v1293_v7  ;;  %v3260_v37 = vpop.f32.mrb[19].mxu1 }
 0x109   : > { %v1105_v41 = vrot.slane %v926_v10, %v3065_v50  ;;  %v1169_v13 = vrot.slane %v1024_v57, %v3065_v50  ;;  %v1239_v18 = vadd.f32 %v1097_v1, %v3160_v15  ;;  %v1255_v20 = vadd.f32 %v1161_v14, %v3172_v31 }
 0x10a   : > { %v1366_v51 = vmax.f32 %v1334_v17, 0.0  ;;  %v1364_v29 = vmax.f32 %v1332_v4, 0.0  ;;  %v972_v32 = vcombine.high %v3103_v9, %v3103_v9  ;;  %v1070_v36 = vcombine.high %v3094_v3, %v3094_v3 }
 0x10b   : > { %v1241_v21 = vadd.f32 %v3154_v11, %v1105_v41  ;;  %v1257_v38 = vadd.f32 %v3167_v25, %v1169_v13  ;;  %v1278_v15 = vmul.f32 %v3112_v19, %v1239_v18  ;;  %v1294_v31 = vmul.f32 %v3112_v19, %v1255_v20 }
 0x10c   : > { %v1117_v40 = vrot.slane %v972_v32, %v3065_v50  ;;  %v1181_v42 = vrot.slane %v1070_v36, %v3065_v50  ;;  %v1109_v43 = vrot.slane %v3103_v9, %v3065_v50  ;;  %v1173_v44 = vrot.slane %v3094_v3, %v3065_v50 }
 0x10d   : > { %v1280_v47 = vmul.f32 %v3112_v19, %v1241_v21  ;;  %v1296_v11 = vmul.f32 %v3112_v19, %v1257_v38  ;;  %v1317_v25 = vadd.f32 %v3122_v30, %v1278_v15  ;;  %v1333_v54 = vadd.f32 %v3122_v30, %v1294_v31 }
 0x10e   : > { %v1244_v53 = vadd.f32 %v3182_v16, %v1117_v40  ;;  %v1260_v46 = vadd.f32 %v3194_v34, %v1181_v42  ;;  %v1242_v45 = vadd.f32 %v1109_v43, %v3188_v55  ;;  %v1258_v48 = vadd.f32 %v1173_v44, %v3202_v24 }
 0x10f   : > { %v1319_v9 = vadd.f32 %v3122_v30, %v1280_v47  ;;  %v1335_v3 = vadd.f32 %v3122_v30, %v1296_v11  ;;  %v1349_v63 = vmax.f32 %v1317_v25, 0.0  ;;  %v1365_v5 = vmax.f32 %v1333_v54, 0.0 }
 0x110   : > { %v1283_v49 = vmul.f32 %v3112_v19, %v1244_v53  ;;  %v1299_v7 = vmul.f32 %v3112_v19, %v1260_v46  ;;  %v1281_v10 = vmul.f32 %v3112_v19, %v1242_v45  ;;  %v1297_v16 = vmul.f32 %v3112_v19, %v1258_v48 }
 0x111   : > { %v1351_v57 = vmax.f32 %v1319_v9, 0.0  ;;  %v1367_v34 = vmax.f32 %v1335_v3, 0.0  ;;  %v1378_v1 = vpack.c.bf16 %v1349_v63, %v1348_v58  ;;  %v3286_v55 = vpack.c.bf16 %v1365_v5, %v1364_v29 }
 0x112   : > { %v1322_v24 = vadd.f32 %v3122_v30, %v1283_v49  ;;  %v1338_v14 = vadd.f32 %v3122_v30, %v1299_v7  ;;  %v1320_v17 = vadd.f32 %v3122_v30, %v1281_v10  ;;  %v1336_v4 = vadd.f32 %v3122_v30, %v1297_v16 }
 0x113   : > { %v1379_v41 = vpack.c.bf16 %v1351_v57, %v1350_v61  ;;  %v3292_v13 = vpack.c.bf16 %v1367_v34, %v1366_v51  ;;  %v964_v18 = vrot.slane %v942_v8, %v3059_v35  ;;  %v1062_v58 = vrot.slane %v1040_v2, %v3059_v35  ;;  %2787 = vmatprep.mubr.msk.bf16.mxu0 %vm1431_vm2, %v1378_v1 }
 0x114   : > { %v1354_v20 = vmax.f32 %v1322_v24, 0.0  ;;  %v1370_v29 = vmax.f32 %v1338_v14, 0.0  ;;  %v1352_v21 = vmax.f32 %v1320_v17, 0.0  ;;  %v1368_v0 = vmax.f32 %v1336_v4, 0.0 }
 0x115   : > { %v974_v32 = vcombine.high %v964_v18, %v964_v18  ;;  %v1072_v36 = vcombine.high %v1062_v58, %v1062_v58  ;;  %v1113_v61 = vrot.slane %v964_v18, %v3065_v50  ;;  %v1177_v51 = vrot.slane %v1062_v58, %v3065_v50  ;;  %2788 = vmatmul.mubr.msk.bf16.gmra.mrb[20].mxu0 %vm1431_vm2, %v1379_v41 }
 0x116   : > { %v1055_v8 = vrot.slane %v3083_v62, %v3059_v35  ;;  %v1069_v60 = vrot.slane %v1041_v6, %v3059_v35 }
 0x117   : > { %v1121_v2 = vrot.slane %v974_v32, %v3065_v50  ;;  %v1185_v38 = vrot.slane %v1072_v36, %v3065_v50  ;;  %v1243_v15 = vadd.f32 %v1113_v61, %v3204_v26  ;;  %v1259_v31 = vadd.f32 %v1177_v51, %v3213_v39 }
 0x118   : > { %v1071_v40 = vcombine.high %v1055_v8, %v1055_v8  ;;  %v1189_v42 = vrot.slane %v1055_v8, %v3065_v50  ;;  %v1073_v43 = vcombine.high %v1069_v60, %v1069_v60  ;;  %v1193_v44 = vrot.slane %v1069_v60, %v3065_v50 }
 0x119   : > { %v1245_v47 = vadd.f32 %v3196_v12, %v1121_v2  ;;  %v1261_v11 = vadd.f32 %v3208_v33, %v1185_v38  ;;  %v1282_v35 = vmul.f32 %v3112_v19, %v1243_v15  ;;  %v1298_v62 = vmul.f32 %v3112_v19, %v1259_v31 }
 0x11a   : > { %v1197_v6 = vrot.slane %v1071_v40, %v3065_v50  ;;  %v1262_v26 = vadd.f32 %v1189_v42, %v3248_v28  ;;  %v1201_v39 = vrot.slane %v1073_v43, %v3065_v50  ;;  %v1263_v25 = vadd.f32 %v1193_v44, %v3260_v37 }
 0x11b   : > { %v1284_v54 = vmul.f32 %v3112_v19, %v1245_v47  ;;  %v1300_v53 = vmul.f32 %v3112_v19, %v1261_v11  ;;  %v1321_v12 = vadd.f32 %v3122_v30, %v1282_v35  ;;  %v1337_v33 = vadd.f32 %v3122_v30, %v1298_v62 }
 0x11c   : > { %v1264_v46 = vadd.f32 %v3244_v52, %v1197_v6  ;;  %v1301_v45 = vmul.f32 %v3112_v19, %v1262_v26  ;;  %v1265_v48 = vadd.f32 %v3254_v27, %v1201_v39  ;;  %v1302_v28 = vmul.f32 %v3112_v19, %v1263_v25 }
 0x11d   : > { %v1323_v50 = vadd.f32 %v3122_v30, %v1284_v54  ;;  %v1339_v37 = vadd.f32 %v3122_v30, %v1300_v53  ;;  %v1353_v9 = vmax.f32 %v1321_v12, 0.0  ;;  %v1369_v3 = vmax.f32 %v1337_v33, 0.0 }
 0x11e   : > { %v1303_v63 = vmul.f32 %v3112_v19, %v1264_v46  ;;  %v1340_v5 = vadd.f32 %v3122_v30, %v1301_v45  ;;  %v1304_v49 = vmul.f32 %v3112_v19, %v1265_v48  ;;  %v1341_v52 = vadd.f32 %v3122_v30, %v1302_v28 }
 0x11f   : > { %v1355_v7 = vmax.f32 %v1323_v50, 0.0  ;;  %v1371_v10 = vmax.f32 %v1339_v37, 0.0  ;;  %v1380_v16 = vpack.c.bf16 %v1353_v9, %v1352_v21  ;;  %v1388_v27 = vpack.c.bf16 %v1369_v3, %v1368_v0 }
 0x120   : > { %v1342_v57 = vadd.f32 %v3122_v30, %v1303_v63  ;;  %v1372_v34 = vmax.f32 %v1340_v5, 0.0  ;;  %v1343_v1 = vadd.f32 %v3122_v30, %v1304_v49  ;;  %v1373_v24 = vmax.f32 %v1341_v52, 0.0  ;;  %v2894_v30 = vld [vmem:[%s3619_s11 + $0x18] sm:$0xff]  }
 0x121   : > { %v1381_v14 = vpack.c.bf16 %v1355_v7, %v1354_v20  ;;  %v1389_v17 = vpack.c.bf16 %v1371_v10, %v1370_v29  ;;  %2791 = vmatprep.mubr.msk.bf16.mxu0 %vm1431_vm2, %v1380_v16  ;;  %2821 = vmatprep.subr.bf16.mxu1 %v2894_v30 }
 0x122   : > { %v1374_v4 = vmax.f32 %v1342_v57, 0.0  ;;  %v1375_v41 = vmax.f32 %v1343_v1, 0.0  ;;  %v1390_v18 = vpack.c.bf16 %v1373_v24, %v1372_v34  ;;  %2822 = vmatpush3.bf16.msra.mxu1 %v2894_v30 }
 0x123   : > { %2792 = vmatmul.mubr.msk.bf16.gmra.mrb[24].mxu0 %vm1431_vm2, %v1381_v14 }
 0x124   : > { %v1391_v19 = vpack.c.bf16 %v1375_v41, %v1374_v4  ;;  %2795 = vmatprep.mubr.msk.bf16.mxu0 %vm1431_vm2, %v3184_v23  ;;  %v3366_v23 = vld [vmem:[%s3616_s8] ss:$0 sm:$0xff] }
 0x12b   : > { %2796 = vmatmul.mubr.msk.bf16.gmra.mrb[28].mxu0 %vm1431_vm2, %v3198_v56 }
 0x12c   : > { %2799 = vmatprep.mubr.msk.bf16.mxu0 %vm1431_vm2, %v3226_v22 }
 0x133   : > { %2800 = vmatmul.mubr.msk.bf16.gmra.mrb[32].mxu0 %vm1431_vm2, %v3222_v59  ;;  %v3371_v59 = vld [vmem:[%s3617_s9] ss:$0 sm:$0xff] }
 0x134   : > { %2803 = vmatprep.mubr.msk.bf16.mxu0 %vm1431_vm2, %v3286_v55 }
 0x13b   : > { %2804 = vmatmul.mubr.msk.bf16.gmra.mrb[36].mxu0 %vm1431_vm2, %v3292_v13  ;;  %v3377_v13 = vld [vmem:[%s3618_s10] ss:$0 sm:$0xff] }
 0x13c   : > { %2807 = vmatprep.mubr.msk.bf16.mxu0 %vm1431_vm2, %v1388_v27 }
 0x143   : > { %2808 = vmatmul.mubr.msk.bf16.gmra.mrb[40].mxu0 %vm1431_vm2, %v1389_v17 }
 0x144   : > { %2811 = vmatprep.mubr.msk.bf16.mxu0 %vm1431_vm2, %v1390_v18 }
 0x14b   : > { %2812 = vmatmul.mubr.msk.bf16.gmra.mrb[44].mxu0 %vm1431_vm2, %v1391_v19 }
 0x1d9   : > { %v2785_v56 = vpop.f32.mrb[16].mxu0 }
 0x1da   : > { %v1523_v22 = vadd.f32 %v2785_v56, %v3366_v23  ;;  %v1514_v55 = vpop.f32.mrb[17].mxu0 }
 0x1db   : > { %v1515_v58 = vadd.f32 %v3366_v23, %v1514_v55  ;;  %v2786_v20 = vpop.f32.mrb[18].mxu0 }
 0x1dc   : > { %v1650_v29 = vmul.f32 %v3371_v59, %v1523_v22  ;;  %v1526_v32 = vadd.f32 %v2786_v20, %v3366_v23  ;;  %v1517_v36 = vpop.f32.mrb[19].mxu0 }
 0x1dd   : > { %v1648_v61 = vmul.f32 %v3371_v59, %v1515_v58  ;;  %v1518_v51 = vadd.f32 %v3366_v23, %v1517_v36 }
 0x1de   : > { %v1689_v21 = vadd.f32 %v3377_v13, %v1650_v29  ;;  %v1651_v0 = vmul.f32 %v3371_v59, %v1526_v32 }
 0x1df   : > { %v1687_v8 = vadd.f32 %v3377_v13, %v1648_v61  ;;  %v1649_v60 = vmul.f32 %v3371_v59, %v1518_v51 }
 0x1e0   : > { %v1690_v2 = vadd.f32 %v3377_v13, %v1651_v0  ;;  %v1721_v15 = vmax.f32 %v1689_v21, 0.0 }
 0x1e1   : > { %v1688_v38 = vadd.f32 %v3377_v13, %v1649_v60  ;;  %v1719_v40 = vmax.f32 %v1687_v8, 0.0 }
 0x1e2   : > { %v1722_v31 = vmax.f32 %v1690_v2, 0.0 }
 0x1e3   : > { %v1720_v42 = vmax.f32 %v1688_v38, 0.0 }
 0x1e4   : > { %v1752_v43 = vpack.c.bf16 %v1722_v31, %v1721_v15 }
 0x1e5   : > { %v1751_v44 = vpack.c.bf16 %v1720_v42, %v1719_v40 }
 0x1e7   : > { %2823 = vmatprep.mubr.msk.bf16.mxu1 %vm1431_vm2, %v1751_v44 }
 0x1e8   : > { %v2789_v47 = vpop.f32.mrb[20].mxu0  ;;  %2824 = vmatmul.mubr.msk.bf16.vlgmr.msra.gmra.mrb[20].mxu1 %vm1431_vm2, %v1752_v43 }
 0x1e9   : > { %v1539_v11 = vadd.f32 %v2789_v47, %v3366_v23  ;;  %v1530_v35 = vpop.f32.mrb[21].mxu0 }
 0x1ea   : > { %v1531_v62 = vadd.f32 %v3366_v23, %v1530_v35  ;;  %v2790_v6 = vpop.f32.mrb[22].mxu0 }
 0x1eb   : > { %v1654_v26 = vmul.f32 %v3371_v59, %v1539_v11  ;;  %v1542_v39 = vadd.f32 %v2790_v6, %v3366_v23  ;;  %v1533_v25 = vpop.f32.mrb[23].mxu0 }
 0x1ec   : > { %v1652_v54 = vmul.f32 %v3371_v59, %v1531_v62  ;;  %v1534_v53 = vadd.f32 %v3366_v23, %v1533_v25 }
 0x1ed   : > { %v1693_v12 = vadd.f32 %v3377_v13, %v1654_v26  ;;  %v1655_v33 = vmul.f32 %v3371_v59, %v1542_v39 }
 0x1ee   : > { %v1691_v46 = vadd.f32 %v3377_v13, %v1652_v54  ;;  %v1653_v45 = vmul.f32 %v3371_v59, %v1534_v53 }
 0x1ef   : > { %v1694_v48 = vadd.f32 %v3377_v13, %v1655_v33  ;;  %v1725_v50 = vmax.f32 %v1693_v12, 0.0 }
 0x1f0   : > { %v1692_v28 = vadd.f32 %v3377_v13, %v1653_v45  ;;  %v1723_v9 = vmax.f32 %v1691_v46, 0.0 }
 0x1f1   : > { %v1726_v37 = vmax.f32 %v1694_v48, 0.0 }
 0x1f2   : > { %v1724_v3 = vmax.f32 %v1692_v28, 0.0 }
 0x1f3   : > { %v1754_v63 = vpack.c.bf16 %v1726_v37, %v1725_v50 }
 0x1f4   : > { %v1753_v5 = vpack.c.bf16 %v1724_v3, %v1723_v9 }
 0x1f6   : > { %v2793_v49 = vpop.f32.mrb[24].mxu0  ;;  %2827 = vmatprep.mubr.msk.bf16.mxu1 %vm1431_vm2, %v1753_v5 }
 0x1f7   : > { %v1555_v52 = vadd.f32 %v2793_v49, %v3366_v23  ;;  %v1546_v7 = vpop.f32.mrb[25].mxu0  ;;  %2828 = vmatmul.mubr.msk.bf16.gmra.mrb[24].mxu1 %vm1431_vm2, %v1754_v63 }
 0x1f8   : > { %v1547_v10 = vadd.f32 %v3366_v23, %v1546_v7  ;;  %v2794_v16 = vpop.f32.mrb[26].mxu0 }
 0x1f9   : > { %v1658_v27 = vmul.f32 %v3371_v59, %v1555_v52  ;;  %v1558_v57 = vadd.f32 %v2794_v16, %v3366_v23  ;;  %v1549_v34 = vpop.f32.mrb[27].mxu0 }
 0x1fa   : > { %v1656_v1 = vmul.f32 %v3371_v59, %v1547_v10  ;;  %v1550_v24 = vadd.f32 %v3366_v23, %v1549_v34 }
 0x1fb   : > { %v1697_v14 = vadd.f32 %v3377_v13, %v1658_v27  ;;  %v1659_v17 = vmul.f32 %v3371_v59, %v1558_v57 }
 0x1fc   : > { %v1695_v4 = vadd.f32 %v3377_v13, %v1656_v1  ;;  %v1657_v41 = vmul.f32 %v3371_v59, %v1550_v24 }
 0x1fd   : > { %v1698_v18 = vadd.f32 %v3377_v13, %v1659_v17  ;;  %v1729_v56 = vmax.f32 %v1697_v14, 0.0 }
 0x1fe   : > { %v1696_v19 = vadd.f32 %v3377_v13, %v1657_v41  ;;  %v2797_v30 = vpop.f32.mrb[28].mxu0  ;;  %v1727_v20 = vmax.f32 %v1695_v4, 0.0 }
 0x1ff   : > { %v1730_v22 = vmax.f32 %v1698_v18, 0.0  ;;  %v1571_v55 = vadd.f32 %v2797_v30, %v3366_v23  ;;  %v1562_v58 = vpop.f32.mrb[29].mxu0 }
 0x200   : > { %v1728_v29 = vmax.f32 %v1696_v19, 0.0  ;;  %v1563_v32 = vadd.f32 %v3366_v23, %v1562_v58  ;;  %v2798_v36 = vpop.f32.mrb[30].mxu0 }
 0x201   : > { %v1756_v61 = vpack.c.bf16 %v1730_v22, %v1729_v56  ;;  %v1662_v51 = vmul.f32 %v3371_v59, %v1571_v55  ;;  %v1574_v21 = vadd.f32 %v2798_v36, %v3366_v23  ;;  %v1565_v0 = vpop.f32.mrb[31].mxu0 }
 0x202   : > { %v1755_v8 = vpack.c.bf16 %v1728_v29, %v1727_v20  ;;  %v1660_v60 = vmul.f32 %v3371_v59, %v1563_v32  ;;  %v1566_v2 = vadd.f32 %v3366_v23, %v1565_v0 }
 0x203   : > { %v1701_v38 = vadd.f32 %v3377_v13, %v1662_v51  ;;  %v1663_v15 = vmul.f32 %v3371_v59, %v1574_v21 }
 0x204   : > { %v1699_v31 = vadd.f32 %v3377_v13, %v1660_v60  ;;  %v1661_v40 = vmul.f32 %v3371_v59, %v1566_v2  ;;  %2831 = vmatprep.mubr.msk.bf16.mxu1 %vm1431_vm2, %v1755_v8 }
 0x205   : > { %v1702_v42 = vadd.f32 %v3377_v13, %v1663_v15  ;;  %2832 = vmatmul.mubr.msk.bf16.gmra.mrb[28].mxu1 %vm1431_vm2, %v1756_v61  ;;  %v1733_v47 = vmax.f32 %v1701_v38, 0.0 }
 0x206   : > { %v1700_v43 = vadd.f32 %v3377_v13, %v1661_v40  ;;  %v2801_v44 = vpop.f32.mrb[32].mxu0  ;;  %v1731_v6 = vmax.f32 %v1699_v31, 0.0 }
 0x207   : > { %v1734_v11 = vmax.f32 %v1702_v42, 0.0  ;;  %v1587_v35 = vadd.f32 %v2801_v44, %v3366_v23  ;;  %v1578_v62 = vpop.f32.mrb[33].mxu0 }
 0x208   : > { %v1732_v26 = vmax.f32 %v1700_v43, 0.0  ;;  %v1579_v39 = vadd.f32 %v3366_v23, %v1578_v62  ;;  %v2802_v25 = vpop.f32.mrb[34].mxu0 }
 0x209   : > { %v1758_v54 = vpack.c.bf16 %v1734_v11, %v1733_v47  ;;  %v1666_v53 = vmul.f32 %v3371_v59, %v1587_v35  ;;  %v1590_v12 = vadd.f32 %v2802_v25, %v3366_v23  ;;  %v1581_v33 = vpop.f32.mrb[35].mxu0 }
 0x20a   : > { %v1757_v46 = vpack.c.bf16 %v1732_v26, %v1731_v6  ;;  %v1664_v45 = vmul.f32 %v3371_v59, %v1579_v39  ;;  %v1582_v48 = vadd.f32 %v3366_v23, %v1581_v33 }
 0x20b   : > { %v1705_v28 = vadd.f32 %v3377_v13, %v1666_v53  ;;  %v1667_v50 = vmul.f32 %v3371_v59, %v1590_v12 }
 0x20c   : > { %v1703_v37 = vadd.f32 %v3377_v13, %v1664_v45  ;;  %v1665_v9 = vmul.f32 %v3371_v59, %v1582_v48  ;;  %2835 = vmatprep.mubr.msk.bf16.mxu1 %vm1431_vm2, %v1757_v46 }
 0x20d   : > { %v1706_v3 = vadd.f32 %v3377_v13, %v1667_v50  ;;  %2836 = vmatmul.mubr.msk.bf16.gmra.mrb[32].mxu1 %vm1431_vm2, %v1758_v54  ;;  %v1737_v49 = vmax.f32 %v1705_v28, 0.0 }
 0x20e   : > { %v1704_v63 = vadd.f32 %v3377_v13, %v1665_v9  ;;  %v2805_v5 = vpop.f32.mrb[36].mxu0  ;;  %v1735_v16 = vmax.f32 %v1703_v37, 0.0 }
 0x20f   : > { %v1738_v52 = vmax.f32 %v1706_v3, 0.0  ;;  %v1603_v7 = vadd.f32 %v2805_v5, %v3366_v23  ;;  %v1594_v10 = vpop.f32.mrb[37].mxu0 }
 0x210   : > { %v1736_v27 = vmax.f32 %v1704_v63, 0.0  ;;  %v1595_v57 = vadd.f32 %v3366_v23, %v1594_v10  ;;  %v2806_v34 = vpop.f32.mrb[38].mxu0 }
 0x211   : > { %v1760_v1 = vpack.c.bf16 %v1738_v52, %v1737_v49  ;;  %v1670_v24 = vmul.f32 %v3371_v59, %v1603_v7  ;;  %v1606_v14 = vadd.f32 %v2806_v34, %v3366_v23  ;;  %v1597_v17 = vpop.f32.mrb[39].mxu0 }
 0x212   : > { %v1759_v4 = vpack.c.bf16 %v1736_v27, %v1735_v16  ;;  %v1668_v41 = vmul.f32 %v3371_v59, %v1595_v57  ;;  %v1598_v18 = vadd.f32 %v3366_v23, %v1597_v17 }
 0x213   : > { %v1709_v19 = vadd.f32 %v3377_v13, %v1670_v24  ;;  %v1671_v30 = vmul.f32 %v3371_v59, %v1606_v14 }
 0x214   : > { %v1707_v56 = vadd.f32 %v3377_v13, %v1668_v41  ;;  %v1669_v22 = vmul.f32 %v3371_v59, %v1598_v18  ;;  %2839 = vmatprep.mubr.msk.bf16.mxu1 %vm1431_vm2, %v1759_v4 }
 0x215   : > { %v1710_v55 = vadd.f32 %v3377_v13, %v1671_v30  ;;  %2840 = vmatmul.mubr.msk.bf16.gmra.mrb[36].mxu1 %vm1431_vm2, %v1760_v1  ;;  %v1741_v29 = vmax.f32 %v1709_v19, 0.0 }
 0x216   : > { %v1708_v58 = vadd.f32 %v3377_v13, %v1669_v22  ;;  %v2809_v20 = vpop.f32.mrb[40].mxu0  ;;  %v1739_v51 = vmax.f32 %v1707_v56, 0.0 }
 0x217   : > { %v1742_v32 = vmax.f32 %v1710_v55, 0.0  ;;  %v1619_v36 = vadd.f32 %v2809_v20, %v3366_v23  ;;  %v1610_v61 = vpop.f32.mrb[41].mxu0 }
 0x218   : > { %v1740_v21 = vmax.f32 %v1708_v58, 0.0  ;;  %v1611_v0 = vadd.f32 %v3366_v23, %v1610_v61  ;;  %v2810_v8 = vpop.f32.mrb[42].mxu0 }
 0x219   : > { %v1762_v60 = vpack.c.bf16 %v1742_v32, %v1741_v29  ;;  %v1674_v2 = vmul.f32 %v3371_v59, %v1619_v36  ;;  %v1622_v38 = vadd.f32 %v2810_v8, %v3366_v23  ;;  %v1613_v15 = vpop.f32.mrb[43].mxu0 }
 0x21a   : > { %v1761_v31 = vpack.c.bf16 %v1740_v21, %v1739_v51  ;;  %v1672_v40 = vmul.f32 %v3371_v59, %v1611_v0  ;;  %v1614_v42 = vadd.f32 %v3366_v23, %v1613_v15 }
 0x21b   : > { %v1713_v43 = vadd.f32 %v3377_v13, %v1674_v2  ;;  %v1675_v44 = vmul.f32 %v3371_v59, %v1622_v38 }
 0x21c   : > { %v1711_v47 = vadd.f32 %v3377_v13, %v1672_v40  ;;  %v1673_v11 = vmul.f32 %v3371_v59, %v1614_v42  ;;  %2843 = vmatprep.mubr.msk.bf16.mxu1 %vm1431_vm2, %v1761_v31 }
 0x21d   : > { %v1714_v35 = vadd.f32 %v3377_v13, %v1675_v44  ;;  %2844 = vmatmul.mubr.msk.bf16.gmra.mrb[40].mxu1 %vm1431_vm2, %v1762_v60  ;;  %v1745_v26 = vmax.f32 %v1713_v43, 0.0 }
 0x21e   : > { %v1712_v62 = vadd.f32 %v3377_v13, %v1673_v11  ;;  %v2813_v6 = vpop.f32.mrb[44].mxu0  ;;  %v1743_v53 = vmax.f32 %v1711_v47, 0.0 }
 0x21f   : > { %v1746_v39 = vmax.f32 %v1714_v35, 0.0  ;;  %v1635_v25 = vadd.f32 %v2813_v6, %v3366_v23  ;;  %v1626_v54 = vpop.f32.mrb[45].mxu0 }
 0x220   : > { %v1744_v12 = vmax.f32 %v1712_v62, 0.0  ;;  %v1627_v33 = vadd.f32 %v3366_v23, %v1626_v54  ;;  %v2814_v46 = vpop.f32.mrb[46].mxu0 }
 0x221   : > { %v1764_v45 = vpack.c.bf16 %v1746_v39, %v1745_v26  ;;  %v1678_v48 = vmul.f32 %v3371_v59, %v1635_v25  ;;  %v1638_v28 = vadd.f32 %v2814_v46, %v3366_v23  ;;  %v1629_v50 = vpop.f32.mrb[47].mxu0 }
 0x222   : > { %v1763_v37 = vpack.c.bf16 %v1744_v12, %v1743_v53  ;;  %v1676_v9 = vmul.f32 %v3371_v59, %v1627_v33  ;;  %v1630_v3 = vadd.f32 %v3366_v23, %v1629_v50 }
 0x223   : > { %v1717_v63 = vadd.f32 %v3377_v13, %v1678_v48  ;;  %v1679_v5 = vmul.f32 %v3371_v59, %v1638_v28 }
 0x224   : > { %v1715_v49 = vadd.f32 %v3377_v13, %v1676_v9  ;;  %v1677_v52 = vmul.f32 %v3371_v59, %v1630_v3  ;;  %2847 = vmatprep.mubr.msk.bf16.mxu1 %vm1431_vm2, %v1763_v37  ;;  %v3493_v59 = vld [vmem:[%s3620_s12] ss:$0 sm:$0xff] }
 0x225   : > { %v1718_v7 = vadd.f32 %v3377_v13, %v1679_v5  ;;  %2848 = vmatmul.mubr.msk.bf16.gmra.mrb[44].mxu1 %vm1431_vm2, %v1764_v45  ;;  %v1749_v16 = vmax.f32 %v1717_v63, 0.0 }
 0x226   : > { %v1716_v10 = vadd.f32 %v3377_v13, %v1677_v52  ;;  %v1747_v57 = vmax.f32 %v1715_v49, 0.0 }
 0x227   : > { %v1750_v27 = vmax.f32 %v1718_v7, 0.0 }
 0x228   : > { %v1748_v23 = vmax.f32 %v1716_v10, 0.0 }
 0x229   : > { %v1766_v34 = vpack.c.bf16 %v1750_v27, %v1749_v16 }
 0x22a   : > { %v1765_v1 = vpack.c.bf16 %v1748_v23, %v1747_v57 }
 0x22c   : > { %2851 = vmatprep.mubr.msk.bf16.mxu1 %vm1431_vm2, %v1765_v1 }
 0x22d   : > { %2852 = vmatmul.mubr.msk.bf16.gmra.mrb[48].mxu1 %vm1431_vm2, %v1766_v34 }
 0x2bb   : > { %v2825_v24 = vpop.f32.mrb[20].mxu1 }
 0x2bc   : > { %v1897_v14 = vadd.f32 %v2825_v24, %v3493_v59  ;;  %v1888_v17 = vpop.f32.mrb[21].mxu1 }
 0x2bd   : > { %v1889_v13 = vadd.f32 %v3493_v59, %v1888_v17  ;;  %v2826_v4 = vpop.f32.mrb[22].mxu1 }
 0x2be   : > { %v2029_v41 = vsel %vm1431_vm2, %v1897_v14, -inf  ;;  %v1900_v18 = vadd.f32 %v2826_v4, %v3493_v59  ;;  %v1891_v19 = vpop.f32.mrb[23].mxu1 }
 0x2bf   : > { %v2030_v30 = vrot.slane %v2029_v41, 4  ;;  %v2015_v56 = vsel %vm1431_vm2, %v1889_v13, -inf  ;;  %v1892_v22 = vadd.f32 %v3493_v59, %v1891_v19 }
 0x2c0   : > { %v2016_v55 = vrot.slane %v2015_v56, 4  ;;  %v2036_v58 = vsel %vm1431_vm2, %v1900_v18, -inf }
 0x2c1   : > { %v2031_v20 = vmax.f32 %v2029_v41, %v2030_v30  ;;  %v2037_v29 = vrot.slane %v2036_v58, 4  ;;  %v2022_v32 = vsel %vm1431_vm2, %v1892_v22, -inf }
 0x2c2   : > { %v2017_v36 = vmax.f32 %v2015_v56, %v2016_v55  ;;  %v2023_v61 = vrot.slane %v2022_v32, 4 }
 0x2c3   : > { %v2032_v51 = vrot.slane %v2031_v20, 2  ;;  %v2038_v21 = vmax.f32 %v2036_v58, %v2037_v29 }
 0x2c4   : > { %v2018_v0 = vrot.slane %v2017_v36, 2  ;;  %v2024_v8 = vmax.f32 %v2022_v32, %v2023_v61 }
 0x2c5   : > { %v2033_v60 = vmax.f32 %v2031_v20, %v2032_v51  ;;  %v2039_v2 = vrot.slane %v2038_v21, 2 }
 0x2c6   : > { %v2019_v38 = vmax.f32 %v2017_v36, %v2018_v0  ;;  %v2025_v15 = vrot.slane %v2024_v8, 2 }
 0x2c7   : > { %v2034_v31 = vrot.slane %v2033_v60, 1  ;;  %v2040_v40 = vmax.f32 %v2038_v21, %v2039_v2 }
 0x2c8   : > { %v2020_v42 = vrot.slane %v2019_v38, 1  ;;  %v2026_v43 = vmax.f32 %v2024_v8, %v2025_v15 }
 0x2c9   : > { %v2035_v44 = vmax.f32 %v2033_v60, %v2034_v31  ;;  %v2041_v47 = vrot.slane %v2040_v40, 1 }
 0x2ca   : > { %v2021_v11 = vmax.f32 %v2019_v38, %v2020_v42  ;;  %v2027_v35 = vrot.slane %v2026_v43, 1  ;;  %v2829_v62 = vpop.f32.mrb[24].mxu1 }
 0x2cb   : > { %v2042_v6 = vmax.f32 %v2040_v40, %v2041_v47  ;;  %v1913_v26 = vadd.f32 %v2829_v62, %v3493_v59  ;;  %v1904_v39 = vpop.f32.mrb[25].mxu1  ;;  %v2645_v33 = vpack.c.bf16 %v2035_v44, %v2035_v44 }
 0x2cc   : > { %v2643_v25 = vpack.c.bf16 %v2021_v11, %v2021_v11  ;;  %v2028_v54 = vmax.f32 %v2026_v43, %v2027_v35  ;;  %v1905_v53 = vadd.f32 %v3493_v59, %v1904_v39  ;;  %v2830_v12 = vpop.f32.mrb[26].mxu1 }
 0x2cd   : > { %v2646_v46 = vpack.c.bf16 %v2042_v6, %v2042_v6  ;;  %v2057_v45 = vsel %vm1431_vm2, %v1913_v26, -inf  ;;  %v1916_v48 = vadd.f32 %v2830_v12, %v3493_v59  ;;  %v1907_v28 = vpop.f32.mrb[27].mxu1  ;;  %v2369_v16 = vunpack.c.l.b16 %v2645_v33 }
 0x2ce   : > { %v2644_v50 = vpack.c.bf16 %v2028_v54, %v2028_v54  ;;  %v2058_v37 = vrot.slane %v2057_v45, 4  ;;  %v2043_v9 = vsel %vm1431_vm2, %v1905_v53, -inf  ;;  %v1908_v5 = vadd.f32 %v3493_v59, %v1907_v28 }
 0x2cf   : > { %v2044_v3 = vrot.slane %v2043_v9, 4  ;;  %v2064_v63 = vsel %vm1431_vm2, %v1916_v48, -inf  ;;  %v2367_v49 = vunpack.c.l.b16 %v2643_v25  ;;  %v2370_v27 = vunpack.c.l.b16 %v2646_v46 }
 0x2d0   : > { %v2368_v52 = vunpack.c.l.b16 %v2644_v50  ;;  %v2059_v7 = vmax.f32 %v2057_v45, %v2058_v37  ;;  %v2065_v10 = vrot.slane %v2064_v63, 4  ;;  %v2050_v23 = vsel %vm1431_vm2, %v1908_v5, -inf }
 0x2d1   : > { %v2045_v57 = vmax.f32 %v2043_v9, %v2044_v3  ;;  %v2051_v14 = vrot.slane %v2050_v23, 4 }
 0x2d2   : > { %v2400_v34 = vsel %vm2399_vm3, %v2368_v52, %v2367_v49  ;;  %v2060_v1 = vrot.slane %v2059_v7, 2  ;;  %v2066_v24 = vmax.f32 %v2064_v63, %v2065_v10 }
 0x2d3   : > { %v2402_v17 = vsel %vm2401_vm4, %v2369_v16, %v2400_v34  ;;  %v2046_v13 = vrot.slane %v2045_v57, 2  ;;  %v2052_v19 = vmax.f32 %v2050_v23, %v2051_v14 }
 0x2d4   : > { %v2061_v4 = vmax.f32 %v2059_v7, %v2060_v1  ;;  %v2404_v41 = vsel %vm2403_vm5, %v2370_v27, %v2402_v17  ;;  %v2067_v18 = vrot.slane %v2066_v24, 2 }
 0x2d5   : > { %v2047_v30 = vmax.f32 %v2045_v57, %v2046_v13  ;;  %v2053_v55 = vrot.slane %v2052_v19, 2 }
 0x2d6   : > { %v2062_v56 = vrot.slane %v2061_v4, 1  ;;  %v2068_v22 = vmax.f32 %v2066_v24, %v2067_v18 }
 0x2d7   : > { %v2048_v58 = vrot.slane %v2047_v30, 1  ;;  %v2054_v32 = vmax.f32 %v2052_v19, %v2053_v55 }
 0x2d8   : > { %v2063_v20 = vmax.f32 %v2061_v4, %v2062_v56  ;;  %v2069_v29 = vrot.slane %v2068_v22, 1  ;;  %v2833_v36 = vpop.f32.mrb[28].mxu1 }
 0x2d9   : > { %v2049_v61 = vmax.f32 %v2047_v30, %v2048_v58  ;;  %v1929_v51 = vadd.f32 %v2833_v36, %v3493_v59  ;;  %v1920_v21 = vpop.f32.mrb[29].mxu1  ;;  %v2055_v8 = vrot.slane %v2054_v32, 1 }
 0x2da   : > { %v2070_v0 = vmax.f32 %v2068_v22, %v2069_v29  ;;  %v1921_v60 = vadd.f32 %v3493_v59, %v1920_v21  ;;  %v2834_v2 = vpop.f32.mrb[30].mxu1  ;;  %v2649_v42 = vpack.c.bf16 %v2063_v20, %v2063_v20 }
 0x2db   : > { %v2647_v38 = vpack.c.bf16 %v2049_v61, %v2049_v61  ;;  %v2085_v15 = vsel %vm1431_vm2, %v1929_v51, -inf  ;;  %v1932_v31 = vadd.f32 %v2834_v2, %v3493_v59  ;;  %v1923_v40 = vpop.f32.mrb[31].mxu1  ;;  %v2056_v44 = vmax.f32 %v2054_v32, %v2055_v8 }
 0x2dc   : > { %v2650_v43 = vpack.c.bf16 %v2070_v0, %v2070_v0  ;;  %v2086_v47 = vrot.slane %v2085_v15, 4  ;;  %v2071_v35 = vsel %vm1431_vm2, %v1921_v60, -inf  ;;  %v1924_v6 = vadd.f32 %v3493_v59, %v1923_v40 }
 0x2dd   : > { %v2371_v11 = vunpack.c.l.b16 %v2647_v38  ;;  %v2092_v62 = vsel %vm1431_vm2, %v1932_v31, -inf  ;;  %v2648_v26 = vpack.c.bf16 %v2056_v44, %v2056_v44  ;;  %v2072_v25 = vrot.slane %v2071_v35, 4 }
 0x2de   : > { %v2087_v39 = vmax.f32 %v2085_v15, %v2086_v47  ;;  %v2093_v53 = vrot.slane %v2092_v62, 4  ;;  %v2078_v12 = vsel %vm1431_vm2, %v1924_v6, -inf  ;;  %v2373_v50 = vunpack.c.l.b16 %v2649_v42 }
 0x2df   : > { %v2406_v54 = vsel %vm2405_vm6, %v2371_v11, %v2404_v41  ;;  %v2372_v33 = vunpack.c.l.b16 %v2648_v26  ;;  %v2073_v45 = vmax.f32 %v2071_v35, %v2072_v25  ;;  %v2079_v48 = vrot.slane %v2078_v12, 4 }
 0x2e0   : > { %v2088_v46 = vrot.slane %v2087_v39, 2  ;;  %v2837_v28 = vpop.f32.mrb[32].mxu1  ;;  %v2374_v37 = vunpack.c.l.b16 %v2650_v43  ;;  %v2094_v9 = vmax.f32 %v2092_v62, %v2093_v53 }
 0x2e1   : > { %v1945_v3 = vadd.f32 %v2837_v28, %v3493_v59  ;;  %v1936_v63 = vpop.f32.mrb[33].mxu1  ;;  %v2408_v5 = vsel %vm2407_vm7, %v2372_v33, %v2406_v54  ;;  %v2074_v52 = vrot.slane %v2073_v45, 2  ;;  %v2080_v7 = vmax.f32 %v2078_v12, %v2079_v48 }
 0x2e2   : > { %v2089_v49 = vmax.f32 %v2087_v39, %v2088_v46  ;;  %v2838_v10 = vpop.f32.mrb[34].mxu1  ;;  %v2410_v16 = vsel %vm2409_vm8, %v2373_v50, %v2408_v5  ;;  %v2095_v27 = vrot.slane %v2094_v9, 2  ;;  %v1937_v23 = vadd.f32 %v3493_v59, %v1936_v63 }
 0x2e3   : > { %v2113_v57 = vsel %vm1431_vm2, %v1945_v3, -inf  ;;  %v1939_v34 = vpop.f32.mrb[35].mxu1  ;;  %v2412_v1 = vsel %vm2411_vm9, %v2374_v37, %v2410_v16  ;;  %v2075_v14 = vmax.f32 %v2073_v45, %v2074_v52  ;;  %v2081_v17 = vrot.slane %v2080_v7, 2 }
 0x2e4   : > { %v2090_v24 = vrot.slane %v2089_v49, 1  ;;  %v2434_v13 = vpack.c.b16 %v2412_v1, %v2412_v1  ;;  %v2096_v4 = vmax.f32 %v2094_v9, %v2095_v27  ;;  %v2114_v41 = vrot.slane %v2113_v57, 4 }
 0x2e5   : > { %v2099_v18 = vsel %vm1431_vm2, %v1937_v23, -inf  ;;  %v2076_v30 = vrot.slane %v2075_v14, 1  ;;  %v2082_v56 = vmax.f32 %v2080_v7, %v2081_v17  ;;  %v1948_v20 = vadd.f32 %v2838_v10, %v3493_v59 }
 0x2e6   : > { %v2091_v19 = vmax.f32 %v2089_v49, %v2090_v24  ;;  %v2100_v22 = vrot.slane %v2099_v18, 4  ;;  %2443 = vst.msk [vmem:[%s3533_s29] sm:$0xf] %vm2442_vm10, %v2434_v13  ;;  %v2097_v55 = vrot.slane %v2096_v4, 1  ;;  %v2115_v58 = vmax.f32 %v2113_v57, %v2114_v41 }
 0x2e7   : > { %v1940_v29 = vadd.f32 %v3493_v59, %v1939_v34  ;;  %v2077_v36 = vmax.f32 %v2075_v14, %v2076_v30  ;;  %v2083_v61 = vrot.slane %v2082_v56, 1  ;;  %v2120_v60 = vsel %vm1431_vm2, %v1948_v20, -inf }
 0x2e8   : > { %v2653_v32 = vpack.c.bf16 %v2091_v19, %v2091_v19  ;;  %v2101_v51 = vmax.f32 %v2099_v18, %v2100_v22  ;;  %v2841_v21 = vpop.f32.mrb[36].mxu1  ;;  %v2098_v0 = vmax.f32 %v2096_v4, %v2097_v55  ;;  %v2116_v8 = vrot.slane %v2115_v58, 2 }
 0x2e9   : > { %v2106_v2 = vsel %vm1431_vm2, %v1940_v29, -inf  ;;  %v1952_v38 = vpop.f32.mrb[37].mxu1  ;;  %v2651_v31 = vpack.c.bf16 %v2077_v36, %v2077_v36  ;;  %v2084_v40 = vmax.f32 %v2082_v56, %v2083_v61  ;;  %v2121_v11 = vrot.slane %v2120_v60, 4 }
 0x2ea   : > { %v2377_v15 = vunpack.c.l.b16 %v2653_v32  ;;  %v2102_v42 = vrot.slane %v2101_v51, 2  ;;  %v2842_v43 = vpop.f32.mrb[38].mxu1  ;;  %v2654_v44 = vpack.c.bf16 %v2098_v0, %v2098_v0  ;;  %v2117_v47 = vmax.f32 %v2115_v58, %v2116_v8 }
 0x2eb   : > { %v2107_v35 = vrot.slane %v2106_v2, 4  ;;  %v1955_v62 = vpop.f32.mrb[39].mxu1  ;;  %v2375_v6 = vunpack.c.l.b16 %v2651_v31  ;;  %v2652_v26 = vpack.c.bf16 %v2084_v40, %v2084_v40  ;;  %v1961_v25 = vadd.f32 %v2841_v21, %v3493_v59 }
 0x2ec   : > { %v2103_v39 = vmax.f32 %v2101_v51, %v2102_v42  ;;  %v2378_v54 = vunpack.c.l.b16 %v2654_v44  ;;  %v2118_v53 = vrot.slane %v2117_v47, 1  ;;  %v2122_v12 = vmax.f32 %v2120_v60, %v2121_v11 }
 0x2ed   : > { %v2108_v33 = vmax.f32 %v2106_v2, %v2107_v35  ;;  %v2376_v46 = vunpack.c.l.b16 %v2652_v26  ;;  %v2141_v48 = vsel %vm1431_vm2, %v1961_v25, -inf  ;;  %v1953_v28 = vadd.f32 %v3493_v59, %v1952_v38 }
 0x2ee   : > { %v2104_v45 = vrot.slane %v2103_v39, 1  ;;  %v2119_v50 = vmax.f32 %v2117_v47, %v2118_v53  ;;  %v2123_v37 = vrot.slane %v2122_v12, 2  ;;  %v2142_v3 = vrot.slane %v2141_v48, 4 }
 0x2ef   : > { %v2109_v9 = vrot.slane %v2108_v33, 2  ;;  %v2413_v63 = vsel %vm2399_vm3, %v2376_v46, %v2375_v6  ;;  %v2127_v49 = vsel %vm1431_vm2, %v1953_v28, -inf  ;;  %v1964_v52 = vadd.f32 %v2842_v43, %v3493_v59 }
 0x2f0   : > { %v2105_v5 = vmax.f32 %v2103_v39, %v2104_v45  ;;  %v2845_v7 = vpop.f32.mrb[40].mxu1  ;;  %v2414_v10 = vsel %vm2401_vm4, %v2377_v15, %v2413_v63  ;;  %v2657_v16 = vpack.c.bf16 %v2119_v50, %v2119_v50  ;;  %v2124_v27 = vmax.f32 %v2122_v12, %v2123_v37 }
 0x2f1   : > { %v2110_v57 = vmax.f32 %v2108_v33, %v2109_v9  ;;  %v1968_v23 = vpop.f32.mrb[41].mxu1  ;;  %v2415_v1 = vsel %vm2403_vm5, %v2378_v54, %v2414_v10  ;;  %v2143_v24 = vmax.f32 %v2141_v48, %v2142_v3  ;;  %v2128_v14 = vrot.slane %v2127_v49, 4 }
 0x2f2   : > { %v2655_v34 = vpack.c.bf16 %v2105_v5, %v2105_v5  ;;  %v2846_v17 = vpop.f32.mrb[42].mxu1  ;;  %v2381_v13 = vunpack.c.l.b16 %v2657_v16  ;;  %v2125_v4 = vrot.slane %v2124_v27, 1  ;;  %v2148_v18 = vsel %vm1431_vm2, %v1964_v52, -inf }
 0x2f3   : > { %v2111_v41 = vrot.slane %v2110_v57, 1  ;;  %v1971_v19 = vpop.f32.mrb[43].mxu1  ;;  %v2144_v56 = vrot.slane %v2143_v24, 2  ;;  %v2129_v22 = vmax.f32 %v2127_v49, %v2128_v14  ;;  %v2149_v55 = vrot.slane %v2148_v18, 4 }
 0x2f4   : > { %v2379_v30 = vunpack.c.l.b16 %v2655_v34  ;;  %v2126_v58 = vmax.f32 %v2124_v27, %v2125_v4  ;;  %v1956_v29 = vadd.f32 %v3493_v59, %v1955_v62  ;;  %v1977_v32 = vadd.f32 %v2845_v7, %v3493_v59 }
 0x2f5   : > { %v2112_v20 = vmax.f32 %v2110_v57, %v2111_v41  ;;  %v2145_v61 = vmax.f32 %v2143_v24, %v2144_v56  ;;  %v2130_v51 = vrot.slane %v2129_v22, 2  ;;  %v2150_v21 = vmax.f32 %v2148_v18, %v2149_v55 }
 0x2f6   : > { %v2416_v36 = vsel %vm2405_vm6, %v2379_v30, %v2415_v1  ;;  %v2658_v0 = vpack.c.bf16 %v2126_v58, %v2126_v58  ;;  %v2134_v60 = vsel %vm1431_vm2, %v1956_v29, -inf  ;;  %v2169_v2 = vsel %vm1431_vm2, %v1977_v32, -inf }
 0x2f7   : > { %v2656_v8 = vpack.c.bf16 %v2112_v20, %v2112_v20  ;;  %v2146_v38 = vrot.slane %v2145_v61, 1  ;;  %v2131_v15 = vmax.f32 %v2129_v22, %v2130_v51  ;;  %v2151_v31 = vrot.slane %v2150_v21, 2 }
 0x2f8   : > { %v2135_v40 = vrot.slane %v2134_v60, 4  ;;  %v2849_v42 = vpop.f32.mrb[44].mxu1  ;;  %v2382_v43 = vunpack.c.l.b16 %v2658_v0  ;;  %v2170_v47 = vrot.slane %v2169_v2, 4  ;;  %v1969_v11 = vadd.f32 %v3493_v59, %v1968_v23 }
 0x2f9   : > { %v2380_v44 = vunpack.c.l.b16 %v2656_v8  ;;  %v1984_v35 = vpop.f32.mrb[45].mxu1  ;;  %v2147_v62 = vmax.f32 %v2145_v61, %v2146_v38  ;;  %v2132_v6 = vrot.slane %v2131_v15, 1  ;;  %v2152_v26 = vmax.f32 %v2150_v21, %v2151_v31 }
 0x2fa   : > { %v2136_v39 = vmax.f32 %v2134_v60, %v2135_v40  ;;  %v2850_v25 = vpop.f32.mrb[46].mxu1  ;;  %v2171_v53 = vmax.f32 %v2169_v2, %v2170_v47  ;;  %v2155_v12 = vsel %vm1431_vm2, %v1969_v11, -inf  ;;  %v1980_v33 = vadd.f32 %v2846_v17, %v3493_v59 }
 0x2fb   : > { %v2417_v54 = vsel %vm2407_vm7, %v2380_v44, %v2416_v36  ;;  %v1987_v46 = vpop.f32.mrb[47].mxu1  ;;  %v2661_v48 = vpack.c.bf16 %v2147_v62, %v2147_v62  ;;  %v2133_v28 = vmax.f32 %v2131_v15, %v2132_v6  ;;  %v2153_v50 = vrot.slane %v2152_v26, 1 }
 0x2fc   : > { %v2418_v45 = vsel %vm2409_vm8, %v2381_v13, %v2417_v54  ;;  %v2137_v9 = vrot.slane %v2136_v39, 2  ;;  %v2172_v3 = vrot.slane %v2171_v53, 2  ;;  %v2156_v63 = vrot.slane %v2155_v12, 4 }
 0x2fd   : > { %v2419_v37 = vsel %vm2411_vm9, %v2382_v43, %v2418_v45  ;;  %v2659_v49 = vpack.c.bf16 %v2133_v28, %v2133_v28  ;;  %v2154_v52 = vmax.f32 %v2152_v26, %v2153_v50  ;;  %v2176_v27 = vsel %vm1431_vm2, %v1980_v33, -inf }
 0x2fe   : > { %v2435_v5 = vpack.c.b16 %v2419_v37, %v2419_v37  ;;  %v2138_v7 = vmax.f32 %v2136_v39, %v2137_v9  ;;  %v2173_v10 = vmax.f32 %v2171_v53, %v2172_v3  ;;  %v2157_v16 = vmax.f32 %v2155_v12, %v2156_v63 }
 0x2ff   : > { %v2385_v57 = vunpack.c.l.b16 %v2661_v48  ;;  %v2177_v23 = vrot.slane %v2176_v27, 4  ;;  %v1972_v34 = vadd.f32 %v3493_v59, %v1971_v19  ;;  %v2662_v24 = vpack.c.bf16 %v2154_v52, %v2154_v52 }
 0x300   : > { %2444 = vst.msk [vmem:[%s3533_s29 + $0x4] sm:$0xf] %vm2442_vm10, %v2435_v5  ;;  %v2853_v1 = vpop.f32.mrb[48].mxu1  ;;  %v2139_v14 = vrot.slane %v2138_v7, 1  ;;  %v2158_v17 = vrot.slane %v2157_v16, 2  ;;  %v1993_v13 = vadd.f32 %v2849_v42, %v3493_v59  ;;  %v2383_v41 = vunpack.c.l.b16 %v2659_v49 }
 0x301   : > { %v2000_v4 = vpop.f32.mrb[49].mxu1  ;;  %v2178_v18 = vmax.f32 %v2176_v27, %v2177_v23  ;;  %v2162_v30 = vsel %vm1431_vm2, %v1972_v34, -inf  ;;  %v1985_v56 = vadd.f32 %v3493_v59, %v1984_v35  ;;  %v2174_v58 = vrot.slane %v2173_v10, 1 }
 0x302   : > { %v2854_v22 = vpop.f32.mrb[50].mxu1  ;;  %v2140_v55 = vmax.f32 %v2138_v7, %v2139_v14  ;;  %v2159_v20 = vmax.f32 %v2157_v16, %v2158_v17  ;;  %v2163_v29 = vrot.slane %v2162_v30, 4  ;;  %v2197_v36 = vsel %vm1431_vm2, %v1993_v13, -inf }
 0x303   : > { %v3570_v32 = vpop.f32.mrb[51].mxu1  ;;  %v2179_v19 = vrot.slane %v2178_v18, 2  ;;  %v2183_v61 = vsel %vm1431_vm2, %v1985_v56, -inf  ;;  %v1996_v51 = vadd.f32 %v2850_v25, %v3493_v59  ;;  %v2386_v21 = vunpack.c.l.b16 %v2662_v24 }
 0x304   : > { %v2660_v0 = vpack.c.bf16 %v2140_v55, %v2140_v55  ;;  %v2160_v8 = vrot.slane %v2159_v20, 1  ;;  %v2164_v60 = vmax.f32 %v2162_v30, %v2163_v29  ;;  %v2198_v38 = vrot.slane %v2197_v36, 4 }
 0x305   : > { %v2180_v2 = vmax.f32 %v2178_v18, %v2179_v19  ;;  %v2184_v15 = vrot.slane %v2183_v61, 4  ;;  %v2204_v31 = vsel %vm1431_vm2, %v1996_v51, -inf  ;;  %v2175_v42 = vmax.f32 %v2173_v10, %v2174_v58 }
 0x306   : > { %v2384_v40 = vunpack.c.l.b16 %v2660_v0  ;;  %v2161_v43 = vmax.f32 %v2159_v20, %v2160_v8  ;;  %v2165_v44 = vrot.slane %v2164_v60, 2  ;;  %v2199_v11 = vmax.f32 %v2197_v36, %v2198_v38 }
 0x307   : > { %v2181_v47 = vrot.slane %v2180_v2, 1  ;;  %v2185_v35 = vmax.f32 %v2183_v61, %v2184_v15  ;;  %v2205_v62 = vrot.slane %v2204_v31, 4  ;;  %v1988_v25 = vadd.f32 %v3493_v59, %v1987_v46 }
 0x308   : > { %v2420_v6 = vsel %vm2399_vm3, %v2384_v40, %v2383_v41  ;;  %v2663_v26 = vpack.c.bf16 %v2161_v43, %v2161_v43  ;;  %v2166_v39 = vmax.f32 %v2164_v60, %v2165_v44  ;;  %v2200_v12 = vrot.slane %v2199_v11, 2 }
 0x309   : > { %v2421_v54 = vsel %vm2401_vm4, %v2385_v57, %v2420_v6  ;;  %v2182_v53 = vmax.f32 %v2180_v2, %v2181_v47  ;;  %v2186_v33 = vrot.slane %v2185_v35, 2  ;;  %v2206_v50 = vmax.f32 %v2204_v31, %v2205_v62 }
 0x30a   : > { %v2387_v45 = vunpack.c.l.b16 %v2663_v26  ;;  %v2422_v48 = vsel %vm2403_vm5, %v2386_v21, %v2421_v54  ;;  %v2167_v28 = vrot.slane %v2166_v39, 1  ;;  %v2665_v37 = vpack.c.bf16 %v2175_v42, %v2175_v42 }
 0x30b   : > { %v2201_v9 = vmax.f32 %v2199_v11, %v2200_v12  ;;  %v2187_v3 = vmax.f32 %v2185_v35, %v2186_v33  ;;  %v2190_v63 = vsel %vm1431_vm2, %v1988_v25, -inf  ;;  %v2207_v52 = vrot.slane %v2206_v50, 2 }
 0x30c   : > { %v2423_v5 = vsel %vm2405_vm6, %v2387_v45, %v2422_v48  ;;  %v2168_v49 = vmax.f32 %v2166_v39, %v2167_v28  ;;  %v2191_v46 = vrot.slane %v2190_v63, 4  ;;  %v2666_v7 = vpack.c.bf16 %v2182_v53, %v2182_v53 }
 0x30d   : > { %v2202_v10 = vrot.slane %v2201_v9, 1  ;;  %v2188_v16 = vrot.slane %v2187_v3, 1  ;;  %v2009_v27 = vadd.f32 %v2853_v1, %v3493_v59  ;;  %v2208_v23 = vmax.f32 %v2206_v50, %v2207_v52 }
 0x30e   : > { %v2664_v57 = vpack.c.bf16 %v2168_v49, %v2168_v49  ;;  %v2192_v34 = vmax.f32 %v2190_v63, %v2191_v46  ;;  %v2001_v24 = vadd.f32 %v3493_v59, %v2000_v4  ;;  %v2389_v14 = vunpack.c.l.b16 %v2665_v37 }
 0x30f   : > { %v2225_v17 = vsel %vm1431_vm2, %v2009_v27, -inf  ;;  %v2012_v13 = vadd.f32 %v2854_v22, %v3493_v59  ;;  %v2209_v18 = vrot.slane %v2208_v23, 1  ;;  %v2390_v55 = vunpack.c.l.b16 %v2666_v7 }
 0x310   : > { %v2388_v41 = vunpack.c.l.b16 %v2664_v57  ;;  %v2193_v30 = vrot.slane %v2192_v34, 2  ;;  %v2226_v56 = vrot.slane %v2225_v17, 4  ;;  %v2203_v58 = vmax.f32 %v2201_v9, %v2202_v10 }
 0x311   : > { %v2189_v20 = vmax.f32 %v2187_v3, %v2188_v16  ;;  %v2211_v29 = vsel %vm1431_vm2, %v2001_v24, -inf  ;;  %v2232_v4 = vsel %vm1431_vm2, %v2012_v13, -inf  ;;  %v2210_v21 = vmax.f32 %v2208_v23, %v2209_v18 }
 0x312   : > { %v2424_v1 = vsel %vm2407_vm7, %v2388_v41, %v2423_v5  ;;  %v2194_v19 = vmax.f32 %v2192_v34, %v2193_v30  ;;  %v2227_v36 = vmax.f32 %v2225_v17, %v2226_v56  ;;  %v2212_v51 = vrot.slane %v2211_v29, 4 }
 0x313   : > { %v2425_v61 = vsel %vm2409_vm8, %v2389_v14, %v2424_v1  ;;  %v2233_v38 = vrot.slane %v2232_v4, 4  ;;  %v2004_v15 = vadd.f32 %v3493_v59, %v3570_v32  ;;  %v2669_v31 = vpack.c.bf16 %v2203_v58, %v2203_v58 }
 0x314   : > { %v2426_v22 = vsel %vm2411_vm9, %v2390_v55, %v2425_v61  ;;  %v2195_v0 = vrot.slane %v2194_v19, 1  ;;  %v2228_v8 = vrot.slane %v2227_v36, 2  ;;  %v2213_v2 = vmax.f32 %v2211_v29, %v2212_v51 }
 0x315   : > { %v2436_v60 = vpack.c.b16 %v2426_v22, %v2426_v22  ;;  %v2667_v40 = vpack.c.bf16 %v2189_v20, %v2189_v20  ;;  %v2234_v47 = vmax.f32 %v2232_v4, %v2233_v38  ;;  %v2218_v11 = vsel %vm1431_vm2, %v2004_v15, -inf }
 0x316   : > { %v2196_v42 = vmax.f32 %v2194_v19, %v2195_v0  ;;  %v2229_v43 = vmax.f32 %v2227_v36, %v2228_v8  ;;  %v2214_v44 = vrot.slane %v2213_v2, 2  ;;  %v2670_v35 = vpack.c.bf16 %v2210_v21, %v2210_v21 }
 0x317   : > { %2445 = vst.msk [vmem:[%s3533_s29 + $0x8] sm:$0xf] %vm2442_vm10, %v2436_v60  ;;  %v2219_v6 = vrot.slane %v2218_v11, 4  ;;  %v2235_v39 = vrot.slane %v2234_v47, 2  ;;  %v2391_v25 = vunpack.c.l.b16 %v2667_v40  ;;  %v2393_v12 = vunpack.c.l.b16 %v2669_v31 }
 0x318   : > { %v2668_v62 = vpack.c.bf16 %v2196_v42, %v2196_v42  ;;  %v2215_v26 = vmax.f32 %v2213_v2, %v2214_v44  ;;  %v2230_v59 = vrot.slane %v2229_v43, 1  ;;  %v2394_v45 = vunpack.c.l.b16 %v2670_v35 }
 0x319   : > { %v2220_v53 = vmax.f32 %v2218_v11, %v2219_v6  ;;  %v2236_v33 = vmax.f32 %v2234_v47, %v2235_v39 }
 0x31a   : > { %v2392_v54 = vunpack.c.l.b16 %v2668_v62  ;;  %v2216_v32 = vrot.slane %v2215_v26, 1  ;;  %v2231_v5 = vmax.f32 %v2229_v43, %v2230_v59 }
 0x31b   : > { %v2221_v28 = vrot.slane %v2220_v53, 2  ;;  %v2237_v9 = vrot.slane %v2236_v33, 1 }
 0x31c   : > { %v2427_v48 = vsel %vm2399_vm3, %v2392_v54, %v2391_v25  ;;  %v2217_v37 = vmax.f32 %v2215_v26, %v2216_v32  ;;  %v2673_v16 = vpack.c.bf16 %v2231_v5, %v2231_v5 }
 0x31d   : > { %v2428_v50 = vsel %vm2401_vm4, %v2393_v12, %v2427_v48  ;;  %v2222_v63 = vmax.f32 %v2220_v53, %v2221_v28  ;;  %v2238_v52 = vmax.f32 %v2236_v33, %v2237_v9 }
 0x31e   : > { %v2429_v3 = vsel %vm2403_vm5, %v2394_v45, %v2428_v50  ;;  %v2671_v49 = vpack.c.bf16 %v2217_v37, %v2217_v37  ;;  %v2397_v24 = vunpack.c.l.b16 %v2673_v16 }
 0x31f   : > { %v2223_v46 = vrot.slane %v2222_v63, 1  ;;  %v2674_v57 = vpack.c.bf16 %v2238_v52, %v2238_v52 }
 0x320   : > { %v2395_v7 = vunpack.c.l.b16 %v2671_v49 }
 0x321   : > { %v2224_v10 = vmax.f32 %v2222_v63, %v2223_v46  ;;  %v2398_v14 = vunpack.c.l.b16 %v2674_v57 }
 0x322   : > { %v2430_v27 = vsel %vm2405_vm6, %v2395_v7, %v2429_v3 }
 0x323   : > { %v2672_v23 = vpack.c.bf16 %v2224_v10, %v2224_v10 }
 0x325   : > { %v2396_v34 = vunpack.c.l.b16 %v2672_v23 }
 0x327   : > { %v2431_v17 = vsel %vm2407_vm7, %v2396_v34, %v2430_v27 }
 0x328   : > { %v2432_v13 = vsel %vm2409_vm8, %v2397_v24, %v2431_v17 }
 0x329   : > { %v2433_v41 = vsel %vm2411_vm9, %v2398_v14, %v2432_v13 }
 0x32a   : > { %v2437_v18 = vpack.c.b16 %v2433_v41, %v2433_v41 }
 0x32c   : > { %2446 = vst.msk [vmem:[%s3533_s29 + $0xc] sm:$0xf] %vm2442_vm10, %v2437_v18 }
 0x32d PF: > { %s23_s25 = sadd.s32 1, %s2901_s25  }
 0x32e   : > { %p20_p5 = scmp.ge.s32.totalorder %s23_s25, 4  }
 0x330   :  { %22 = sbr.rel (!%p20_p5) target bundleno = 1 (0x1), region = 105 }

// kernel: dyedcnn_forward.8
= control target key start
LH: loop header
LB: loop body
LE: loop exit
PB: predicated region body
PF: predicated region fallthrough
CT: control target
= control target key end

     0   :  { %s1303_s18 = smov 0   ;;  %s1524_s0 = inlined_call_operand.vmem [shape: bf16[64,64], index: 0, kind: input, shape index: {}]   ;;  %s1525_s1 = inlined_call_operand.vmem [shape: bf16[64,8,64], index: 1, kind: input, shape index: {}]   ;;  %s1526_s2 = inlined_call_operand.vmem [shape: bf16[64,128], index: 2, kind: input, shape index: {}]   ;;  %s1527_s3 = inlined_call_operand.vmem [shape: bf16[64,128], index: 3, kind: input, shape index: {}]   ;;  %s1528_s4 = inlined_call_operand.vmem [shape: f32[1,128], index: 4, kind: input, shape index: {}]   ;;  %s1529_s5 = inlined_call_operand.vmem [shape: bf16[64,128], index: 5, kind: output, shape index: {}]  }
   0x1 LB: > { %s1068_s19 = sadd.s32 4294967295, %s1271_s18   ;;  %p1072_p0 = scmp.ge.s32.totalorder %s1271_s18, 1  ;;  %s1271_s18 = sphi %s1303_s18, %s15_s18  }
   0x2   : > { %p199_p1 = scmp.lt.s32.totalorder %s1271_s18, 3 }
   0x4   : > { %p200_p2 = pnand %p1072_p0, %p199_p1 }
   0x5   : > { %v1239_v0 = vld [vmem:[%s1526_s2] sm:$0xff] (!%p200_p2)   ;;  %s1073_s22 = sshll.u32 (!%p200_p2), %s1068_s19, 2  ;;  %v1241_v2 = vld [vmem:[%s1526_s2 + $0x8] sm:$0xff] (!%p200_p2)   ;;  %v1243_v4 = vld [vmem:[%s1526_s2 + $0x10] sm:$0xff] (!%p200_p2)   ;;  %s1075_s6 = sshll.u32 (!%p200_p2), %s1068_s19, 5  ;;  %vm304_vm0 = vcmask (!%p200_p2), 523264  }
   0x6   : > { %203 = sbr.rel (%p200_p2) target bundleno = 312 (0x138), region = 40  ;;  %v1240_v1 = vld [vmem:[%s1527_s3] sm:$0xff] (!%p200_p2)   ;;  %p233_p3 = scmp.lt.s32.totalorder (!%p200_p2), %s1073_s22, 7  ;;  %1171 = vmatprep.subr.bf16.mxu0 (!%p200_p2), %v1239_v0  ;;  %v1242_v3 = vld [vmem:[%s1527_s3 + $0x8] sm:$0xff] (!%p200_p2)   ;;  %v1244_v5 = vld [vmem:[%s1527_s3 + $0x10] sm:$0xff] (!%p200_p2)   ;;  %vm937_vm1 = vcmask (!%p200_p2), 1041409  }
   0x7   : > { %1223 = vmatprep.subr.bf16.mxu1 (!%p200_p2), %v1240_v1  ;;  %1172 = vmatpush3.bf16.msra.mxu0 (!%p200_p2), %v1239_v0  ;;  %v1245_v6 = vld [vmem:[%s1526_s2 + $0x18] sm:$0xff] (!%p200_p2)   ;;  %p239_p4 = scmp.lt.s32.totalorder (!%p200_p2), %s1075_s6, 63  ;;  %v1399_v51 = vld [vmem:[%s1528_s4] ss:$0 sm:$0xff] (!%p200_p2)  ;;  %vm939_vm2 = vcmask (!%p200_p2), 1042434   ;;  %vm941_vm3 = vcmask (!%p200_p2), 1043459  }
   0x8   : > { %1227 = vmatpush3.bf16.msra.mxu1 (!%p200_p2), %v1240_v1  ;;  %1173 = vmatprep.subr.bf16.mxu0 (!%p200_p2), %v1241_v2  ;;  %v1246_v8 = vld [vmem:[%s1527_s3 + $0x18] sm:$0xff] (!%p200_p2)   ;;  %vm943_vm4 = vcmask (!%p200_p2), 1044484   ;;  %vm945_vm5 = vcmask (!%p200_p2), 1045509   ;;  %vm947_vm6 = vcmask (!%p200_p2), 1046534   ;;  %vm949_vm7 = vcmask (!%p200_p2), 1047559  }
   0x9   : > { %1224 = vmatprep.subr.bf16.mxu1 (!%p200_p2), %v1242_v3 }
   0xb   : > { %1174 = vmatpush3.bf16.msra.mxu0 (!%p200_p2), %v1241_v2 }
   0xc   : > { %1228 = vmatpush3.bf16.msra.mxu1 (!%p200_p2), %v1242_v3  ;;  %1175 = vmatprep.subr.bf16.mxu0 (!%p200_p2), %v1243_v4 }
   0xd   : > { %s1531_s22 = smov (!%p233_p3, %s1073_s22), 7  ;;  %1225 = vmatprep.subr.bf16.mxu1 %v1244_v5  ;;  %s1533_s6 = smov (!%p239_p4, %s1075_s6), 63 }
   0xe   : > { %s1074_s9 = sshll.u32 %s1531_s22, 2  ;;  %s1076_s17 = sshll.u32 %s1533_s6, 2 }
   0xf   : > { %s236_s12 = scalar_lea.vmem %s1524_s0, %s1074_s9  ;;  %1176 = vmatpush3.bf16.msra.mxu0 %v1243_v4  ;;  %s1347_s21 = scalar_lea.vmem %s1525_s1, %s1076_s17 }
  0x10   : > { %v1247_v7 = vld [vmem:[%s236_s12] sm:$0xff]   ;;  %1229 = vmatpush3.bf16.msra.mxu1 %v1244_v5  ;;  %1177 = vmatprep.subr.bf16.mxu0 %v1245_v6  ;;  %v1248_v9 = vld [vmem:[%s1347_s21 + $0x30] sm:$0xff]   ;;  %v1249_v10 = vld [vmem:[%s236_s12 + $0x8] sm:$0xff]   ;;  %s248_s27 = scalar_lea.vmem %s1529_s5, %s1074_s9 }
  0x11   : > { %1179 = vmatprep.mubr.msk.bf16.mxu0 %vm304_vm0, %v1247_v7  ;;  %1226 = vmatprep.subr.bf16.mxu1 %v1246_v8  ;;  %v1250_v11 = vld [vmem:[%s1347_s21 + $0x38] sm:$0xff]   ;;  %v1251_v12 = vld [vmem:[%s1347_s21 + $0x40] sm:$0xff]   ;;  %v1252_v14 = vld [vmem:[%s1347_s21 + $0x48] sm:$0xff]  }
  0x12   : > { %1203 = vmatprep.mubr.msk.bf16.mxu1 %vm304_vm0, %v1248_v9  ;;  %v1253_v13 = vld [vmem:[%s1347_s21] sm:$0xff]   ;;  %v1254_v15 = vld [vmem:[%s1347_s21 + $0x50] sm:$0xff]   ;;  %v1255_v16 = vld [vmem:[%s1347_s21 + $0x8] sm:$0xff]  }
  0x13   : > { %1178 = vmatpush3.bf16.msra.mxu0 %v1245_v6  ;;  %v1256_v17 = vld [vmem:[%s1347_s21 + $0x58] sm:$0xff]   ;;  %v1257_v18 = vld [vmem:[%s1347_s21 + $0x10] sm:$0xff]   ;;  %v1258_v19 = vld [vmem:[%s1347_s21 + $0x60] sm:$0xff]  }
  0x14   : > { %1230 = vmatpush3.bf16.msra.mxu1 %v1246_v8  ;;  %1183 = vmatprep.subr.bf16.mxu0 %v1240_v1  ;;  %v1259_v20 = vld [vmem:[%s1347_s21 + $0x18] sm:$0xff]   ;;  %v1260_v21 = vld [vmem:[%s1347_s21 + $0x68] sm:$0xff]   ;;  %v1261_v22 = vld [vmem:[%s1347_s21 + $0x20] sm:$0xff]  }
  0x15   : > { %v1262_v23 = vld [vmem:[%s1347_s21 + $0x70] sm:$0xff]   ;;  %v1263_v24 = vld [vmem:[%s1347_s21 + $0x28] sm:$0xff]   ;;  %v1264_v25 = vld [vmem:[%s1347_s21 + $0x78] sm:$0xff]  }
  0x16   : > { %1180 = vmatmul.mubr.msk.bf16.vlgmr.msra.gmra.mrb[0].mxu0 %vm304_vm0, %v1249_v10 }
  0x17   : > { %1204 = vmatmul.mubr.msk.bf16.vlgmr.msra.gmra.mrb[0].mxu1 %vm304_vm0, %v1250_v11  ;;  %1184 = vmatpush3.bf16.msra.mxu0 %v1240_v1 }
  0x18   : > { %1185 = vmatprep.subr.bf16.mxu0 %v1242_v3  ;;  %1207 = vmatprep.mubr.msk.bf16.mxu1 %vm304_vm0, %v1251_v12 }
  0x19   : > { %1191 = vmatprep.mubr.msk.bf16.mxu0 %vm304_vm0, %v1253_v13 }
  0x1b   : > { %1186 = vmatpush3.bf16.msra.mxu0 %v1242_v3 }
  0x1c   : > { %1187 = vmatprep.subr.bf16.mxu0 %v1244_v5 }
  0x1f   : > { %1208 = vmatmul.mubr.msk.bf16.gmra.mrb[4].mxu1 %vm304_vm0, %v1252_v14  ;;  %1188 = vmatpush3.bf16.msra.mxu0 %v1244_v5 }
  0x20   : > { %1189 = vmatprep.subr.bf16.mxu0 %v1246_v8  ;;  %1211 = vmatprep.mubr.msk.bf16.mxu1 %vm304_vm0, %v1254_v15 }
  0x23   : > { %1190 = vmatpush3.bf16.msra.mxu0 %v1246_v8 }
  0x26   : > { %1192 = vmatmul.mubr.msk.bf16.vlgmr.msra.gmra.mrb[4].mxu0 %vm304_vm0, %v1255_v16 }
  0x27   : > { %1212 = vmatmul.mubr.msk.bf16.gmra.mrb[8].mxu1 %vm304_vm0, %v1256_v17  ;;  %1195 = vmatprep.mubr.msk.bf16.mxu0 %vm304_vm0, %v1257_v18 }
  0x28   : > { %1215 = vmatprep.mubr.msk.bf16.mxu1 %vm304_vm0, %v1258_v19 }
  0x2e   : > { %1196 = vmatmul.mubr.msk.bf16.gmra.mrb[8].mxu0 %vm304_vm0, %v1259_v20 }
  0x2f   : > { %1216 = vmatmul.mubr.msk.bf16.gmra.mrb[12].mxu1 %vm304_vm0, %v1260_v21  ;;  %1199 = vmatprep.mubr.msk.bf16.mxu0 %vm304_vm0, %v1261_v22 }
  0x30   : > { %1219 = vmatprep.mubr.msk.bf16.mxu1 %vm304_vm0, %v1262_v23 }
  0x36   : > { %1200 = vmatmul.mubr.msk.bf16.gmra.mrb[12].mxu0 %vm304_vm0, %v1263_v24 }
  0x37   : > { %1220 = vmatmul.mubr.msk.bf16.gmra.mrb[16].mxu1 %vm304_vm0, %v1264_v25 }
  0xe9   : > { %v1181_v26 = vpop.f32.mrb[0].mxu0 }
  0xea   : > { %v1382_v27 = vpop.f32.mrb[0].mxu1  ;;  %v1384_v28 = vpop.f32.mrb[1].mxu0  ;;  %v1402_v11 = vadd.f32 %v1181_v26, %v1399_v51 }
  0xeb   : > { %v1386_v29 = vpop.f32.mrb[1].mxu1  ;;  %v1388_v30 = vpop.f32.mrb[2].mxu0 }
  0xec   : > { %v1390_v31 = vpop.f32.mrb[2].mxu1  ;;  %v1392_v32 = vpop.f32.mrb[3].mxu0 }
  0xed   : > { %v1394_v33 = vpop.f32.mrb[3].mxu1 }
  0xf2   : > { %v1209_v34 = vpop.f32.mrb[4].mxu1 }
  0xf3   : > { %v821_v35 = vrot.slane %v1209_v34, 4  ;;  %v650_v36 = vpop.f32.mrb[5].mxu1 }
  0xf4   : > { %v809_v37 = vrot.slane %v650_v36, 4  ;;  %v1210_v38 = vpop.f32.mrb[6].mxu1 }
  0xf5   : > { %v822_v39 = vmax.f32 %v1209_v34, %v821_v35  ;;  %v827_v40 = vrot.slane %v1210_v38, 4  ;;  %v653_v41 = vpop.f32.mrb[7].mxu1 }
  0xf6   : > { %v810_v42 = vmax.f32 %v650_v36, %v809_v37  ;;  %v815_v43 = vrot.slane %v653_v41, 4  ;;  %v797_v37 = vrot.slane %v1382_v27, 4 }
  0xf7   : > { %v823_v44 = vrot.slane %v822_v39, 2  ;;  %v828_v45 = vmax.f32 %v1210_v38, %v827_v40  ;;  %v1408_v38 = vadd.f32 %v1399_v51, %v1384_v28 }
  0xf8   : > { %v811_v46 = vrot.slane %v810_v42, 2  ;;  %v816_v47 = vmax.f32 %v653_v41, %v815_v43  ;;  %v785_v43 = vrot.slane %v1386_v29, 4 }
  0xf9   : > { %v824_v48 = vmax.f32 %v822_v39, %v823_v44  ;;  %v829_v49 = vrot.slane %v828_v45, 2  ;;  %v1193_v50 = vpop.f32.mrb[4].mxu0 }
  0xfa   : > { %v812_v52 = vmax.f32 %v810_v42, %v811_v46  ;;  %v817_v53 = vrot.slane %v816_v47, 2  ;;  %v725_v54 = vrot.slane %v1193_v50, 4  ;;  %v1213_v55 = vpop.f32.mrb[8].mxu1  ;;  %v586_v56 = vpop.f32.mrb[5].mxu0 }
  0xfb   : > { %v825_v57 = vrot.slane %v824_v48, 1  ;;  %v830_v58 = vmax.f32 %v828_v45, %v829_v49  ;;  %v845_v59 = vrot.slane %v1213_v55, 4  ;;  %v713_v60 = vrot.slane %v586_v56, 4  ;;  %v666_v61 = vpop.f32.mrb[9].mxu1  ;;  %v1194_v62 = vpop.f32.mrb[6].mxu0 }
  0xfc   : > { %v813_v63 = vrot.slane %v812_v52, 1  ;;  %v818_v0 = vmax.f32 %v816_v47, %v817_v53  ;;  %v833_v1 = vrot.slane %v666_v61, 4  ;;  %v1214_v2 = vpop.f32.mrb[10].mxu1  ;;  %v589_v3 = vpop.f32.mrb[7].mxu0  ;;  %v726_v5 = vmax.f32 %v1193_v50, %v725_v54 }
  0xfd   : > { %v831_v4 = vrot.slane %v830_v58, 1  ;;  %v714_v6 = vmax.f32 %v586_v56, %v713_v60  ;;  %v669_v7 = vpop.f32.mrb[11].mxu1  ;;  %v846_v9 = vmax.f32 %v1213_v55, %v845_v59  ;;  %v826_v12 = vmax.f32 %v824_v48, %v825_v57 }
  0xfe   : > { %v819_v8 = vrot.slane %v818_v0, 1  ;;  %v834_v10 = vmax.f32 %v666_v61, %v833_v1  ;;  %v814_v13 = vmax.f32 %v812_v52, %v813_v63  ;;  %v731_v14 = vrot.slane %v1194_v62, 4 }
  0xff   : > { %v715_v16 = vrot.slane %v714_v6, 2  ;;  %v851_v18 = vrot.slane %v1214_v2, 4  ;;  %v832_v19 = vmax.f32 %v830_v58, %v831_v4  ;;  %v727_v20 = vrot.slane %v726_v5, 2 }
 0x100   : > { %v820_v15 = vmax.f32 %v818_v0, %v819_v8  ;;  %v835_v17 = vrot.slane %v834_v10, 2  ;;  %v732_v21 = vmax.f32 %v1194_v62, %v731_v14  ;;  %v719_v22 = vrot.slane %v589_v3, 4 }
 0x101   : > { %v1197_v23 = vpop.f32.mrb[8].mxu0  ;;  %v847_v25 = vrot.slane %v846_v9, 2  ;;  %v852_v35 = vmax.f32 %v1214_v2, %v851_v18  ;;  %v716_v44 = vmax.f32 %v714_v6, %v715_v16  ;;  %v803_v49 = vrot.slane %v1390_v31, 4 }
 0x102   : > { %v958_v24 = vsel %vm937_vm1, %v820_v15, %v814_v13  ;;  %v836_v34 = vmax.f32 %v834_v10, %v835_v17  ;;  %v1217_v36 = vpop.f32.mrb[12].mxu1  ;;  %v602_v26 = vpop.f32.mrb[9].mxu0  ;;  %v733_v40 = vrot.slane %v732_v21, 2  ;;  %v728_v50 = vmax.f32 %v726_v5, %v727_v20 }
 0x103   : > { %v959_v39 = vsel %vm939_vm2, %v826_v12, %v958_v24  ;;  %v682_v41 = vpop.f32.mrb[13].mxu1  ;;  %v1198_v42 = vpop.f32.mrb[10].mxu0  ;;  %v853_v52 = vrot.slane %v852_v35, 2  ;;  %v720_v28 = vmax.f32 %v589_v3, %v719_v22  ;;  %v848_v54 = vmax.f32 %v846_v9, %v847_v25 }
 0x104   : > { %v837_v45 = vrot.slane %v836_v34, 1  ;;  %v960_v46 = vsel %vm941_vm3, %v832_v19, %v959_v39  ;;  %v1218_v47 = vpop.f32.mrb[14].mxu1  ;;  %v1413_v48 = vpop.f32.mrb[11].mxu0  ;;  %v839_v56 = vrot.slane %v669_v7, 4  ;;  %v749_v57 = vrot.slane %v1197_v23, 4 }
 0x105   : > { %v1416_v53 = vpop.f32.mrb[15].mxu1  ;;  %v791_v58 = vrot.slane %v1394_v33, 4  ;;  %v734_v59 = vmax.f32 %v732_v21, %v733_v40  ;;  %v721_v60 = vrot.slane %v720_v28, 2  ;;  %v737_v61 = vrot.slane %v602_v26, 4 }
 0x106   : > { %v838_v55 = vmax.f32 %v836_v34, %v837_v45  ;;  %v717_v62 = vrot.slane %v716_v44, 1  ;;  %v840_v0 = vmax.f32 %v669_v7, %v839_v56  ;;  %v869_v1 = vrot.slane %v1217_v36, 4 }
 0x107   : > { %v729_v2 = vrot.slane %v728_v50, 1  ;;  %v854_v3 = vmax.f32 %v852_v35, %v853_v52  ;;  %v722_v4 = vmax.f32 %v720_v28, %v721_v60  ;;  %v738_v5 = vmax.f32 %v602_v26, %v737_v61 }
 0x108   : > { %v961_v63 = vsel %vm943_vm4, %v838_v55, %v960_v46  ;;  %v849_v8 = vrot.slane %v848_v54, 1  ;;  %v841_v9 = vrot.slane %v840_v0, 2  ;;  %v750_v10 = vmax.f32 %v1197_v23, %v749_v57 }
 0x109   : > { %v1420_v6 = vpop.f32.mrb[12].mxu0  ;;  %v857_v12 = vrot.slane %v682_v41, 4  ;;  %v735_v15 = vrot.slane %v734_v59, 1  ;;  %v723_v16 = vrot.slane %v722_v4, 1  ;;  %v739_v7 = vrot.slane %v738_v5, 2 }
 0x10a   : > { %v1422_v13 = vpop.f32.mrb[16].mxu1  ;;  %v1424_v14 = vpop.f32.mrb[13].mxu0  ;;  %v755_v17 = vrot.slane %v1198_v42, 4  ;;  %v718_v20 = vmax.f32 %v716_v44, %v717_v62  ;;  %v842_v21 = vmax.f32 %v840_v0, %v841_v9  ;;  %v870_v22 = vmax.f32 %v1217_v36, %v869_v1 }
 0x10b   : > { %v698_v18 = vpop.f32.mrb[17].mxu1  ;;  %v1426_v19 = vpop.f32.mrb[14].mxu0  ;;  %v875_v24 = vrot.slane %v1218_v47, 4  ;;  %v855_v23 = vrot.slane %v854_v3, 1  ;;  %v724_v35 = vmax.f32 %v722_v4, %v723_v16  ;;  %v740_v26 = vmax.f32 %v738_v5, %v739_v7 }
 0x10c   : > { %v1428_v25 = vpop.f32.mrb[18].mxu1  ;;  %v1430_v34 = vpop.f32.mrb[15].mxu0  ;;  %v858_v39 = vmax.f32 %v682_v41, %v857_v12  ;;  %v730_v45 = vmax.f32 %v728_v50, %v729_v2  ;;  %v843_v46 = vrot.slane %v842_v21, 1  ;;  %v751_v52 = vrot.slane %v750_v10, 2 }
 0x10d   : > { %v1432_v40 = vpop.f32.mrb[19].mxu1  ;;  %v756_v28 = vmax.f32 %v1198_v42, %v755_v17  ;;  %v736_v55 = vmax.f32 %v734_v59, %v735_v15  ;;  %v938_v44 = vsel %vm937_vm1, %v724_v35, %v718_v20  ;;  %v741_v56 = vrot.slane %v740_v26, 1 }
 0x10e   : > { %v876_v36 = vmax.f32 %v1218_v47, %v875_v24  ;;  %v850_v57 = vmax.f32 %v848_v54, %v849_v8  ;;  %v940_v60 = vsel %vm939_vm2, %v730_v45, %v938_v44  ;;  %v844_v61 = vmax.f32 %v842_v21, %v843_v46 }
 0x10f   : > { %v871_v62 = vrot.slane %v870_v22, 2  ;;  %v856_v0 = vmax.f32 %v854_v3, %v855_v23  ;;  %v742_v1 = vmax.f32 %v740_v26, %v741_v56  ;;  %v942_v41 = vsel %vm941_vm3, %v736_v55, %v940_v60 }
 0x110   : > { %v859_v4 = vrot.slane %v858_v39, 2  ;;  %v962_v50 = vsel %vm945_vm5, %v844_v61, %v961_v63  ;;  %v752_v2 = vmax.f32 %v750_v10, %v751_v52  ;;  %v757_v5 = vrot.slane %v756_v28, 2 }
 0x111   : > { %v743_v42 = vrot.slane %v1413_v48, 4  ;;  %v963_v59 = vsel %vm947_vm6, %v850_v57, %v962_v50  ;;  %v944_v47 = vsel %vm943_vm4, %v742_v1, %v942_v41  ;;  %v877_v54 = vrot.slane %v876_v36, 2 }
 0x112   : > { %v863_v8 = vrot.slane %v1416_v53, 4  ;;  %v1445_v3 = vmax.f32 %v1382_v27, %v797_v37  ;;  %v964_v9 = vsel %vm949_vm7, %v856_v0, %v963_v59  ;;  %v872_v12 = vmax.f32 %v870_v22, %v871_v62 }
 0x113   : > { %v744_v63 = vmax.f32 %v1413_v48, %v743_v42  ;;  %v1452_v10 = vmax.f32 %v1386_v29, %v785_v43  ;;  %v1455_v15 = vadd.f32 %v964_v9, %v1402_v11  ;;  %v860_v16 = vmax.f32 %v858_v39, %v859_v4 }
 0x114   : > { %v864_v7 = vmax.f32 %v1416_v53, %v863_v8  ;;  %v1461_v27 = vmax.f32 %v1390_v31, %v803_v49  ;;  %v1466_v37 = vmax.f32 %v1394_v33, %v791_v58  ;;  %v758_v48 = vmax.f32 %v756_v28, %v757_v5 }
 0x115   : > { %v745_v17 = vrot.slane %v744_v63, 2  ;;  %v753_v29 = vrot.slane %v752_v2, 1  ;;  %v878_v43 = vmax.f32 %v876_v36, %v877_v54  ;;  %v881_v11 = vrot.slane %v698_v18, 4 }
 0x116   : > { %v865_v20 = vrot.slane %v864_v7, 2  ;;  %v873_v21 = vrot.slane %v872_v12, 1  ;;  %v773_v53 = vrot.slane %v1420_v6, 4  ;;  %v761_v24 = vrot.slane %v1424_v14, 4 }
 0x117   : > { %v746_v22 = vmax.f32 %v744_v63, %v745_v17  ;;  %v861_v23 = vrot.slane %v860_v16, 1  ;;  %v893_v49 = vrot.slane %v1422_v13, 4  ;;  %v882_v35 = vmax.f32 %v698_v18, %v881_v11 }
 0x118   : > { %v866_v31 = vmax.f32 %v864_v7, %v865_v20  ;;  %v759_v26 = vrot.slane %v758_v48, 1  ;;  %v779_v58 = vrot.slane %v1426_v19, 4  ;;  %v899_v39 = vrot.slane %v1428_v25, 4 }
 0x119   : > { %v747_v33 = vrot.slane %v746_v22, 1  ;;  %v754_v45 = vmax.f32 %v752_v2, %v753_v29  ;;  %v879_v46 = vrot.slane %v878_v43, 1  ;;  %v883_v28 = vrot.slane %v882_v35, 2 }
 0x11a   : > { %v867_v52 = vrot.slane %v866_v31, 1  ;;  %v874_v55 = vmax.f32 %v872_v12, %v873_v21  ;;  %v774_v56 = vmax.f32 %v1420_v6, %v773_v53  ;;  %v762_v36 = vmax.f32 %v1424_v14, %v761_v24 }
 0x11b   : > { %v748_v44 = vmax.f32 %v746_v22, %v747_v33  ;;  %v862_v57 = vmax.f32 %v860_v16, %v861_v23  ;;  %v894_v18 = vmax.f32 %v1422_v13, %v893_v49  ;;  %v884_v61 = vmax.f32 %v882_v35, %v883_v28 }
 0x11c   : > { %v868_v60 = vmax.f32 %v866_v31, %v867_v52  ;;  %v760_v62 = vmax.f32 %v758_v48, %v759_v26  ;;  %v780_v1 = vmax.f32 %v1426_v19, %v779_v58  ;;  %v900_v41 = vmax.f32 %v1428_v25, %v899_v39 }
 0x11d   : > { %v946_v0 = vsel %vm945_vm5, %v748_v44, %v944_v47  ;;  %v880_v4 = vmax.f32 %v878_v43, %v879_v46  ;;  %v885_v6 = vrot.slane %v884_v61, 1  ;;  %v775_v42 = vrot.slane %v774_v56, 2 }
 0x11e   : > { %v948_v50 = vsel %vm947_vm6, %v754_v45, %v946_v0  ;;  %v965_v2 = vsel %vm937_vm1, %v868_v60, %v862_v57  ;;  %v763_v13 = vrot.slane %v762_v36, 2  ;;  %v895_v47 = vrot.slane %v894_v18, 2 }
 0x11f   : > { %v950_v14 = vsel %vm949_vm7, %v760_v62, %v948_v50  ;;  %v966_v5 = vsel %vm939_vm2, %v874_v55, %v965_v2  ;;  %v886_v54 = vmax.f32 %v884_v61, %v885_v6  ;;  %v781_v25 = vrot.slane %v780_v1, 2 }
 0x120   : > { %v1484_v59 = vadd.f32 %v950_v14, %v1408_v38  ;;  %v967_v19 = vsel %vm941_vm3, %v880_v4, %v966_v5  ;;  %v901_v8 = vrot.slane %v900_v41, 2  ;;  %v767_v9 = vrot.slane %v1430_v34, 4 }
 0x121   : > { %v887_v12 = vrot.slane %v1432_v40, 4  ;;  %v787_v63 = vrot.slane %v1452_v10, 2  ;;  %v968_v16 = vsel %vm943_vm4, %v886_v54, %v967_v19  ;;  %v793_v7 = vrot.slane %v1466_v37, 2 }
 0x122   : > { %v764_v48 = vmax.f32 %v762_v36, %v763_v13  ;;  %v768_v38 = vmax.f32 %v1430_v34, %v767_v9  ;;  %v799_v29 = vrot.slane %v1445_v3, 2  ;;  %v805_v43 = vrot.slane %v1461_v27, 2 }
 0x123   : > { %v888_v17 = vmax.f32 %v1432_v40, %v887_v12  ;;  %v776_v20 = vmax.f32 %v774_v56, %v775_v42  ;;  %v896_v11 = vmax.f32 %v894_v18, %v895_v47  ;;  %v782_v21 = vmax.f32 %v780_v1, %v781_v25 }
 0x124   : > { %v902_v22 = vmax.f32 %v900_v41, %v901_v8  ;;  %v769_v53 = vrot.slane %v768_v38, 2  ;;  %v788_v23 = vmax.f32 %v1452_v10, %v787_v63  ;;  %v794_v31 = vmax.f32 %v1466_v37, %v793_v7 }
 0x125   : > { %v889_v24 = vrot.slane %v888_v17, 2  ;;  %v765_v49 = vrot.slane %v764_v48, 1  ;;  %v800_v34 = vmax.f32 %v1445_v3, %v799_v29  ;;  %v806_v40 = vmax.f32 %v1461_v27, %v805_v43 }
 0x126   : > { %v770_v35 = vmax.f32 %v768_v38, %v769_v53  ;;  %v777_v33 = vrot.slane %v776_v20, 1  ;;  %v897_v58 = vrot.slane %v896_v11, 1  ;;  %v783_v39 = vrot.slane %v782_v21, 1 }
 0x127   : > { %v890_v26 = vmax.f32 %v888_v17, %v889_v24  ;;  %v903_v45 = vrot.slane %v902_v22, 1  ;;  %v789_v28 = vrot.slane %v788_v23, 1  ;;  %v795_v55 = vrot.slane %v794_v31, 1 }
 0x128   : > { %v771_v46 = vrot.slane %v770_v35, 1  ;;  %v766_v44 = vmax.f32 %v764_v48, %v765_v49  ;;  %v801_v36 = vrot.slane %v800_v34, 1  ;;  %v807_v37 = vrot.slane %v806_v40, 1 }
 0x129   : > { %v891_v52 = vrot.slane %v890_v26, 1  ;;  %v778_v57 = vmax.f32 %v776_v20, %v777_v33  ;;  %v898_v60 = vmax.f32 %v896_v11, %v897_v58  ;;  %v784_v18 = vmax.f32 %v782_v21, %v783_v39 }
 0x12a   : > { %v772_v56 = vmax.f32 %v770_v35, %v771_v46  ;;  %v904_v61 = vmax.f32 %v902_v22, %v903_v45  ;;  %v790_v62 = vmax.f32 %v788_v23, %v789_v28  ;;  %v357_v0 = vadd.f32 %v1388_v30, %v1399_v51 }
 0x12b   : > { %v892_v10 = vmax.f32 %v890_v26, %v891_v52  ;;  %v796_v4 = vmax.f32 %v794_v31, %v795_v55  ;;  %v802_v6 = vmax.f32 %v800_v34, %v801_v36  ;;  %v808_v42 = vmax.f32 %v806_v40, %v807_v37 }
 0x12c   : > { %v951_v3 = vsel %vm937_vm1, %v772_v56, %v766_v44  ;;  %v349_v30 = vadd.f32 %v1399_v51, %v1392_v32 }
 0x12d   : > { %v969_v27 = vsel %vm945_vm5, %v892_v10, %v968_v16  ;;  %v952_v1 = vsel %vm939_vm2, %v778_v57, %v951_v3 }
 0x12e   : > { %v970_v41 = vsel %vm947_vm6, %v898_v60, %v969_v27  ;;  %v953_v50 = vsel %vm941_vm3, %v784_v18, %v952_v1 }
 0x12f   : > { %v971_v2 = vsel %vm949_vm7, %v904_v61, %v970_v41  ;;  %v954_v14 = vsel %vm943_vm4, %v790_v62, %v953_v50 }
 0x130   : > { %v979_v5 = vadd.f32 %v971_v2, %v357_v0  ;;  %v955_v13 = vsel %vm945_vm5, %v796_v4, %v954_v14 }
 0x131   : > { %v956_v47 = vsel %vm947_vm6, %v802_v6, %v955_v13 }
 0x132   : > { %v1142_v54 = vpack.c.bf16 %v979_v5, %v1455_v15  ;;  %v957_v19 = vsel %vm949_vm7, %v808_v42, %v956_v47 }
 0x133   : > { %v977_v25 = vadd.f32 %v957_v19, %v349_v30 }
 0x134   : > { %1144 = vst [vmem:[%s248_s27 + $0x8] sm:$0xff] %v1142_v54  }
 0x135   : > { %v1137_v8 = vpack.c.bf16 %v977_v25, %v1484_v59 }
 0x137   : > { %1138 = vst [vmem:[%s248_s27] sm:$0xff] %v1137_v8  }
 0x138 PF: > { %s15_s18 = sadd.s32 1, %s1271_s18  }
 0x139   : > { %p12_p5 = scmp.ge.s32.totalorder %s15_s18, 4  }
 0x13b   :  { %14 = sbr.rel (!%p12_p5) target bundleno = 1 (0x1), region = 73 }

// kernel: dyedcnn_forward.9
= control target key start
LH: loop header
LB: loop body
LE: loop exit
PB: predicated region body
PF: predicated region fallthrough
CT: control target
= control target key end

     0   :  { %v1174_v2 = vmov 0   ;;  %s1608_s0 = inlined_call_operand.vmem [shape: bf16[64,64], index: 0, kind: input, shape index: {}]   ;;  %s1609_s1 = inlined_call_operand.vmem [shape: bf16[64,128], index: 1, kind: input, shape index: {}]   ;;  %s1610_s2 = inlined_call_operand.vmem [shape: bf16[64,256], index: 2, kind: input, shape index: {}]   ;;  %s1611_s3 = inlined_call_operand.vmem [shape: bf16[128,256], index: 3, kind: input, shape index: {}]   ;;  %s1612_s4 = inlined_call_operand.vmem [shape: f32[1,256], index: 4, kind: input, shape index: {}]   ;;  %s1613_s5 = inlined_call_operand.vmem [shape: f32[256,128], index: 5, kind: input, shape index: {}]   ;;  %s1614_s6 = inlined_call_operand.vmem [shape: f32[1,128], index: 6, kind: input, shape index: {}]   ;;  %s1615_s7 = inlined_call_operand.vmem [shape: f32[1,128], index: 7, kind: input, shape index: {}]   ;;  %s1616_s8 = inlined_call_operand.vmem [shape: f32[1,128], index: 8, kind: input, shape index: {}]   ;;  %s1617_s9 = inlined_call_operand.vmem [shape: f32[128,64], index: 9, kind: input, shape index: {}]   ;;  %s1618_s10 = inlined_call_operand.vmem [shape: f32[1,64], index: 10, kind: input, shape index: {}]   ;;  %s1619_s11 = inlined_call_operand.vmem [shape: f32[1,64], index: 11, kind: input, shape index: {}]   ;;  %s1620_s12 = inlined_call_operand.vmem [shape: f32[1,64], index: 12, kind: input, shape index: {}]   ;;  %s1621_s13 = inlined_call_operand.vmem [shape: f32[64,4], index: 13, kind: input, shape index: {}]   ;;  %s1622_s14 = inlined_call_operand.vmem [shape: f32[1,4], index: 14, kind: input, shape index: {}]   ;;  %s1623_s15 = inlined_call_operand.hbm [shape: f32[4,4], index: 15, kind: output, shape index: {}]  }
   0x1   :  { %v1106_v0 = vld [vmem:[%s1611_s3 + $0x4] ss:$8 sps:$4 sm:$0xff]   ;;  %v1108_v1 = vld [vmem:[%s1611_s3] ss:$8 sps:$4 sm:$0xff]   ;;  %228 = vmatprep.mubr.bf16.mxu0 %v1174_v2  ;;  %v1109_v3 = vld [vmem:[%s1611_s3 + $0x14] ss:$8 sps:$4 sm:$0xff]  }
   0x2   :  { %196 = vmatprep.subr.bf16.mxu0 %v1106_v0  ;;  %v1111_v4 = vld [vmem:[%s1611_s3 + $0x10] ss:$8 sps:$4 sm:$0xff]   ;;  %v1112_v5 = vld [vmem:[%s1611_s3 + $0x24] ss:$8 sps:$4 sm:$0xff]   ;;  %v1114_v6 = vld [vmem:[%s1611_s3 + $0x20] ss:$8 sps:$4 sm:$0xff]  }
   0x3   :  { %197 = vmatpush1.bf16.msra.mxu0 %v1108_v1  ;;  %v1115_v7 = vld [vmem:[%s1611_s3 + $0x34] ss:$8 sps:$4 sm:$0xff]   ;;  %v1117_v8 = vld [vmem:[%s1611_s3 + $0x30] ss:$8 sps:$4 sm:$0xff]   ;;  %v1118_v9 = vld [vmem:[%s1611_s3 + $0x44] ss:$8 sps:$4 sm:$0xff]  }
   0x4   :  { %198 = vmatprep.subr.bf16.mxu0 %v1109_v3  ;;  %v1120_v10 = vld [vmem:[%s1611_s3 + $0x40] ss:$8 sps:$4 sm:$0xff]   ;;  %v1121_v11 = vld [vmem:[%s1611_s3 + $0x54] ss:$8 sps:$4 sm:$0xff]   ;;  %v1123_v12 = vld [vmem:[%s1611_s3 + $0x50] ss:$8 sps:$4 sm:$0xff]  }
   0x5   :  { %v1124_v13 = vld [vmem:[%s1611_s3 + $0x64] ss:$8 sps:$4 sm:$0xff]   ;;  %v1126_v14 = vld [vmem:[%s1611_s3 + $0x60] ss:$8 sps:$4 sm:$0xff]   ;;  %v1127_v15 = vld [vmem:[%s1611_s3 + $0x74] ss:$8 sps:$4 sm:$0xff]  }
   0x7   :  { %199 = vmatpush1.bf16.msra.mxu0 %v1111_v4 }
   0x8   :  { %200 = vmatprep.subr.bf16.mxu0 %v1112_v5 }
   0xb   :  { %201 = vmatpush1.bf16.msra.mxu0 %v1114_v6 }
   0xc   :  { %202 = vmatprep.subr.bf16.mxu0 %v1115_v7 }
   0xf   :  { %203 = vmatpush1.bf16.msra.mxu0 %v1117_v8 }
  0x10   :  { %204 = vmatprep.subr.bf16.mxu0 %v1118_v9 }
  0x13   :  { %205 = vmatpush1.bf16.msra.mxu0 %v1120_v10 }
  0x14   :  { %206 = vmatprep.subr.bf16.mxu0 %v1121_v11 }
  0x17   :  { %207 = vmatpush1.bf16.msra.mxu0 %v1123_v12 }
  0x18   :  { %208 = vmatprep.subr.bf16.mxu0 %v1124_v13 }
  0x19   :  { %20 = vsyncpa [#allocation3], 0  ;;  %v1129_v16 = vld [vmem:[%s1611_s3 + $0x70] ss:$8 sps:$4 sm:$0xff]   ;;  %v1133_v17 = vld [vmem:[%s1610_s2 + $0x4] ss:$8 sps:$4 sm:$0xff]  }
  0x1a   :  { %v1130_v18 = vld [vmem:[%s1609_s1] sm:$0xff]   ;;  %v1137_v20 = vld [vmem:[%s1610_s2 + $0x14] ss:$8 sps:$4 sm:$0xff]   ;;  %v1135_v21 = vld [vmem:[%s1610_s2 + $0x10] ss:$8 sps:$4 sm:$0xff]   ;;  %vm329_vm0 = vcmask 523264  }
  0x1b   :  { %209 = vmatpush1.bf16.msra.mxu0 %v1126_v14  ;;  %v1131_v19 = vld [vmem:[%s1610_s2] ss:$8 sps:$4 sm:$0xff]   ;;  %v1141_v22 = vld [vmem:[%s1610_s2 + $0x24] ss:$8 sps:$4 sm:$0xff]   ;;  %v1145_v25 = vld [vmem:[%s1610_s2 + $0x34] ss:$8 sps:$4 sm:$0xff]  }
  0x1c   :  { %210 = vmatprep.subr.bf16.mxu0 %v1127_v15  ;;  %v1134_v23 = vld [vmem:[%s1609_s1 + $0x8] sm:$0xff]   ;;  %v1143_v26 = vld [vmem:[%s1610_s2 + $0x30] ss:$8 sps:$4 sm:$0xff]   ;;  %v1146_v29 = vld [vmem:[%s1608_s0] sm:$0xff]   ;;  %vm546_vm1 = vcmask 1041409   ;;  %vm548_vm2 = vcmask 1042434  }
  0x1d   :  { %v1139_v24 = vld [vmem:[%s1610_s2 + $0x20] ss:$8 sps:$4 sm:$0xff]   ;;  %v1138_v27 = vld [vmem:[%s1609_s1 + $0x10] sm:$0xff]   ;;  %v1142_v28 = vld [vmem:[%s1609_s1 + $0x18] sm:$0xff]   ;;  %vm550_vm3 = vcmask 1043459   ;;  %vm1176_vm4 = vmmov 0  }
  0x1e   :  { %v1147_v30 = vld [vmem:[%s1608_s0 + $0x8] sm:$0xff]   ;;  %v1148_v31 = vld [vmem:[%s1608_s0 + $0x10] sm:$0xff]   ;;  %v1149_v32 = vld [vmem:[%s1608_s0 + $0x18] sm:$0xff]   ;;  %vm842_vm5 = vcmask 27648  }
  0x1f   :  { %211 = vmatpush1.bf16.msra.mxu0 %v1129_v16  ;;  %v515_v33 = vld [vmem:[%s1613_s5 + $0x80] sm:$0xff]  ;;  %v516_v34 = vld [vmem:[%s1613_s5 + $0x88] sm:$0xff]  ;;  %v517_v39 = vld [vmem:[%s1613_s5 + $0x90] sm:$0xff] }
  0x20   :  { %342 = vmatprep.subr.bf16.mxu0 %v1133_v17  ;;  %v1017_v35 = vpack.c.bf16 %v516_v34, %v515_v33  ;;  %v499_v36 = vld [vmem:[%s1613_s5] sm:$0xff]  ;;  %v500_v37 = vld [vmem:[%s1613_s5 + $0x8] sm:$0xff]  ;;  %v518_v40 = vld [vmem:[%s1613_s5 + $0x98] sm:$0xff]  ;;  %v1175_v17 = vmov 0.0|0.0  }
  0x21   :  { %v1019_v38 = vpack.c.bf16 %v500_v37, %v499_v36  ;;  %v1021_v41 = vpack.c.bf16 %v518_v40, %v517_v39  ;;  %v501_v42 = vld [vmem:[%s1613_s5 + $0x10] sm:$0xff]  ;;  %v502_v43 = vld [vmem:[%s1613_s5 + $0x18] sm:$0xff]  ;;  %v519_v45 = vld [vmem:[%s1613_s5 + $0xa0] sm:$0xff] }
  0x22   :  { %229 = vmatmul.mubr.bf16.vlgmr.msra.gmra.mrb[0].mxu0 %v1130_v18  ;;  %1018 = vmatprep.subr.bf16.mxu1 %v1017_v35  ;;  %v1023_v44 = vpack.c.bf16 %v502_v43, %v501_v42  ;;  %v520_v46 = vld [vmem:[%s1613_s5 + $0xa8] sm:$0xff]  ;;  %v503_v48 = vld [vmem:[%s1613_s5 + $0x20] sm:$0xff]  ;;  %v521_v51 = vld [vmem:[%s1613_s5 + $0xb0] sm:$0xff]  ;;  %v417_v18 = vlaneseq }
  0x23   :  { %343 = vmatpush1.bf16.msra.mxu0 %v1131_v19  ;;  %238 = vmatprep.mubr.bf16.mxu0 %v1174_v2  ;;  %v1025_v47 = vpack.c.bf16 %v520_v46, %v519_v45  ;;  %v504_v49 = vld [vmem:[%s1613_s5 + $0x28] sm:$0xff]  ;;  %v522_v52 = vld [vmem:[%s1613_s5 + $0xb8] sm:$0xff]  ;;  %v505_v54 = vld [vmem:[%s1613_s5 + $0x30] sm:$0xff] }
  0x24   :  { %344 = vmatprep.subr.bf16.mxu0 %v1137_v20  ;;  %1020 = vmatpush3.bf16.msra.mxu1 %v1019_v38  ;;  %v1027_v50 = vpack.c.bf16 %v504_v49, %v503_v48  ;;  %v1029_v53 = vpack.c.bf16 %v522_v52, %v521_v51  ;;  %v506_v55 = vld [vmem:[%s1613_s5 + $0x38] sm:$0xff]  ;;  %v523_v57 = vld [vmem:[%s1613_s5 + $0xc0] sm:$0xff]  ;;  %v524_v58 = vld [vmem:[%s1613_s5 + $0xc8] sm:$0xff]  ;;  %v418_v19 = vshrl.u32 %v417_v18, 7 }
  0x25   :  { %1022 = vmatprep.subr.bf16.mxu1 %v1021_v41  ;;  %v1031_v56 = vpack.c.bf16 %v506_v55, %v505_v54  ;;  %v1033_v59 = vpack.c.bf16 %v524_v58, %v523_v57  ;;  %v507_v60 = vld [vmem:[%s1613_s5 + $0x40] sm:$0xff]  ;;  %v508_v61 = vld [vmem:[%s1613_s5 + $0x48] sm:$0xff]  ;;  %v525_v63 = vld [vmem:[%s1613_s5 + $0xd0] sm:$0xff] }
  0x26   :  { %v1035_v62 = vpack.c.bf16 %v508_v61, %v507_v60  ;;  %v526_v0 = vld [vmem:[%s1613_s5 + $0xd8] sm:$0xff]  ;;  %v527_v5 = vld [vmem:[%s1613_s5 + $0xe0] sm:$0xff]  ;;  %v528_v6 = vld [vmem:[%s1613_s5 + $0xe8] sm:$0xff]  ;;  %v419_v20 = vsub.s32 0, %v418_v19 }
  0x27   :  { %345 = vmatpush1.bf16.msra.mxu0 %v1135_v21  ;;  %v1037_v1 = vpack.c.bf16 %v526_v0, %v525_v63  ;;  %v510_v3 = vld [vmem:[%s1613_s5 + $0x58] sm:$0xff]  ;;  %v1041_v7 = vpack.c.bf16 %v528_v6, %v527_v5  ;;  %v511_v8 = vld [vmem:[%s1613_s5 + $0x60] sm:$0xff]  ;;  %v512_v9 = vld [vmem:[%s1613_s5 + $0x68] sm:$0xff] }
  0x28   :  { %346 = vmatprep.subr.bf16.mxu0 %v1141_v22  ;;  %1024 = vmatpush3.bf16.msra.mxu1 %v1023_v44  ;;  %v1043_v10 = vpack.c.bf16 %v512_v9, %v511_v8  ;;  %v529_v11 = vld [vmem:[%s1613_s5 + $0xf0] sm:$0xff]  ;;  %v530_v12 = vld [vmem:[%s1613_s5 + $0xf8] sm:$0xff]  ;;  %v415_v21 = vld [vmem:[%s1612_s4] sm:$0x3]  ;;  %v423_v22 = vsub.s32 1, %v418_v19 }
  0x29   :  { %1026 = vmatprep.subr.bf16.mxu1 %v1025_v47  ;;  %v513_v13 = vld [vmem:[%s1613_s5 + $0x70] sm:$0xff]  ;;  %v1045_v14 = vpack.c.bf16 %v530_v12, %v529_v11  ;;  %v514_v15 = vld [vmem:[%s1613_s5 + $0x78] sm:$0xff] }
  0x2a   :  { %239 = vmatmul.mubr.bf16.gmra.mrb[4].mxu0 %v1134_v23  ;;  %v1047_v16 = vpack.c.bf16 %v514_v15, %v513_v13  ;;  %v1467_v23 = vrot.slane %v415_v21, %v419_v20 }
  0x2b   :  { %248 = vmatprep.mubr.bf16.mxu0 %v1174_v2  ;;  %347 = vmatpush1.bf16.msra.mxu0 %v1139_v24 }
  0x2c   :  { %348 = vmatprep.subr.bf16.mxu0 %v1145_v25  ;;  %1028 = vmatpush3.bf16.msra.mxu1 %v1027_v50  ;;  %v1469_v25 = vrot.slane %v415_v21, %v423_v22 }
  0x2d   :  { %1030 = vmatprep.subr.bf16.mxu1 %v1029_v53 }
  0x2f   :  { %349 = vmatpush1.bf16.msra.mxu0 %v1143_v26 }
  0x30   :  { %1032 = vmatpush3.bf16.msra.mxu1 %v1031_v56 }
  0x31   :  { %1034 = vmatprep.subr.bf16.mxu1 %v1033_v59 }
  0x32   :  { %249 = vmatmul.mubr.bf16.gmra.mrb[8].mxu0 %v1138_v27 }
  0x33   :  { %258 = vmatprep.mubr.bf16.mxu0 %v1174_v2 }
  0x34   :  { %1036 = vmatpush3.bf16.msra.mxu1 %v1035_v62 }
  0x35   :  { %1038 = vmatprep.subr.bf16.mxu1 %v1037_v1 }
  0x3a   :  { %259 = vmatmul.mubr.bf16.gmra.mrb[12].mxu0 %v1142_v28 }
  0x3b   :  { %374 = vmatprep.mubr.bf16.mxu0 %v1174_v2 }
  0x42   :  { %890 = vmatmul.mubr.msk.bf16.vlgmr.msra.gmra.mrb[0].mxu0 %vm329_vm0, %v1146_v29 }
  0x43   :  { %384 = vmatprep.mubr.bf16.mxu0 %v1174_v2 }
  0x4a   :  { %891 = vmatmul.mubr.msk.bf16.gmra.mrb[4].mxu0 %vm329_vm0, %v1147_v30 }
  0x4b   :  { %394 = vmatprep.mubr.bf16.mxu0 %v1174_v2 }
  0x52   :  { %892 = vmatmul.mubr.msk.bf16.gmra.mrb[8].mxu0 %vm329_vm0, %v1148_v31 }
  0x53   :  { %404 = vmatprep.mubr.bf16.mxu0 %v1174_v2  ;;  %v509_v2 = vld [vmem:[%s1613_s5 + $0x50] sm:$0xff] }
  0x54   :  { %v1039_v4 = vpack.c.bf16 %v510_v3, %v509_v2 }
  0x56   :  { %1040 = vmatpush3.bf16.msra.mxu1 %v1039_v4 }
  0x57   :  { %1042 = vmatprep.subr.bf16.mxu1 %v1041_v7 }
  0x5a   :  { %893 = vmatmul.mubr.msk.bf16.gmra.mrb[12].mxu0 %vm329_vm0, %v1149_v32  ;;  %1044 = vmatpush3.bf16.msra.mxu1 %v1043_v10 }
  0x5b   :  { %1046 = vmatprep.subr.bf16.mxu1 %v1045_v14 }
  0x5e   :  { %1048 = vmatpush3.bf16.msra.mxu1 %v1047_v16 }
  0x5f   :  { %1049 = vmatprep.subr.bf16.mxu1 %v1175_v17 }
 0x115   :  { %v376_v24 = vpop.f32.mrb[0].mxu0 }
 0x116   :  { %v378_v26 = vpop.f32.mrb[1].mxu0  ;;  %v427_v28 = vadd.f32 %v1467_v23, %v376_v24 }
 0x117   :  { %v380_v27 = vpop.f32.mrb[2].mxu0  ;;  %v428_v31 = vadd.f32 %v1469_v25, %v378_v26 }
 0x118   :  { %v429_v29 = vadd.f32 %v1467_v23, %v380_v27  ;;  %v382_v30 = vpop.f32.mrb[3].mxu0 }
 0x119   :  { %v430_v32 = vadd.f32 %v1469_v25, %v382_v30 }
 0x11a   :  { %v443_v33 = vmax.f32 %v427_v28, %v429_v29 }
 0x11b   :  { %v450_v34 = vmax.f32 %v428_v31, %v430_v32 }
 0x11c   :  { %v444_v35 = vrot.slane %v443_v33, 4 }
 0x11d   :  { %v451_v36 = vrot.slane %v450_v34, 4  ;;  %v386_v37 = vpop.f32.mrb[4].mxu0 }
 0x11e   :  { %v445_v38 = vmax.f32 %v443_v33, %v444_v35  ;;  %v388_v39 = vpop.f32.mrb[5].mxu0  ;;  %v431_v42 = vadd.f32 %v1467_v23, %v386_v37 }
 0x11f   :  { %v452_v40 = vmax.f32 %v450_v34, %v451_v36  ;;  %v390_v41 = vpop.f32.mrb[6].mxu0  ;;  %v432_v45 = vadd.f32 %v1469_v25, %v388_v39 }
 0x120   :  { %v433_v43 = vadd.f32 %v1467_v23, %v390_v41  ;;  %v392_v44 = vpop.f32.mrb[7].mxu0  ;;  %v446_v47 = vrot.slane %v445_v38, 2 }
 0x121   :  { %v434_v46 = vadd.f32 %v1469_v25, %v392_v44  ;;  %v453_v49 = vrot.slane %v452_v40, 2 }
 0x122   :  { %v457_v48 = vmax.f32 %v431_v42, %v433_v43  ;;  %v447_v54 = vmax.f32 %v445_v38, %v446_v47 }
 0x123   :  { %v464_v50 = vmax.f32 %v432_v45, %v434_v46  ;;  %v454_v57 = vmax.f32 %v452_v40, %v453_v49 }
 0x124   :  { %v458_v51 = vrot.slane %v457_v48, 4  ;;  %v448_v3 = vrot.slane %v447_v54, 1 }
 0x125   :  { %v465_v52 = vrot.slane %v464_v50, 4  ;;  %v396_v53 = vpop.f32.mrb[8].mxu0  ;;  %v455_v6 = vrot.slane %v454_v57, 1 }
 0x126   :  { %v459_v55 = vmax.f32 %v457_v48, %v458_v51  ;;  %v398_v56 = vpop.f32.mrb[9].mxu0  ;;  %v435_v61 = vadd.f32 %v1467_v23, %v396_v53  ;;  %v449_v14 = vmax.f32 %v447_v54, %v448_v3  ;;  %v645_v53 = vld [vmem:[%s1617_s9 + $0x8] sm:$0xff] }
 0x127   :  { %v466_v58 = vmax.f32 %v464_v50, %v465_v52  ;;  %v400_v59 = vpop.f32.mrb[10].mxu0  ;;  %v436_v1 = vadd.f32 %v1469_v25, %v398_v56  ;;  %v456_v19 = vmax.f32 %v454_v57, %v455_v6  ;;  %v644_v52 = vld [vmem:[%s1617_s9] sm:$0xff] }
 0x128   :  { %v460_v60 = vrot.slane %v459_v55, 2  ;;  %v437_v62 = vadd.f32 %v1467_v23, %v400_v59  ;;  %v402_v63 = vpop.f32.mrb[11].mxu0  ;;  %v1050_v57 = vpack.c.bf16 %v645_v53, %v644_v52  ;;  %v646_v59 = vld [vmem:[%s1617_s9 + $0x10] sm:$0xff] }
 0x129   :  { %v467_v0 = vrot.slane %v466_v58, 2  ;;  %v438_v2 = vadd.f32 %v1469_v25, %v402_v63  ;;  %v649_v63 = vld [vmem:[%s1617_s9 + $0x28] sm:$0xff] }
 0x12a   :  { %v461_v4 = vmax.f32 %v459_v55, %v460_v60  ;;  %v471_v5 = vmax.f32 %v435_v61, %v437_v62  ;;  %v647_v60 = vld [vmem:[%s1617_s9 + $0x18] sm:$0xff]  ;;  %v648_v62 = vld [vmem:[%s1617_s9 + $0x20] sm:$0xff] }
 0x12b   :  { %v468_v7 = vmax.f32 %v466_v58, %v467_v0  ;;  %v478_v8 = vmax.f32 %v436_v1, %v438_v2  ;;  %v1053_v61 = vpack.c.bf16 %v647_v60, %v646_v59  ;;  %v1056_v0 = vpack.c.bf16 %v649_v63, %v648_v62  ;;  %v650_v1 = vld [vmem:[%s1617_s9 + $0x30] sm:$0xff]  ;;  %v651_v2 = vld [vmem:[%s1617_s9 + $0x38] sm:$0xff] }
 0x12c   :  { %v462_v9 = vrot.slane %v461_v4, 1  ;;  %v472_v10 = vrot.slane %v471_v5, 4  ;;  %v1059_v3 = vpack.c.bf16 %v651_v2, %v650_v1 }
 0x12d   :  { %v469_v11 = vrot.slane %v468_v7, 1  ;;  %v479_v12 = vrot.slane %v478_v8, 4  ;;  %v406_v13 = vpop.f32.mrb[12].mxu0 }
 0x12e   :  { %v463_v15 = vmax.f32 %v461_v4, %v462_v9  ;;  %v473_v16 = vmax.f32 %v471_v5, %v472_v10  ;;  %v408_v18 = vpop.f32.mrb[13].mxu0  ;;  %v439_v26 = vadd.f32 %v1467_v23, %v406_v13  ;;  %v652_v4 = vld [vmem:[%s1617_s9 + $0x40] sm:$0xff]  ;;  %v653_v5 = vld [vmem:[%s1617_s9 + $0x48] sm:$0xff]  ;;  %v658_v13 = vld [vmem:[%s1617_s9 + $0x70] sm:$0xff] }
 0x12f   :  { %v470_v20 = vmax.f32 %v468_v7, %v469_v11  ;;  %v480_v21 = vmax.f32 %v478_v8, %v479_v12  ;;  %v410_v22 = vpop.f32.mrb[14].mxu0  ;;  %v440_v31 = vadd.f32 %v1469_v25, %v408_v18  ;;  %v1062_v6 = vpack.c.bf16 %v653_v5, %v652_v4  ;;  %v654_v7 = vld [vmem:[%s1617_s9 + $0x50] sm:$0xff]  ;;  %v655_v8 = vld [vmem:[%s1617_s9 + $0x58] sm:$0xff]  ;;  %v656_v10 = vld [vmem:[%s1617_s9 + $0x60] sm:$0xff] }
 0x130   :  { %v474_v24 = vrot.slane %v473_v16, 2  ;;  %v441_v27 = vadd.f32 %v1467_v23, %v410_v22  ;;  %v412_v28 = vpop.f32.mrb[15].mxu0  ;;  %v547_v29 = vsel %vm546_vm1, %v463_v15, %v449_v14  ;;  %v1065_v9 = vpack.c.bf16 %v655_v8, %v654_v7  ;;  %v657_v11 = vld [vmem:[%s1617_s9 + $0x68] sm:$0xff]  ;;  %v659_v14 = vld [vmem:[%s1617_s9 + $0x78] sm:$0xff]  ;;  %v895_v22 = vld [vmem:[%s1615_s7] ss:$0 sm:$0xff] }
 0x131   :  { %v481_v30 = vrot.slane %v480_v21, 2  ;;  %v442_v32 = vadd.f32 %v1469_v25, %v412_v28  ;;  %v552_v33 = vsel %vm546_vm1, %v470_v20, %v456_v19  ;;  %v1068_v12 = vpack.c.bf16 %v657_v11, %v656_v10  ;;  %v894_v19 = vld [vmem:[%s1614_s6] ss:$0 sm:$0xff] }
 0x132   :  { %v475_v34 = vmax.f32 %v473_v16, %v474_v24  ;;  %v485_v35 = vmax.f32 %v439_v26, %v441_v27  ;;  %v1071_v15 = vpack.c.bf16 %v659_v14, %v658_v13  ;;  %v1177_v16 = vmov 0.0   ;;  %v896_v26 = vld [vmem:[%s1616_s8] ss:$0 sm:$0xff] }
 0x133   :  { %v482_v36 = vmax.f32 %v480_v21, %v481_v30  ;;  %v492_v37 = vmax.f32 %v440_v31, %v442_v32  ;;  %v754_v28 = vld [vmem:[%s1621_s13] sm:$0xff] }
 0x134   :  { %v476_v38 = vrot.slane %v475_v34, 1  ;;  %v486_v39 = vrot.slane %v485_v35, 4 }
 0x135   :  { %v493_v40 = vrot.slane %v492_v37, 4  ;;  %v483_v41 = vrot.slane %v482_v36, 1 }
 0x136   :  { %v487_v23 = vmax.f32 %v485_v35, %v486_v39  ;;  %v477_v42 = vmax.f32 %v475_v34, %v476_v38  ;;  %v757_v34 = vld [vmem:[%s1621_s13 + $0x18] sm:$0xff]  ;;  %v760_v39 = vld [vmem:[%s1621_s13 + $0x30] sm:$0xff] }
 0x137   :  { %v494_v43 = vmax.f32 %v492_v37, %v493_v40  ;;  %v484_v44 = vmax.f32 %v482_v36, %v483_v41  ;;  %v758_v36 = vld [vmem:[%s1621_s13 + $0x20] sm:$0xff]  ;;  %v759_v37 = vld [vmem:[%s1621_s13 + $0x28] sm:$0xff]  ;;  %v761_v40 = vld [vmem:[%s1621_s13 + $0x38] sm:$0xff] }
 0x138   :  { %v488_v45 = vrot.slane %v487_v23, 2  ;;  %v549_v46 = vsel %vm548_vm2, %v477_v42, %v547_v29  ;;  %v755_v29 = vld [vmem:[%s1621_s13 + $0x8] sm:$0xff]  ;;  %v1080_v38 = vpack.c.bf16 %v759_v37, %v758_v36  ;;  %v1083_v41 = vpack.c.bf16 %v761_v40, %v760_v39 }
 0x139   :  { %v495_v47 = vrot.slane %v494_v43, 2  ;;  %v553_v48 = vsel %vm548_vm2, %v484_v44, %v552_v33  ;;  %v1074_v31 = vpack.c.bf16 %v755_v29, %v754_v28  ;;  %v756_v33 = vld [vmem:[%s1621_s13 + $0x10] sm:$0xff] }
 0x13a   :  { %v489_v25 = vmax.f32 %v487_v23, %v488_v45  ;;  %v1077_v35 = vpack.c.bf16 %v757_v34, %v756_v33  ;;  %v897_v23 = vld [vmem:[%s1618_s10] ss:$0 sm:$0xff]  ;;  %s1178_s10 = smov [#allocation2]  }
 0x13b   :  { %v496_v49 = vmax.f32 %v494_v43, %v495_v47  ;;  %v898_v43 = vld [vmem:[%s1619_s11] ss:$0 sm:$0xff]  ;;  %s850_s9 = sshll.u32 %s1178_s10, 4  ;;  %s851_s9 = int_to_ptr.vmem [resolvable:$true] %s850_s9 }
 0x13c   :  { %v490_v50 = vrot.slane %v489_v25, 1  ;;  %v899_v45 = vld [vmem:[%s1620_s12] ss:$0 sm:$0xff]  ;;  %s1150_s11 = scalar_lea.vmem %s851_s9, 64  ;;  %p1155_p1 = scmp.lt.s32.totalorder %s851_s9, %s851_s9 }
 0x13d   :  { %v497_v51 = vrot.slane %v496_v49, 1  ;;  %p1151_p0 = scmp.ne.s32.totalorder %s851_s9, %s1150_s11  ;;  %p1156_p2 = scmp.lt.s32.totalorder %s1150_s11, %s1150_s11 }
 0x13e   :  { %v491_v54 = vmax.f32 %v489_v25, %v490_v50  ;;  %v900_v25 = vld [vmem:[%s1622_s14] ss:$0 sm:$0xff] }
 0x13f   :  { %v498_v55 = vmax.f32 %v496_v49, %v497_v51  ;;  %p1157_p3 = por %p1156_p2, %p1155_p1 }
 0x140   :  { %v551_v56 = vsel %vm550_vm3, %v491_v54, %v549_v46 }
 0x141   :  { %v554_v58 = vsel %vm550_vm3, %v498_v55, %v553_v48  ;;  %p1158_p4 = pnand %p1157_p3, %p1151_p0 }
 0x142   :  { %621 = vmatprep.mubr.f32.mxu1 %v554_v58 }
 0x143   :  { %622 = vmatmul.mubr.f32.vlgmr.msra.gmra.mrb[0].mxu1 %v551_v56 }
 0x144   :  { %1051 = vmatpush3.bf16.msra.mxu1 %v1050_v57  ;;  %995 = vmatprep.mubr.msk.f32.mxu1 %vm1176_vm4, %v1177_v16 }
 0x145   :  { %1052 = vmatprep.subr.bf16.mxu1 %v1175_v17 }
 0x148   :  { %1054 = vmatpush3.bf16.msra.mxu1 %v1053_v61 }
 0x149   :  { %1055 = vmatprep.subr.bf16.mxu1 %v1175_v17 }
 0x14c   :  { %1057 = vmatpush3.bf16.msra.mxu1 %v1056_v0 }
 0x14d   :  { %1058 = vmatprep.subr.bf16.mxu1 %v1175_v17 }
 0x150   :  { %1060 = vmatpush3.bf16.msra.mxu1 %v1059_v3 }
 0x151   :  { %1061 = vmatprep.subr.bf16.mxu1 %v1175_v17 }
 0x154   :  { %1063 = vmatpush3.bf16.msra.mxu1 %v1062_v6 }
 0x155   :  { %1064 = vmatprep.subr.bf16.mxu1 %v1175_v17 }
 0x158   :  { %1066 = vmatpush3.bf16.msra.mxu1 %v1065_v9 }
 0x159   :  { %1067 = vmatprep.subr.bf16.mxu1 %v1175_v17 }
 0x15c   :  { %1069 = vmatpush3.bf16.msra.mxu1 %v1068_v12 }
 0x15d   :  { %1070 = vmatprep.subr.bf16.mxu1 %v1175_v17 }
 0x160   :  { %1072 = vmatpush3.bf16.msra.mxu1 %v1071_v15 }
 0x161   :  { %1073 = vmatprep.subr.bf16.mxu1 %v1175_v17 }
 0x216   :  { %v934_v18 = vpop.f32.mrb[0].mxu1 }
 0x217   :  { %v935_v20 = vpop.f32.mrb[1].mxu1 }
 0x218   :  { %v936_v21 = vadd.f32 %v935_v20, %v934_v18 }
 0x21a   :  { %v624_v24 = vadd.f32 %v936_v21, %v894_v19 }
 0x21c   :  { %v634_v27 = vmul.f32 %v895_v22, %v624_v24 }
 0x21e   :  { %v642_v30 = vadd.f32 %v896_v26, %v634_v27 }
 0x220   :  { %v643_v32 = vmax.f32 %v642_v30, 0.0 }
 0x222   :  { %996 = vmatmul.mubr.f32.vlgmr.msra.gmra.mrb[2].mxu1 %v643_v32 }
 0x223   :  { %1075 = vmatpush3.bf16.msra.mxu1 %v1074_v31  ;;  %1014 = vmatprep.mubr.msk.f32.mxu1 %vm1176_vm4, %v1177_v16 }
 0x224   :  { %1076 = vmatprep.subr.bf16.mxu1 %v1175_v17 }
 0x227   :  { %1078 = vmatpush3.bf16.msra.mxu1 %v1077_v35 }
 0x228   :  { %1079 = vmatprep.subr.bf16.mxu1 %v1175_v17 }
 0x22b   :  { %1081 = vmatpush3.bf16.msra.mxu1 %v1080_v38 }
 0x22c   :  { %1082 = vmatprep.subr.bf16.mxu1 %v1175_v17 }
 0x22f   :  { %1084 = vmatpush3.bf16.msra.mxu1 %v1083_v41 }
 0x2f5   :  { %v733_v42 = vpop.f32.mrb[2].mxu1 }
 0x2f6   :  { %v734_v17 = vadd.f32 %v897_v23, %v733_v42  ;;  %v997_v44 = vpop.f32.mrb[3].mxu1 }
 0x2f8   :  { %v744_v46 = vmul.f32 %v898_v43, %v734_v17 }
 0x2fa   :  { %v752_v47 = vadd.f32 %v899_v45, %v744_v46 }
 0x2fc   :  { %v753_v48 = vmax.f32 %v752_v47, 0.0 }
 0x2fe   :  { %1015 = vmatmul.mubr.msk.f32.vlgmr.msra.gmra.mrb[4].mxu1 %vm329_vm0, %v753_v48 }
 0x3d1   :  { %v838_v49 = vpop.f32.mrb[4].mxu1 }
 0x3d2   :  { %v839_v50 = vadd.f32 %v900_v25, %v838_v49  ;;  %v1016_v51 = vpop.f32.mrb[5].mxu1 }
 0x3d4   :  { %843 = vst.msk [vmem:[#allocation2] sm:$0xf] %vm842_vm5, %v839_v50 }
 0x3d5   :  { %1161 = shalt.err (!%p1158_p4)
}
 0x3d6   :  { %s1162_s22 = scalar_lea.hbm %s1623_s15, 64 }
 0x3d7   :  { %p1163_p5 = scmp.ne.s32.totalorder %s1623_s15, %s1162_s22  ;;  %p1166_p6 = scmp.lt.u32.totalorder %s1162_s22, %s1623_s15 }
 0x3d9   :  { %p1168_p7 = pnand %p1166_p6, %p1163_p5 }
 0x3db   :  { %1171 = shalt.err (!%p1168_p7)
}
 0x3dc   :  { %853 = dma.vmem_to_hbm [thread:$0]  %s851_s9, 64, %s1623_s15, [#allocation3]  }
 0x3dd   :  { %1172 = dma.done.wait [#allocation3], 64  }
 0x3de   :  { %1173 = vsyncadd [#allocation3], 4294967232 }
 0x3df   :  { %857 = vsyncpa [#allocation3], 1 }

</bundles_post_ra>
